<compile_context>
chip_gen: v7x
topology: tpu7x:2x2x1
jax: 0.10.0
libtpu: 0.0.40
codegen_flags: <defaults>
</compile_context>

<pallas_src>
import functools

import numpy as np
import jax
import jax.numpy as jnp
from jax import lax
from jax.experimental import pallas as pl
from jax.experimental.pallas import tpu as pltpu

# ----------------------------- model hyper-params (small) -----------------------
C_IMG = 3
H_IMG = W_IMG = 16
C_OBJ = 19
N_PAIR = 33
C_PAIR_EMBED = 8
MAX_STEP = 4
MAX_LENGTH = MAX_STEP + 1            # 5
C_HIDDEN = [64, 32]                  # FCBlocks hidden sizes; rnn hidden = 32
FC_IMG_EN = [32, 32]
FC_FUSION = [32, 32]
N_OBJ = 10                           # objects in init_desc (before no_obj append)

# encoder: concat(init, fin) -> conv(6->8, k3 s2 p1) -> relu -> conv(8->16, k3 s2 p1) -> relu
ENC_C1, ENC_C2 = 8, 16
H_ENC1, W_ENC1 = H_IMG // 2, W_IMG // 2        # 8, 8
H_ENC2, W_ENC2 = H_IMG // 4, W_IMG // 4        # 4, 4
K1 = 2 * C_IMG * 9                             # 54   (conv1 patch length)
S1 = H_ENC1 * W_ENC1                           # 64   (conv1 spatial positions)
S2 = H_ENC2 * W_ENC2                           # 16   (conv2 spatial positions)
C1_FLAT = ENC_C1 * S1                          # 512  (flat conv1 activation)
FC_IN = ENC_C2 * S2                            # 256

VMEM = pl.BlockSpec(memory_space=pltpu.MemorySpace.VMEM)


# ----------------------------- Pallas kernel 1: conv1 ----------------------------
def _conv1_kernel(colsT_ref, w_ref, b_ref, o_ref):
    # (Cout, K) @ (K, B*Ho*Wo) + b -> relu.  Transposed so the OUTPUT is lane-dense
    # (last dim = B*Ho*Wo = 128), i.e. an unmasked full-width store.
    o_ref[...] = jnp.maximum(
        jnp.dot(w_ref[...], colsT_ref[...], preferred_element_type=jnp.float32)
        + b_ref[...], 0.0)


def conv1_pallas(colsT, w_t, b_col):
    c1, k = w_t.shape
    m = colsT.shape[1]
    return pl.pallas_call(
        _conv1_kernel,
        out_shape=jax.ShapeDtypeStruct((c1, m), jnp.float32),
        in_specs=[VMEM] * 3,
        out_specs=VMEM,
        compiler_params=pltpu.CompilerParams(vmem_limit_bytes=2 * 1024 * 1024),
        cost_estimate=pl.CostEstimate(
            flops=2 * c1 * k * m, transcendentals=0,
            bytes_accessed=4 * (k * m + c1 * k + c1 + c1 * m)),
    )(colsT, w_t, b_col)


# --------------- Pallas kernel 2: conv2 + FC head + full 5-step decode loop ------
def _sigmoid(x):
    return 1.0 / (1.0 + jnp.exp(-x))


def _fused_kernel(
        y1_ref, wfold_ref, b2_ref, wfc1_ref, bfc1_ref, wfc2_ref, bfc2_ref,
        descT_ref, descF_ref, gbias_ref, obj0_ref, pair0_ref,
        wgo_ref, wgp_ref, wgh_ref, bg_ref, wgn_ref, bgn_ref,
        wobjT_ref, bobj_ref, wi1_ref, bi1_ref, wi2_ref, bi2_ref,
        wfh_ref, wfo_ref, bf1_ref, wf2_ref, bf2_ref, wp_ref, bp_ref,
        emb_ref, splace_ref, pplace_ref,
        out_ref, *, hidden, steps):
    dot = functools.partial(jnp.dot, preferred_element_type=jnp.float32)
    relu = lambda v: jnp.maximum(v, 0.0)
    H = hidden

    # ---- load everything once; weights stay VMEM/vreg resident across all steps --
    wfold, b2 = wfold_ref[...], b2_ref[...]
    wfc1, bfc1, wfc2, bfc2 = wfc1_ref[...], bfc1_ref[...], wfc2_ref[...], bfc2_ref[...]
    descF, gbias = descF_ref[...], gbias_ref[...]
    wgo, wgp, wgh, bg = wgo_ref[...], wgp_ref[...], wgh_ref[...], bg_ref[...]
    wgn, bgn = wgn_ref[...], bgn_ref[...]
    wi1, bi1, wi2, bi2 = wi1_ref[...], bi1_ref[...], wi2_ref[...], bi2_ref[...]
    wfh, wfo, bf1 = wfh_ref[...], wfo_ref[...], bf1_ref[...]
    wf2, bf2, wp, bp = wf2_ref[...], bf2_ref[...], wp_ref[...], bp_ref[...]
    emb, splace, pplace = emb_ref[...], splace_ref[...], pplace_ref[...]

    # ---- compute_h0: conv2 (folded into one dense 512->256 matmul) + FCBlocks ----
    feat = relu(dot(y1_ref[...], wfold) + b2)                 # (B, 256)
    h = relu(dot(feat, wfc1) + bfc1)                          # (B, c_hidden[0])
    h = relu(dot(h, wfc2) + bfc2)                             # (B, H)  == h0

    # ---- per-object encodings: constant across decode steps, computed once ------
    encT = relu(dot(wobjT_ref[...], descT_ref[...]) + bobj_ref[...])   # (E, B*N1)

    B, BN = gbias.shape
    NP1 = bp.shape[1]
    obj_iota = lax.broadcasted_iota(jnp.int32, (B, BN), 1)
    pair_iota = lax.broadcasted_iota(jnp.int32, (B, NP1), 1)

    obj = obj0_ref[...]                                       # (B, C_OBJ)
    pair = pair0_ref[...]                                     # (B, C_PAIR_EMBED)

    # 5 decode steps, statically unrolled; h / obj / pair never touch HBM.
    for t in range(steps):
        # --- GRU cell (PyTorch gate order r, z, n), merged b_ih + b_hh bias;
        #     gate matmul in one fused pass, split per operand (obj / pair / h)
        #     to avoid an in-kernel minor-dim concat relayout.                  ---
        g = dot(obj, wgo) + dot(pair, wgp) + dot(h, wgh) + bg   # gi + gh + biases
        ghn = dot(h, wgn) + bgn                                 # gh_n + b_hh_n
        r = _sigmoid(g[:, 0:H])
        z = _sigmoid(g[:, H:2 * H])
        n = jnp.tanh(g[:, 2 * H:3 * H] + (r - 1.0) * ghn)       # gi_n + r*gh_n
        h = (1.0 - z) * n + z * h

        # --- decoder: hidden-state encoder MLP ---
        img = relu(dot(h, wi1) + bi1)
        img = relu(dot(img, wi2) + bi2)                         # (B, E)

        # --- attention logits over all (batch, object) columns ---
        scores = dot(img, encT)                                 # (B, B*N1)

        # hard object selection restricted to own batch group
        # (first-max tie-break == argmax)
        masked = scores + gbias
        maxv = jnp.max(masked, axis=-1, keepdims=True)
        first = jnp.min(jnp.where(masked == maxv, obj_iota, BN),
                        axis=-1, keepdims=True)
        onehot = (obj_iota == first).astype(jnp.float32)
        obj = dot(onehot, descF)                                # (B, C_OBJ)

        # --- fusion MLP + pair classifier (concat expressed as split matmul) ---
        f = relu(dot(img, wfh) + dot(obj, wfo) + bf1)
        f = relu(dot(f, wf2) + bf2)
        plog = dot(f, wp) + bp                                  # (B, n_pair + 1)

        # --- lane-dense output row: [obj scores | pair logits | 0 pad] (width 128),
        #     built with tiny placement matmuls -> one unmasked full-width store ---
        out_ref[t] = dot(scores, splace) + dot(plog, pplace)

        # --- next pair input: embed_pair(pair_choice.argmax()), first-max one-hot ---
        pmax = jnp.max(plog, axis=-1, keepdims=True)
        pfirst = jnp.min(jnp.where(plog == pmax, pair_iota, NP1),
                         axis=-1, keepdims=True)
        ponehot = (pair_iota == pfirst).astype(jnp.float32)
        pair = dot(ponehot, emb)                                # (B, C_PAIR_EMBED)


# ----------------------------- parameters ---------------------------------------
def init_params(key):
    ks = jax.random.split(key, 28)
    n = lambda k, shape, s=0.1: s * jax.random.normal(k, shape, dtype=jnp.float32)
    H = C_HIDDEN[-1]
    c_in_rnn = C_OBJ + C_PAIR_EMBED
    # TODO(synk): `encoder`/`FCBlocks`/`TransformationDecoder` classes are not in the
    # provided source; their weights are synthesized with matching shapes.
    return {
        "conv1_w": n(ks[0], (ENC_C1, 2 * C_IMG, 3, 3)), "conv1_b": n(ks[1], (ENC_C1,)),
        "conv2_w": n(ks[2], (ENC_C2, ENC_C1, 3, 3)),    "conv2_b": n(ks[3], (ENC_C2,)),
        "fc1_w": n(ks[4], (FC_IN, C_HIDDEN[0])), "fc1_b": n(ks[5], (C_HIDDEN[0],)),
        "fc2_w": n(ks[6], (C_HIDDEN[0], H)),     "fc2_b": n(ks[7], (H,)),
        # context-encoder parameters (reset_parameters -> normal init)
        "no_obj": jax.random.normal(ks[8], (C_OBJ,), dtype=jnp.float32),
        "obj_init_input": jax.random.normal(ks[9], (C_OBJ,), dtype=jnp.float32),
        "pair_init_input": jax.random.normal(ks[10], (C_PAIR_EMBED,), dtype=jnp.float32),
        "embed_pair": n(ks[11], (N_PAIR + 3, C_PAIR_EMBED), 1.0),
        # GRU (PyTorch weight layout transposed to (in, 3H); gate order r, z, n)
        "gru_w_ih": n(ks[12], (c_in_rnn, 3 * H)), "gru_w_hh": n(ks[13], (H, 3 * H)),
        "gru_b_ih": n(ks[14], (3 * H,)),          "gru_b_hh": n(ks[15], (3 * H,)),
        # TransformationDecoder
        "dec_w_obj": n(ks[16], (C_OBJ, FC_IMG_EN[-1])), "dec_b_obj": n(ks[17], (FC_IMG_EN[-1],)),
        "dec_w_i1": n(ks[18], (H, FC_IMG_EN[0])),       "dec_b_i1": n(ks[19], (FC_IMG_EN[0],)),
        "dec_w_i2": n(ks[20], (FC_IMG_EN[0], FC_IMG_EN[1])), "dec_b_i2": n(ks[21], (FC_IMG_EN[1],)),
        "dec_w_fh": n(ks[22], (FC_IMG_EN[1], FC_FUSION[0])),
        "dec_w_fo": n(ks[23], (C_OBJ, FC_FUSION[0])),
        "dec_b_f1": n(ks[24], (FC_FUSION[0],)),
        "dec_w_f2": n(ks[25], (FC_FUSION[0], FC_FUSION[1])),
        "dec_b_f2": jnp.zeros((FC_FUSION[1],), jnp.float32),
        "dec_w_p": n(ks[26], (FC_FUSION[1], N_PAIR + 1)),
        "dec_b_p": jnp.zeros((N_PAIR + 1,), jnp.float32),
    }


def _conv2_as_fc(conv2_w):
    """Fold conv2 (k3 s2 p1 over the 8x8x8 conv1 activation) into one dense
    (512 -> 256) matrix.  Exact: conv + im2col are linear, and the im2col gather
    commutes with the relu already applied inside the conv1 kernel."""
    w2 = np.asarray(conv2_w)                                   # (C2, C1, 3, 3)
    wf = np.zeros((C1_FLAT, S2 * ENC_C2), np.float32)
    for sh in range(H_ENC2):
        for sw in range(W_ENC2):
            s = sh * W_ENC2 + sw
            for kh in range(3):
                h = 2 * sh - 1 + kh
                if h < 0 or h >= H_ENC1:
                    continue
                for kw in range(3):
                    w = 2 * sw - 1 + kw
                    if w < 0 or w >= W_ENC1:
                        continue
                    for c in range(ENC_C1):
                        i = c * S1 + h * W_ENC1 + w           # flat order (c, h, w)
                        wf[i, s * ENC_C2:(s + 1) * ENC_C2] += w2[:, c, kh, kw]
    return jnp.asarray(wf)


def pack_params(p):
    """Repack torch-style parameters into the layouts the fused kernels consume.
    Must be called eagerly (outside jit): the conv2->FC fold needs concrete weights."""
    H = C_HIDDEN[-1]
    return {
        # encoder
        "w1_t": p["conv1_w"].reshape(ENC_C1, K1),              # (8, 54)
        "b1_col": p["conv1_b"].reshape(ENC_C1, 1),
        "w_fold": _conv2_as_fc(p["conv2_w"]),                  # (512, 256)
        "b2_tiled": jnp.tile(p["conv2_b"], S2).reshape(1, S2 * ENC_C2),
        "fc1_w": p["fc1_w"], "fc1_b": p["fc1_b"].reshape(1, -1),
        "fc2_w": p["fc2_w"], "fc2_b": p["fc2_b"].reshape(1, -1),
        # context encoder
        "no_obj": p["no_obj"],
        "obj_init_input": p["obj_init_input"],
        "pair_init_input": p["pair_init_input"],
        "embed34": p["embed_pair"][:N_PAIR + 1],
        # GRU: merged biases; input matmul split per operand (obj / pair / h)
        "w_g_obj": p["gru_w_ih"][:C_OBJ],
        "w_g_pair": p["gru_w_ih"][C_OBJ:],
        "w_g_h": p["gru_w_hh"],
        "b_g": (p["gru_b_ih"] + p["gru_b_hh"]).reshape(1, -1),
        "w_g_hn": p["gru_w_hh"][:, 2 * H:3 * H],
        "b_g_hn": p["gru_b_hh"][2 * H:3 * H].reshape(1, -1),
        # decoder
        "w_objT": p["dec_w_obj"].T, "b_obj_col": p["dec_b_obj"].reshape(-1, 1),
        "w_i1": p["dec_w_i1"], "b_i1": p["dec_b_i1"].reshape(1, -1),
        "w_i2": p["dec_w_i2"], "b_i2": p["dec_b_i2"].reshape(1, -1),
        "w_fh": p["dec_w_fh"], "w_fo": p["dec_w_fo"], "b_f1": p["dec_b_f1"].reshape(1, -1),
        "w_f2": p["dec_w_f2"], "b_f2": p["dec_b_f2"].reshape(1, -1),
        "w_p": p["dec_w_p"], "b_p": p["dec_b_p"].reshape(1, -1),
    }


# ----------------------------- forward (eval-mode iterative path) ----------------
def trancenet_forward(pp, init, fin, init_desc):
    B = init.shape[0]
    H = C_HIDDEN[-1]
    N1 = init_desc.shape[1] + 1                   # objects + learned "no object"
    NP1 = N_PAIR + 1
    BN = B * N1
    ROW_W = ((BN + NP1 + 127) // 128) * 128       # lane-dense output row width

    # ---- compute_h0, conv1: im2col in XLA, lane-dense transposed matmul in Pallas
    x = jnp.concatenate([init, fin], axis=1)                                 # (B,6,16,16)
    p1 = lax.conv_general_dilated_patches(x, (3, 3), (2, 2), [(1, 1), (1, 1)])
    # Default NCHW/OIHW dim numbers => patch features ordered (c_in, kh, kw), which
    # matches conv_w.reshape(C_out, C_in*kh*kw).
    colsT = jnp.transpose(p1, (1, 0, 2, 3)).reshape(K1, B * S1)               # (54, B*64)
    y1T = conv1_pallas(colsT, pp["w1_t"], pp["b1_col"])                       # (8, B*64), post-relu
    # flatten to per-batch rows in (c, h, w) order — matches the conv2->FC fold
    y1_flat = jnp.transpose(y1T.reshape(ENC_C1, B, S1), (1, 0, 2)).reshape(B, C1_FLAT)

    # ---- descriptors / constants in the layouts the fused kernel wants ----------
    desc = jnp.concatenate(
        [init_desc, jnp.broadcast_to(pp["no_obj"][None, None, :], (B, 1, C_OBJ))], axis=1)
    descF = desc.reshape(BN, C_OBJ)
    descT = descF.T                                                           # (C_OBJ, BN)
    own = (jnp.arange(BN)[None, :] // N1) == jnp.arange(B)[:, None]
    gbias = jnp.where(own, 0.0, -1e30).astype(jnp.float32)                    # (B, BN)
    obj0 = jnp.broadcast_to(pp["obj_init_input"][None, :], (B, C_OBJ))
    pair0 = jnp.broadcast_to(pp["pair_init_input"][None, :], (B, C_PAIR_EMBED))
    splace = jnp.eye(BN, ROW_W, dtype=jnp.float32)                 # scores -> lanes [0, BN)
    pplace = jnp.eye(NP1, ROW_W, k=BN, dtype=jnp.float32)          # logits -> lanes [BN, BN+NP1)

    args = (y1_flat, pp["w_fold"], pp["b2_tiled"],
            pp["fc1_w"], pp["fc1_b"], pp["fc2_w"], pp["fc2_b"],
            descT, descF, gbias, obj0, pair0,
            pp["w_g_obj"], pp["w_g_pair"], pp["w_g_h"], pp["b_g"],
            pp["w_g_hn"], pp["b_g_hn"],
            pp["w_objT"], pp["b_obj_col"],
            pp["w_i1"], pp["b_i1"], pp["w_i2"], pp["b_i2"],
            pp["w_fh"], pp["w_fo"], pp["b_f1"], pp["w_f2"], pp["b_f2"],
            pp["w_p"], pp["b_p"], pp["embed34"], splace, pplace)

    flops = int(
        2 * B * (C1_FLAT * FC_IN + FC_IN * C_HIDDEN[0] + C_HIDDEN[0] * H)
        + 2 * FC_IMG_EN[-1] * C_OBJ * BN
        + MAX_LENGTH * 2 * B * (
            (C_OBJ + C_PAIR_EMBED + H) * 3 * H + H * H                 # GRU
            + H * FC_IMG_EN[0] + FC_IMG_EN[0] * FC_IMG_EN[1]           # img MLP
            + FC_IMG_EN[1] * BN + BN * C_OBJ                           # attention + select
            + FC_IMG_EN[1] * FC_FUSION[0] + C_OBJ * FC_FUSION[0]       # fusion
            + FC_FUSION[0] * FC_FUSION[1] + FC_FUSION[1] * NP1         # pair head
            + NP1 * C_PAIR_EMBED + (BN + NP1) * ROW_W))                # embed + placement
    bytes_acc = int(4 * (sum(a.size for a in args) + MAX_LENGTH * B * ROW_W))

    # TODO(synk): if B grows beyond a few hundred, add a leading "parallel" batch grid
    # axis (dimension_semantics=("parallel","arbitrary")) so megacore/v7x splits it.
    slab = pl.pallas_call(
        functools.partial(_fused_kernel, hidden=H, steps=MAX_LENGTH),
        out_shape=jax.ShapeDtypeStruct((MAX_LENGTH, B, ROW_W), jnp.float32),
        in_specs=[VMEM] * len(args),
        out_specs=VMEM,
        compiler_params=pltpu.CompilerParams(vmem_limit_bytes=8 * 1024 * 1024),
        cost_estimate=pl.CostEstimate(
            flops=flops, transcendentals=int(3 * H * B * MAX_LENGTH),
            bytes_accessed=bytes_acc),
    )(*args)

    # ---- un-pack the lane-dense output slab -------------------------------------
    scores = slab[:, :, :BN].reshape(MAX_LENGTH, B, B, N1)
    bidx = jnp.arange(B)
    obj_choice = jnp.transpose(scores[:, bidx, bidx, :], (1, 0, 2))           # (B, L, N1)
    pair_choice = jnp.transpose(slab[:, :, BN:BN + NP1], (1, 0, 2))           # (B, L, NP1)
    return {"obj_choice": obj_choice, "pair_choice": pair_choice}


# ----------------------------- main ----------------------------------------------
if __name__ == "__main__":
    key = jax.random.PRNGKey(0)
    kp, k1, k2, k3 = jax.random.split(key, 4)
    params = init_params(kp)
    pp = pack_params(params)                     # eager: folds conv2 into a dense matrix

    B = 2
    init = jax.random.normal(k1, (B, C_IMG, H_IMG, W_IMG), dtype=jnp.float32)
    fin = jax.random.normal(k2, (B, C_IMG, H_IMG, W_IMG), dtype=jnp.float32)
    init_desc = jax.random.normal(k3, (B, N_OBJ, C_OBJ), dtype=jnp.float32)

    fwd = jax.jit(trancenet_forward)
    out = fwd(pp, init, fin, init_desc)
    jax.block_until_ready(out)

    assert out["obj_choice"].shape == (B, MAX_LENGTH, N_OBJ + 1)
    assert out["pair_choice"].shape == (B, MAX_LENGTH, N_PAIR + 1)
    assert bool(jnp.all(jnp.isfinite(out["obj_choice"])))
    assert bool(jnp.all(jnp.isfinite(out["pair_choice"])))
    print("KERNEL_OK")
</pallas_src>

<mosaic_0001>
module attributes {stable_mosaic.version = 11 : i64} {
  func.func @_conv1_kernel(%arg0: memref<54x128xf32, #tpu.memory_space<vmem>>, %arg1: memref<8x54xf32, #tpu.memory_space<vmem>>, %arg2: memref<8x1xf32, #tpu.memory_space<vmem>>, %arg3: memref<8x128xf32, #tpu.memory_space<vmem>>) attributes {dimension_semantics = [], scalar_prefetch = 0 : i64, scratch_operands = 0 : i64, tpu.core_type = #tpu.core_type<tc>} {
    %c0 = arith.constant 0 : index
    %c0_0 = arith.constant 0 : index
    %0 = vector.load %arg1[%c0, %c0_0] : memref<8x54xf32, #tpu.memory_space<vmem>>, vector<8x54xf32>
    %c0_1 = arith.constant 0 : index
    %c0_2 = arith.constant 0 : index
    %1 = vector.load %arg0[%c0_1, %c0_2] : memref<54x128xf32, #tpu.memory_space<vmem>>, vector<54x128xf32>
    %cst = arith.constant dense<0.000000e+00> : vector<8x128xf32>
    %2 = tpu.matmul %0, %1, %cst {dimension_numbers = #tpu.dot_dimension_numbers<[1], [0], [0], [1], [0, 0, 1, 1], [], []>} : vector<8x54xf32>, vector<54x128xf32>, vector<8x128xf32> -> vector<8x128xf32>
    %c0_3 = arith.constant 0 : index
    %c0_4 = arith.constant 0 : index
    %3 = vector.load %arg2[%c0_3, %c0_4] : memref<8x1xf32, #tpu.memory_space<vmem>>, vector<8x1xf32>
    %4 = vector.broadcast %3 : vector<8x1xf32> to vector<8x128xf32>
    %5 = arith.addf %2, %4 : vector<8x128xf32>
    %cst_5 = arith.constant 0.000000e+00 : f32
    %6 = vector.broadcast %cst_5 : f32 to vector<8x128xf32>
    %7 = arith.maximumf %5, %6 : vector<8x128xf32>
    %c0_6 = arith.constant 0 : index
    %c0_7 = arith.constant 0 : index
    %8 = vector.load %arg3[%c0_6, %c0_7] : memref<8x128xf32, #tpu.memory_space<vmem>>, vector<8x128xf32>
    tpu.vector_store %arg3[%c0_6, %c0_7], %7 {strides = array<i32>} : memref<8x128xf32, #tpu.memory_space<vmem>>, vector<8x128xf32>,
    return
  }
}

module attributes {stable_mosaic.version = 11 : i64} {
  func.func @_fused_kernel(%arg0: memref<2x512xf32, #tpu.memory_space<vmem>>, %arg1: memref<512x256xf32, #tpu.memory_space<vmem>>, %arg2: memref<1x256xf32, #tpu.memory_space<vmem>>, %arg3: memref<256x64xf32, #tpu.memory_space<vmem>>, %arg4: memref<1x64xf32, #tpu.memory_space<vmem>>, %arg5: memref<64x32xf32, #tpu.memory_space<vmem>>, %arg6: memref<1x32xf32, #tpu.memory_space<vmem>>, %arg7: memref<19x22xf32, #tpu.memory_space<vmem>>, %arg8: memref<22x19xf32, #tpu.memory_space<vmem>>, %arg9: memref<2x22xf32, #tpu.memory_space<vmem>>, %arg10: memref<2x19xf32, #tpu.memory_space<vmem>>, %arg11: memref<2x8xf32, #tpu.memory_space<vmem>>, %arg12: memref<19x96xf32, #tpu.memory_space<vmem>>, %arg13: memref<8x96xf32, #tpu.memory_space<vmem>>, %arg14: memref<32x96xf32, #tpu.memory_space<vmem>>, %arg15: memref<1x96xf32, #tpu.memory_space<vmem>>, %arg16: memref<32x32xf32, #tpu.memory_space<vmem>>, %arg17: memref<1x32xf32, #tpu.memory_space<vmem>>, %arg18: memref<32x19xf32, #tpu.memory_space<vmem>>, %arg19: memref<32x1xf32, #tpu.memory_space<vmem>>, %arg20: memref<32x32xf32, #tpu.memory_space<vmem>>, %arg21: memref<1x32xf32, #tpu.memory_space<vmem>>, %arg22: memref<32x32xf32, #tpu.memory_space<vmem>>, %arg23: memref<1x32xf32, #tpu.memory_space<vmem>>, %arg24: memref<32x32xf32, #tpu.memory_space<vmem>>, %arg25: memref<19x32xf32, #tpu.memory_space<vmem>>, %arg26: memref<1x32xf32, #tpu.memory_space<vmem>>, %arg27: memref<32x32xf32, #tpu.memory_space<vmem>>, %arg28: memref<1x32xf32, #tpu.memory_space<vmem>>, %arg29: memref<32x34xf32, #tpu.memory_space<vmem>>, %arg30: memref<1x34xf32, #tpu.memory_space<vmem>>, %arg31: memref<34x8xf32, #tpu.memory_space<vmem>>, %arg32: memref<22x128xf32, #tpu.memory_space<vmem>>, %arg33: memref<34x128xf32, #tpu.memory_space<vmem>>, %arg34: memref<5x2x128xf32, #tpu.memory_space<vmem>>) attributes {dimension_semantics = [], scalar_prefetch = 0 : i64, scratch_operands = 0 : i64, tpu.core_type = #tpu.core_type<tc>} {
    %c0 = arith.constant 0 : index
    %c0_0 = arith.constant 0 : index
    %0 = vector.load %arg1[%c0, %c0_0] : memref<512x256xf32, #tpu.memory_space<vmem>>, vector<512x256xf32>
    %c0_1 = arith.constant 0 : index
    %c0_2 = arith.constant 0 : index
    %1 = vector.load %arg2[%c0_1, %c0_2] : memref<1x256xf32, #tpu.memory_space<vmem>>, vector<1x256xf32>
    %c0_3 = arith.constant 0 : index
    %c0_4 = arith.constant 0 : index
    %2 = vector.load %arg3[%c0_3, %c0_4] : memref<256x64xf32, #tpu.memory_space<vmem>>, vector<256x64xf32>
    %c0_5 = arith.constant 0 : index
    %c0_6 = arith.constant 0 : index
    %3 = vector.load %arg4[%c0_5, %c0_6] : memref<1x64xf32, #tpu.memory_space<vmem>>, vector<1x64xf32>
    %c0_7 = arith.constant 0 : index
    %c0_8 = arith.constant 0 : index
    %4 = vector.load %arg5[%c0_7, %c0_8] : memref<64x32xf32, #tpu.memory_space<vmem>>, vector<64x32xf32>
    %c0_9 = arith.constant 0 : index
    %c0_10 = arith.constant 0 : index
    %5 = vector.load %arg6[%c0_9, %c0_10] : memref<1x32xf32, #tpu.memory_space<vmem>>, vector<1x32xf32>
    %c0_11 = arith.constant 0 : index
    %c0_12 = arith.constant 0 : index
    %6 = vector.load %arg8[%c0_11, %c0_12] : memref<22x19xf32, #tpu.memory_space<vmem>>, vector<22x19xf32>
    %c0_13 = arith.constant 0 : index
    %c0_14 = arith.constant 0 : index
    %7 = vector.load %arg9[%c0_13, %c0_14] : memref<2x22xf32, #tpu.memory_space<vmem>>, vector<2x22xf32>
    %c0_15 = arith.constant 0 : index
    %c0_16 = arith.constant 0 : index
    %8 = vector.load %arg12[%c0_15, %c0_16] : memref<19x96xf32, #tpu.memory_space<vmem>>, vector<19x96xf32>
    %c0_17 = arith.constant 0 : index
    %c0_18 = arith.constant 0 : index
    %9 = vector.load %arg13[%c0_17, %c0_18] : memref<8x96xf32, #tpu.memory_space<vmem>>, vector<8x96xf32>
    %c0_19 = arith.constant 0 : index
    %c0_20 = arith.constant 0 : index
    %10 = vector.load %arg14[%c0_19, %c0_20] : memref<32x96xf32, #tpu.memory_space<vmem>>, vector<32x96xf32>
    %c0_21 = arith.constant 0 : index
    %c0_22 = arith.constant 0 : index
    %11 = vector.load %arg15[%c0_21, %c0_22] : memref<1x96xf32, #tpu.memory_space<vmem>>, vector<1x96xf32>
    %c0_23 = arith.constant 0 : index
    %c0_24 = arith.constant 0 : index
    %12 = vector.load %arg16[%c0_23, %c0_24] : memref<32x32xf32, #tpu.memory_space<vmem>>, vector<32x32xf32>
    %c0_25 = arith.constant 0 : index
    %c0_26 = arith.constant 0 : index
    %13 = vector.load %arg17[%c0_25, %c0_26] : memref<1x32xf32, #tpu.memory_space<vmem>>, vector<1x32xf32>
    %c0_27 = arith.constant 0 : index
    %c0_28 = arith.constant 0 : index
    %14 = vector.load %arg20[%c0_27, %c0_28] : memref<32x32xf32, #tpu.memory_space<vmem>>, vector<32x32xf32>
    %c0_29 = arith.constant 0 : index
    %c0_30 = arith.constant 0 : index
    %15 = vector.load %arg21[%c0_29, %c0_30] : memref<1x32xf32, #tpu.memory_space<vmem>>, vector<1x32xf32>
    %c0_31 = arith.constant 0 : index
    %c0_32 = arith.constant 0 : index
    %16 = vector.load %arg22[%c0_31, %c0_32] : memref<32x32xf32, #tpu.memory_space<vmem>>, vector<32x32xf32>
    %c0_33 = arith.constant 0 : index
    %c0_34 = arith.constant 0 : index
    %17 = vector.load %arg23[%c0_33, %c0_34] : memref<1x32xf32, #tpu.memory_space<vmem>>, vector<1x32xf32>
    %c0_35 = arith.constant 0 : index
    %c0_36 = arith.constant 0 : index
    %18 = vector.load %arg24[%c0_35, %c0_36] : memref<32x32xf32, #tpu.memory_space<vmem>>, vector<32x32xf32>
    %c0_37 = arith.constant 0 : index
    %c0_38 = arith.constant 0 : index
    %19 = vector.load %arg25[%c0_37, %c0_38] : memref<19x32xf32, #tpu.memory_space<vmem>>, vector<19x32xf32>
    %c0_39 = arith.constant 0 : index
    %c0_40 = arith.constant 0 : index
    %20 = vector.load %arg26[%c0_39, %c0_40] : memref<1x32xf32, #tpu.memory_space<vmem>>, vector<1x32xf32>
    %c0_41 = arith.constant 0 : index
    %c0_42 = arith.constant 0 : index
    %21 = vector.load %arg27[%c0_41, %c0_42] : memref<32x32xf32, #tpu.memory_space<vmem>>, vector<32x32xf32>
    %c0_43 = arith.constant 0 : index
    %c0_44 = arith.constant 0 : index
    %22 = vector.load %arg28[%c0_43, %c0_44] : memref<1x32xf32, #tpu.memory_space<vmem>>, vector<1x32xf32>
    %c0_45 = arith.constant 0 : index
    %c0_46 = arith.constant 0 : index
    %23 = vector.load %arg29[%c0_45, %c0_46] : memref<32x34xf32, #tpu.memory_space<vmem>>, vector<32x34xf32>
    %c0_47 = arith.constant 0 : index
    %c0_48 = arith.constant 0 : index
    %24 = vector.load %arg30[%c0_47, %c0_48] : memref<1x34xf32, #tpu.memory_space<vmem>>, vector<1x34xf32>
    %c0_49 = arith.constant 0 : index
    %c0_50 = arith.constant 0 : index
    %25 = vector.load %arg31[%c0_49, %c0_50] : memref<34x8xf32, #tpu.memory_space<vmem>>, vector<34x8xf32>
    %c0_51 = arith.constant 0 : index
    %c0_52 = arith.constant 0 : index
    %26 = vector.load %arg32[%c0_51, %c0_52] : memref<22x128xf32, #tpu.memory_space<vmem>>, vector<22x128xf32>
    %c0_53 = arith.constant 0 : index
    %c0_54 = arith.constant 0 : index
    %27 = vector.load %arg33[%c0_53, %c0_54] : memref<34x128xf32, #tpu.memory_space<vmem>>, vector<34x128xf32>
    %c0_55 = arith.constant 0 : index
    %c0_56 = arith.constant 0 : index
    %28 = vector.load %arg0[%c0_55, %c0_56] : memref<2x512xf32, #tpu.memory_space<vmem>>, vector<2x512xf32>
    %cst = arith.constant dense<0.000000e+00> : vector<2x256xf32>
    %29 = tpu.matmul %28, %0, %cst {dimension_numbers = #tpu.dot_dimension_numbers<[1], [0], [0], [1], [0, 0, 1, 1], [], []>} : vector<2x512xf32>, vector<512x256xf32>, vector<2x256xf32> -> vector<2x256xf32>
    %30 = vector.broadcast %1 : vector<1x256xf32> to vector<2x256xf32>
    %31 = arith.addf %29, %30 : vector<2x256xf32>
    %cst_57 = arith.constant 0.000000e+00 : f32
    %32 = vector.broadcast %cst_57 : f32 to vector<2x256xf32>
    %33 = arith.maximumf %31, %32 : vector<2x256xf32>
    %cst_58 = arith.constant dense<0.000000e+00> : vector<2x64xf32>
    %34 = tpu.matmul %33, %2, %cst_58 {dimension_numbers = #tpu.dot_dimension_numbers<[1], [0], [0], [1], [0, 0, 1, 1], [], []>} : vector<2x256xf32>, vector<256x64xf32>, vector<2x64xf32> -> vector<2x64xf32>
    %35 = vector.broadcast %3 : vector<1x64xf32> to vector<2x64xf32>
    %36 = arith.addf %34, %35 : vector<2x64xf32>
    %cst_59 = arith.constant 0.000000e+00 : f32
    %37 = vector.broadcast %cst_59 : f32 to vector<2x64xf32>
    %38 = arith.maximumf %36, %37 : vector<2x64xf32>
    %cst_60 = arith.constant dense<0.000000e+00> : vector<2x32xf32>
    %39 = tpu.matmul %38, %4, %cst_60 {dimension_numbers = #tpu.dot_dimension_numbers<[1], [0], [0], [1], [0, 0, 1, 1], [], []>} : vector<2x64xf32>, vector<64x32xf32>, vector<2x32xf32> -> vector<2x32xf32>
    %40 = vector.broadcast %5 : vector<1x32xf32> to vector<2x32xf32>
    %41 = arith.addf %39, %40 : vector<2x32xf32>
    %cst_61 = arith.constant 0.000000e+00 : f32
    %42 = vector.broadcast %cst_61 : f32 to vector<2x32xf32>
    %43 = arith.maximumf %41, %42 : vector<2x32xf32>
    %c0_62 = arith.constant 0 : index
    %c0_63 = arith.constant 0 : index
    %44 = vector.load %arg18[%c0_62, %c0_63] : memref<32x19xf32, #tpu.memory_space<vmem>>, vector<32x19xf32>
    %c0_64 = arith.constant 0 : index
    %c0_65 = arith.constant 0 : index
    %45 = vector.load %arg7[%c0_64, %c0_65] : memref<19x22xf32, #tpu.memory_space<vmem>>, vector<19x22xf32>
    %cst_66 = arith.constant dense<0.000000e+00> : vector<32x22xf32>
    %46 = tpu.matmul %44, %45, %cst_66 {dimension_numbers = #tpu.dot_dimension_numbers<[1], [0], [0], [1], [0, 0, 1, 1], [], []>} : vector<32x19xf32>, vector<19x22xf32>, vector<32x22xf32> -> vector<32x22xf32>
    %c0_67 = arith.constant 0 : index
    %c0_68 = arith.constant 0 : index
    %47 = vector.load %arg19[%c0_67, %c0_68] : memref<32x1xf32, #tpu.memory_space<vmem>>, vector<32x1xf32>
    %48 = vector.broadcast %47 : vector<32x1xf32> to vector<32x22xf32>
    %49 = arith.addf %46, %48 : vector<32x22xf32>
    %cst_69 = arith.constant 0.000000e+00 : f32
    %50 = vector.broadcast %cst_69 : f32 to vector<32x22xf32>
    %51 = arith.maximumf %49, %50 : vector<32x22xf32>
    %52 = tpu.iota {dimensions = array<i32: 1>} : vector<2x22xi32>
    %53 = tpu.iota {dimensions = array<i32: 1>} : vector<2x34xi32>
    %c0_70 = arith.constant 0 : index
    %c0_71 = arith.constant 0 : index
    %54 = vector.load %arg10[%c0_70, %c0_71] : memref<2x19xf32, #tpu.memory_space<vmem>>, vector<2x19xf32>
    %c0_72 = arith.constant 0 : index
    %c0_73 = arith.constant 0 : index
    %55 = vector.load %arg11[%c0_72, %c0_73] : memref<2x8xf32, #tpu.memory_space<vmem>>, vector<2x8xf32>
    %cst_74 = arith.constant dense<0.000000e+00> : vector<2x96xf32>
    %56 = tpu.matmul %54, %8, %cst_74 {dimension_numbers = #tpu.dot_dimension_numbers<[1], [0], [0], [1], [0, 0, 1, 1], [], []>} : vector<2x19xf32>, vector<19x96xf32>, vector<2x96xf32> -> vector<2x96xf32>
    %cst_75 = arith.constant dense<0.000000e+00> : vector<2x96xf32>
    %57 = tpu.matmul %55, %9, %cst_75 {dimension_numbers = #tpu.dot_dimension_numbers<[1], [0], [0], [1], [0, 0, 1, 1], [], []>} : vector<2x8xf32>, vector<8x96xf32>, vector<2x96xf32> -> vector<2x96xf32>
    %58 = arith.addf %56, %57 : vector<2x96xf32>
    %cst_76 = arith.constant dense<0.000000e+00> : vector<2x96xf32>
    %59 = tpu.matmul %43, %10, %cst_76 {dimension_numbers = #tpu.dot_dimension_numbers<[1], [0], [0], [1], [0, 0, 1, 1], [], []>} : vector<2x32xf32>, vector<32x96xf32>, vector<2x96xf32> -> vector<2x96xf32>
    %60 = arith.addf %58, %59 : vector<2x96xf32>
    %61 = vector.broadcast %11 : vector<1x96xf32> to vector<2x96xf32>
    %62 = arith.addf %60, %61 : vector<2x96xf32>
    %cst_77 = arith.constant dense<0.000000e+00> : vector<2x32xf32>
    %63 = tpu.matmul %43, %12, %cst_77 {dimension_numbers = #tpu.dot_dimension_numbers<[1], [0], [0], [1], [0, 0, 1, 1], [], []>} : vector<2x32xf32>, vector<32x32xf32>, vector<2x32xf32> -> vector<2x32xf32>
    %64 = vector.broadcast %13 : vector<1x32xf32> to vector<2x32xf32>
    %65 = arith.addf %63, %64 : vector<2x32xf32>
    %66 = vector.extract_strided_slice %62 {offsets = [0, 0], sizes = [2, 32], strides = [1, 1]} : vector<2x96xf32> to vector<2x32xf32>
    %cst_78 = arith.constant 0.000000e+00 : f32
    %67 = vector.broadcast %cst_78 : f32 to vector<2x32xf32>
    %68 = arith.subf %67, %66 : vector<2x32xf32>
    %69 = math.exp %68 : vector<2x32xf32>
    %cst_79 = arith.constant 1.000000e+00 : f32
    %70 = vector.broadcast %cst_79 : f32 to vector<2x32xf32>
    %71 = arith.addf %70, %69 : vector<2x32xf32>
    %cst_80 = arith.constant 1.000000e+00 : f32
    %72 = vector.broadcast %cst_80 : f32 to vector<2x32xf32>
    %73 = arith.divf %72, %71 : vector<2x32xf32>
    %74 = vector.extract_strided_slice %62 {offsets = [0, 32], sizes = [2, 32], strides = [1, 1]} : vector<2x96xf32> to vector<2x32xf32>
    %cst_81 = arith.constant 0.000000e+00 : f32
    %75 = vector.broadcast %cst_81 : f32 to vector<2x32xf32>
    %76 = arith.subf %75, %74 : vector<2x32xf32>
    %77 = math.exp %76 : vector<2x32xf32>
    %cst_82 = arith.constant 1.000000e+00 : f32
    %78 = vector.broadcast %cst_82 : f32 to vector<2x32xf32>
    %79 = arith.addf %78, %77 : vector<2x32xf32>
    %cst_83 = arith.constant 1.000000e+00 : f32
    %80 = vector.broadcast %cst_83 : f32 to vector<2x32xf32>
    %81 = arith.divf %80, %79 : vector<2x32xf32>
    %82 = vector.extract_strided_slice %62 {offsets = [0, 64], sizes = [2, 32], strides = [1, 1]} : vector<2x96xf32> to vector<2x32xf32>
    %cst_84 = arith.constant 1.000000e+00 : f32
    %83 = vector.broadcast %cst_84 : f32 to vector<2x32xf32>
    %84 = arith.subf %73, %83 : vector<2x32xf32>
    %85 = arith.mulf %84, %65 : vector<2x32xf32>
    %86 = arith.addf %82, %85 : vector<2x32xf32>
    %87 = math.tanh %86 : vector<2x32xf32>
    %cst_85 = arith.constant 1.000000e+00 : f32
    %88 = vector.broadcast %cst_85 : f32 to vector<2x32xf32>
    %89 = arith.subf %88, %81 : vector<2x32xf32>
    %90 = arith.mulf %89, %87 : vector<2x32xf32>
    %91 = arith.mulf %81, %43 : vector<2x32xf32>
    %92 = arith.addf %90, %91 : vector<2x32xf32>
    %cst_86 = arith.constant dense<0.000000e+00> : vector<2x32xf32>
    %93 = tpu.matmul %92, %14, %cst_86 {dimension_numbers = #tpu.dot_dimension_numbers<[1], [0], [0], [1], [0, 0, 1, 1], [], []>} : vector<2x32xf32>, vector<32x32xf32>, vector<2x32xf32> -> vector<2x32xf32>
    %94 = vector.broadcast %15 : vector<1x32xf32> to vector<2x32xf32>
    %95 = arith.addf %93, %94 : vector<2x32xf32>
    %cst_87 = arith.constant 0.000000e+00 : f32
    %96 = vector.broadcast %cst_87 : f32 to vector<2x32xf32>
    %97 = arith.maximumf %95, %96 : vector<2x32xf32>
    %cst_88 = arith.constant dense<0.000000e+00> : vector<2x32xf32>
    %98 = tpu.matmul %97, %16, %cst_88 {dimension_numbers = #tpu.dot_dimension_numbers<[1], [0], [0], [1], [0, 0, 1, 1], [], []>} : vector<2x32xf32>, vector<32x32xf32>, vector<2x32xf32> -> vector<2x32xf32>
    %99 = vector.broadcast %17 : vector<1x32xf32> to vector<2x32xf32>
    %100 = arith.addf %98, %99 : vector<2x32xf32>
    %cst_89 = arith.constant 0.000000e+00 : f32
    %101 = vector.broadcast %cst_89 : f32 to vector<2x32xf32>
    %102 = arith.maximumf %100, %101 : vector<2x32xf32>
    %cst_90 = arith.constant dense<0.000000e+00> : vector<2x22xf32>
    %103 = tpu.matmul %102, %51, %cst_90 {dimension_numbers = #tpu.dot_dimension_numbers<[1], [0], [0], [1], [0, 0, 1, 1], [], []>} : vector<2x32xf32>, vector<32x22xf32>, vector<2x22xf32> -> vector<2x22xf32>
    %104 = arith.addf %103, %7 : vector<2x22xf32>
    %cst_91 = arith.constant dense<0xFF800000> : vector<2xf32>
    %105 = vector.multi_reduction <maximumf>, %104, %cst_91 [1] : vector<2x22xf32> to vector<2xf32>
    %106 = vector.shape_cast %105 : vector<2xf32> to vector<2x1xf32>
    %107 = vector.broadcast %106 : vector<2x1xf32> to vector<2x22xf32>
    %108 = arith.cmpf oeq, %104, %107 : vector<2x22xf32>
    %c22_i32 = arith.constant 22 : i32
    %109 = vector.broadcast %c22_i32 : i32 to vector<2x22xi32>
    %110 = arith.select %108, %52, %109 : vector<2x22xi1>, vector<2x22xi32>
    %cst_92 = arith.constant dense<2147483647> : vector<2xi32>
    %111 = vector.multi_reduction <minsi>, %110, %cst_92 [1] : vector<2x22xi32> to vector<2xi32>
    %112 = vector.shape_cast %111 : vector<2xi32> to vector<2x1xi32>
    %113 = vector.broadcast %112 : vector<2x1xi32> to vector<2x22xi32>
    %114 = arith.cmpi eq, %52, %113 : vector<2x22xi32>
    %115 = arith.extui %114 : vector<2x22xi1> to vector<2x22xi32>
    %116 = arith.sitofp %115 : vector<2x22xi32> to vector<2x22xf32>
    %cst_93 = arith.constant dense<0.000000e+00> : vector<2x19xf32>
    %117 = tpu.matmul %116, %6, %cst_93 {dimension_numbers = #tpu.dot_dimension_numbers<[1], [0], [0], [1], [0, 0, 1, 1], [], []>} : vector<2x22xf32>, vector<22x19xf32>, vector<2x19xf32> -> vector<2x19xf32>
    %cst_94 = arith.constant dense<0.000000e+00> : vector<2x32xf32>
    %118 = tpu.matmul %102, %18, %cst_94 {dimension_numbers = #tpu.dot_dimension_numbers<[1], [0], [0], [1], [0, 0, 1, 1], [], []>} : vector<2x32xf32>, vector<32x32xf32>, vector<2x32xf32> -> vector<2x32xf32>
    %cst_95 = arith.constant dense<0.000000e+00> : vector<2x32xf32>
    %119 = tpu.matmul %117, %19, %cst_95 {dimension_numbers = #tpu.dot_dimension_numbers<[1], [0], [0], [1], [0, 0, 1, 1], [], []>} : vector<2x19xf32>, vector<19x32xf32>, vector<2x32xf32> -> vector<2x32xf32>
    %120 = arith.addf %118, %119 : vector<2x32xf32>
    %121 = vector.broadcast %20 : vector<1x32xf32> to vector<2x32xf32>
    %122 = arith.addf %120, %121 : vector<2x32xf32>
    %cst_96 = arith.constant 0.000000e+00 : f32
    %123 = vector.broadcast %cst_96 : f32 to vector<2x32xf32>
    %124 = arith.maximumf %122, %123 : vector<2x32xf32>
    %cst_97 = arith.constant dense<0.000000e+00> : vector<2x32xf32>
    %125 = tpu.matmul %124, %21, %cst_97 {dimension_numbers = #tpu.dot_dimension_numbers<[1], [0], [0], [1], [0, 0, 1, 1], [], []>} : vector<2x32xf32>, vector<32x32xf32>, vector<2x32xf32> -> vector<2x32xf32>
    %126 = vector.broadcast %22 : vector<1x32xf32> to vector<2x32xf32>
    %127 = arith.addf %125, %126 : vector<2x32xf32>
    %cst_98 = arith.constant 0.000000e+00 : f32
    %128 = vector.broadcast %cst_98 : f32 to vector<2x32xf32>
    %129 = arith.maximumf %127, %128 : vector<2x32xf32>
    %cst_99 = arith.constant dense<0.000000e+00> : vector<2x34xf32>
    %130 = tpu.matmul %129, %23, %cst_99 {dimension_numbers = #tpu.dot_dimension_numbers<[1], [0], [0], [1], [0, 0, 1, 1], [], []>} : vector<2x32xf32>, vector<32x34xf32>, vector<2x34xf32> -> vector<2x34xf32>
    %131 = vector.broadcast %24 : vector<1x34xf32> to vector<2x34xf32>
    %132 = arith.addf %130, %131 : vector<2x34xf32>
    %cst_100 = arith.constant dense<0.000000e+00> : vector<2x128xf32>
    %133 = tpu.matmul %103, %26, %cst_100 {dimension_numbers = #tpu.dot_dimension_numbers<[1], [0], [0], [1], [0, 0, 1, 1], [], []>} : vector<2x22xf32>, vector<22x128xf32>, vector<2x128xf32> -> vector<2x128xf32>
    %cst_101 = arith.constant dense<0.000000e+00> : vector<2x128xf32>
    %134 = tpu.matmul %132, %27, %cst_101 {dimension_numbers = #tpu.dot_dimension_numbers<[1], [0], [0], [1], [0, 0, 1, 1], [], []>} : vector<2x34xf32>, vector<34x128xf32>, vector<2x128xf32> -> vector<2x128xf32>
    %135 = arith.addf %133, %134 : vector<2x128xf32>
    %c0_102 = arith.constant 0 : index
    %c0_103 = arith.constant 0 : index
    %c0_104 = arith.constant 0 : index
    %136 = vector.load %arg34[%c0_102, %c0_103, %c0_104] : memref<5x2x128xf32, #tpu.memory_space<vmem>>, vector<1x2x128xf32>
    %137 = vector.shape_cast %136 : vector<1x2x128xf32> to vector<2x128xf32>
    %138 = vector.shape_cast %135 : vector<2x128xf32> to vector<1x2x128xf32>
    tpu.vector_store %arg34[%c0_102, %c0_103, %c0_104], %138 {strides = array<i32>} : memref<5x2x128xf32, #tpu.memory_space<vmem>>, vector<1x2x128xf32>,
    %cst_105 = arith.constant dense<0xFF800000> : vector<2xf32>
    %139 = vector.multi_reduction <maximumf>, %132, %cst_105 [1] : vector<2x34xf32> to vector<2xf32>
    %140 = vector.shape_cast %139 : vector<2xf32> to vector<2x1xf32>
    %141 = vector.broadcast %140 : vector<2x1xf32> to vector<2x34xf32>
    %142 = arith.cmpf oeq, %132, %141 : vector<2x34xf32>
    %c34_i32 = arith.constant 34 : i32
    %143 = vector.broadcast %c34_i32 : i32 to vector<2x34xi32>
    %144 = arith.select %142, %53, %143 : vector<2x34xi1>, vector<2x34xi32>
    %cst_106 = arith.constant dense<2147483647> : vector<2xi32>
    %145 = vector.multi_reduction <minsi>, %144, %cst_106 [1] : vector<2x34xi32> to vector<2xi32>
    %146 = vector.shape_cast %145 : vector<2xi32> to vector<2x1xi32>
    %147 = vector.broadcast %146 : vector<2x1xi32> to vector<2x34xi32>
    %148 = arith.cmpi eq, %53, %147 : vector<2x34xi32>
    %149 = arith.extui %148 : vector<2x34xi1> to vector<2x34xi32>
    %150 = arith.sitofp %149 : vector<2x34xi32> to vector<2x34xf32>
    %cst_107 = arith.constant dense<0.000000e+00> : vector<2x8xf32>
    %151 = tpu.matmul %150, %25, %cst_107 {dimension_numbers = #tpu.dot_dimension_numbers<[1], [0], [0], [1], [0, 0, 1, 1], [], []>} : vector<2x34xf32>, vector<34x8xf32>, vector<2x8xf32> -> vector<2x8xf32>
    %cst_108 = arith.constant dense<0.000000e+00> : vector<2x96xf32>
    %152 = tpu.matmul %117, %8, %cst_108 {dimension_numbers = #tpu.dot_dimension_numbers<[1], [0], [0], [1], [0, 0, 1, 1], [], []>} : vector<2x19xf32>, vector<19x96xf32>, vector<2x96xf32> -> vector<2x96xf32>
    %cst_109 = arith.constant dense<0.000000e+00> : vector<2x96xf32>
    %153 = tpu.matmul %151, %9, %cst_109 {dimension_numbers = #tpu.dot_dimension_numbers<[1], [0], [0], [1], [0, 0, 1, 1], [], []>} : vector<2x8xf32>, vector<8x96xf32>, vector<2x96xf32> -> vector<2x96xf32>
    %154 = arith.addf %152, %153 : vector<2x96xf32>
    %cst_110 = arith.constant dense<0.000000e+00> : vector<2x96xf32>
    %155 = tpu.matmul %92, %10, %cst_110 {dimension_numbers = #tpu.dot_dimension_numbers<[1], [0], [0], [1], [0, 0, 1, 1], [], []>} : vector<2x32xf32>, vector<32x96xf32>, vector<2x96xf32> -> vector<2x96xf32>
    %156 = arith.addf %154, %155 : vector<2x96xf32>
    %157 = vector.broadcast %11 : vector<1x96xf32> to vector<2x96xf32>
    %158 = arith.addf %156, %157 : vector<2x96xf32>
    %cst_111 = arith.constant dense<0.000000e+00> : vector<2x32xf32>
    %159 = tpu.matmul %92, %12, %cst_111 {dimension_numbers = #tpu.dot_dimension_numbers<[1], [0], [0], [1], [0, 0, 1, 1], [], []>} : vector<2x32xf32>, vector<32x32xf32>, vector<2x32xf32> -> vector<2x32xf32>
    %160 = vector.broadcast %13 : vector<1x32xf32> to vector<2x32xf32>
    %161 = arith.addf %159, %160 : vector<2x32xf32>
    %162 = vector.extract_strided_slice %158 {offsets = [0, 0], sizes = [2, 32], strides = [1, 1]} : vector<2x96xf32> to vector<2x32xf32>
    %cst_112 = arith.constant 0.000000e+00 : f32
    %163 = vector.broadcast %cst_112 : f32 to vector<2x32xf32>
    %164 = arith.subf %163, %162 : vector<2x32xf32>
    %165 = math.exp %164 : vector<2x32xf32>
    %cst_113 = arith.constant 1.000000e+00 : f32
    %166 = vector.broadcast %cst_113 : f32 to vector<2x32xf32>
    %167 = arith.addf %166, %165 : vector<2x32xf32>
    %cst_114 = arith.constant 1.000000e+00 : f32
    %168 = vector.broadcast %cst_114 : f32 to vector<2x32xf32>
    %169 = arith.divf %168, %167 : vector<2x32xf32>
    %170 = vector.extract_strided_slice %158 {offsets = [0, 32], sizes = [2, 32], strides = [1, 1]} : vector<2x96xf32> to vector<2x32xf32>
    %cst_115 = arith.constant 0.000000e+00 : f32
    %171 = vector.broadcast %cst_115 : f32 to vector<2x32xf32>
    %172 = arith.subf %171, %170 : vector<2x32xf32>
    %173 = math.exp %172 : vector<2x32xf32>
    %cst_116 = arith.constant 1.000000e+00 : f32
    %174 = vector.broadcast %cst_116 : f32 to vector<2x32xf32>
    %175 = arith.addf %174, %173 : vector<2x32xf32>
    %cst_117 = arith.constant 1.000000e+00 : f32
    %176 = vector.broadcast %cst_117 : f32 to vector<2x32xf32>
    %177 = arith.divf %176, %175 : vector<2x32xf32>
    %178 = vector.extract_strided_slice %158 {offsets = [0, 64], sizes = [2, 32], strides = [1, 1]} : vector<2x96xf32> to vector<2x32xf32>
    %cst_118 = arith.constant 1.000000e+00 : f32
    %179 = vector.broadcast %cst_118 : f32 to vector<2x32xf32>
    %180 = arith.subf %169, %179 : vector<2x32xf32>
    %181 = arith.mulf %180, %161 : vector<2x32xf32>
    %182 = arith.addf %178, %181 : vector<2x32xf32>
    %183 = math.tanh %182 : vector<2x32xf32>
    %cst_119 = arith.constant 1.000000e+00 : f32
    %184 = vector.broadcast %cst_119 : f32 to vector<2x32xf32>
    %185 = arith.subf %184, %177 : vector<2x32xf32>
    %186 = arith.mulf %185, %183 : vector<2x32xf32>
    %187 = arith.mulf %177, %92 : vector<2x32xf32>
    %188 = arith.addf %186, %187 : vector<2x32xf32>
    %cst_120 = arith.constant dense<0.000000e+00> : vector<2x32xf32>
    %189 = tpu.matmul %188, %14, %cst_120 {dimension_numbers = #tpu.dot_dimension_numbers<[1], [0], [0], [1], [0, 0, 1, 1], [], []>} : vector<2x32xf32>, vector<32x32xf32>, vector<2x32xf32> -> vector<2x32xf32>
    %190 = vector.broadcast %15 : vector<1x32xf32> to vector<2x32xf32>
    %191 = arith.addf %189, %190 : vector<2x32xf32>
    %cst_121 = arith.constant 0.000000e+00 : f32
    %192 = vector.broadcast %cst_121 : f32 to vector<2x32xf32>
    %193 = arith.maximumf %191, %192 : vector<2x32xf32>
    %cst_122 = arith.constant dense<0.000000e+00> : vector<2x32xf32>
    %194 = tpu.matmul %193, %16, %cst_122 {dimension_numbers = #tpu.dot_dimension_numbers<[1], [0], [0], [1], [0, 0, 1, 1], [], []>} : vector<2x32xf32>, vector<32x32xf32>, vector<2x32xf32> -> vector<2x32xf32>
    %195 = vector.broadcast %17 : vector<1x32xf32> to vector<2x32xf32>
    %196 = arith.addf %194, %195 : vector<2x32xf32>
    %cst_123 = arith.constant 0.000000e+00 : f32
    %197 = vector.broadcast %cst_123 : f32 to vector<2x32xf32>
    %198 = arith.maximumf %196, %197 : vector<2x32xf32>
    %cst_124 = arith.constant dense<0.000000e+00> : vector<2x22xf32>
    %199 = tpu.matmul %198, %51, %cst_124 {dimension_numbers = #tpu.dot_dimension_numbers<[1], [0], [0], [1], [0, 0, 1, 1], [], []>} : vector<2x32xf32>, vector<32x22xf32>, vector<2x22xf32> -> vector<2x22xf32>
    %200 = arith.addf %199, %7 : vector<2x22xf32>
    %cst_125 = arith.constant dense<0xFF800000> : vector<2xf32>
    %201 = vector.multi_reduction <maximumf>, %200, %cst_125 [1] : vector<2x22xf32> to vector<2xf32>
    %202 = vector.shape_cast %201 : vector<2xf32> to vector<2x1xf32>
    %203 = vector.broadcast %202 : vector<2x1xf32> to vector<2x22xf32>
    %204 = arith.cmpf oeq, %200, %203 : vector<2x22xf32>
    %c22_i32_126 = arith.constant 22 : i32
    %205 = vector.broadcast %c22_i32_126 : i32 to vector<2x22xi32>
    %206 = arith.select %204, %52, %205 : vector<2x22xi1>, vector<2x22xi32>
    %cst_127 = arith.constant dense<2147483647> : vector<2xi32>
    %207 = vector.multi_reduction <minsi>, %206, %cst_127 [1] : vector<2x22xi32> to vector<2xi32>
    %208 = vector.shape_cast %207 : vector<2xi32> to vector<2x1xi32>
    %209 = vector.broadcast %208 : vector<2x1xi32> to vector<2x22xi32>
    %210 = arith.cmpi eq, %52, %209 : vector<2x22xi32>
    %211 = arith.extui %210 : vector<2x22xi1> to vector<2x22xi32>
    %212 = arith.sitofp %211 : vector<2x22xi32> to vector<2x22xf32>
    %cst_128 = arith.constant dense<0.000000e+00> : vector<2x19xf32>
    %213 = tpu.matmul %212, %6, %cst_128 {dimension_numbers = #tpu.dot_dimension_numbers<[1], [0], [0], [1], [0, 0, 1, 1], [], []>} : vector<2x22xf32>, vector<22x19xf32>, vector<2x19xf32> -> vector<2x19xf32>
    %cst_129 = arith.constant dense<0.000000e+00> : vector<2x32xf32>
    %214 = tpu.matmul %198, %18, %cst_129 {dimension_numbers = #tpu.dot_dimension_numbers<[1], [0], [0], [1], [0, 0, 1, 1], [], []>} : vector<2x32xf32>, vector<32x32xf32>, vector<2x32xf32> -> vector<2x32xf32>
    %cst_130 = arith.constant dense<0.000000e+00> : vector<2x32xf32>
    %215 = tpu.matmul %213, %19, %cst_130 {dimension_numbers = #tpu.dot_dimension_numbers<[1], [0], [0], [1], [0, 0, 1, 1], [], []>} : vector<2x19xf32>, vector<19x32xf32>, vector<2x32xf32> -> vector<2x32xf32>
    %216 = arith.addf %214, %215 : vector<2x32xf32>
    %217 = vector.broadcast %20 : vector<1x32xf32> to vector<2x32xf32>
    %218 = arith.addf %216, %217 : vector<2x32xf32>
    %cst_131 = arith.constant 0.000000e+00 : f32
    %219 = vector.broadcast %cst_131 : f32 to vector<2x32xf32>
    %220 = arith.maximumf %218, %219 : vector<2x32xf32>
    %cst_132 = arith.constant dense<0.000000e+00> : vector<2x32xf32>
    %221 = tpu.matmul %220, %21, %cst_132 {dimension_numbers = #tpu.dot_dimension_numbers<[1], [0], [0], [1], [0, 0, 1, 1], [], []>} : vector<2x32xf32>, vector<32x32xf32>, vector<2x32xf32> -> vector<2x32xf32>
    %222 = vector.broadcast %22 : vector<1x32xf32> to vector<2x32xf32>
    %223 = arith.addf %221, %222 : vector<2x32xf32>
    %cst_133 = arith.constant 0.000000e+00 : f32
    %224 = vector.broadcast %cst_133 : f32 to vector<2x32xf32>
    %225 = arith.maximumf %223, %224 : vector<2x32xf32>
    %cst_134 = arith.constant dense<0.000000e+00> : vector<2x34xf32>
    %226 = tpu.matmul %225, %23, %cst_134 {dimension_numbers = #tpu.dot_dimension_numbers<[1], [0], [0], [1], [0, 0, 1, 1], [], []>} : vector<2x32xf32>, vector<32x34xf32>, vector<2x34xf32> -> vector<2x34xf32>
    %227 = vector.broadcast %24 : vector<1x34xf32> to vector<2x34xf32>
    %228 = arith.addf %226, %227 : vector<2x34xf32>
    %cst_135 = arith.constant dense<0.000000e+00> : vector<2x128xf32>
    %229 = tpu.matmul %199, %26, %cst_135 {dimension_numbers = #tpu.dot_dimension_numbers<[1], [0], [0], [1], [0, 0, 1, 1], [], []>} : vector<2x22xf32>, vector<22x128xf32>, vector<2x128xf32> -> vector<2x128xf32>
    %cst_136 = arith.constant dense<0.000000e+00> : vector<2x128xf32>
    %230 = tpu.matmul %228, %27, %cst_136 {dimension_numbers = #tpu.dot_dimension_numbers<[1], [0], [0], [1], [0, 0, 1, 1], [], []>} : vector<2x34xf32>, vector<34x128xf32>, vector<2x128xf32> -> vector<2x128xf32>
    %231 = arith.addf %229, %230 : vector<2x128xf32>
    %c1 = arith.constant 1 : index
    %c0_137 = arith.constant 0 : index
    %c0_138 = arith.constant 0 : index
    %232 = vector.load %arg34[%c1, %c0_137, %c0_138] : memref<5x2x128xf32, #tpu.memory_space<vmem>>, vector<1x2x128xf32>
    %233 = vector.shape_cast %232 : vector<1x2x128xf32> to vector<2x128xf32>
    %234 = vector.shape_cast %231 : vector<2x128xf32> to vector<1x2x128xf32>
    tpu.vector_store %arg34[%c1, %c0_137, %c0_138], %234 {strides = array<i32>} : memref<5x2x128xf32, #tpu.memory_space<vmem>>, vector<1x2x128xf32>,
    %cst_139 = arith.constant dense<0xFF800000> : vector<2xf32>
    %235 = vector.multi_reduction <maximumf>, %228, %cst_139 [1] : vector<2x34xf32> to vector<2xf32>
    %236 = vector.shape_cast %235 : vector<2xf32> to vector<2x1xf32>
    %237 = vector.broadcast %236 : vector<2x1xf32> to vector<2x34xf32>
    %238 = arith.cmpf oeq, %228, %237 : vector<2x34xf32>
    %c34_i32_140 = arith.constant 34 : i32
    %239 = vector.broadcast %c34_i32_140 : i32 to vector<2x34xi32>
    %240 = arith.select %238, %53, %239 : vector<2x34xi1>, vector<2x34xi32>
    %cst_141 = arith.constant dense<2147483647> : vector<2xi32>
    %241 = vector.multi_reduction <minsi>, %240, %cst_141 [1] : vector<2x34xi32> to vector<2xi32>
    %242 = vector.shape_cast %241 : vector<2xi32> to vector<2x1xi32>
    %243 = vector.broadcast %242 : vector<2x1xi32> to vector<2x34xi32>
    %244 = arith.cmpi eq, %53, %243 : vector<2x34xi32>
    %245 = arith.extui %244 : vector<2x34xi1> to vector<2x34xi32>
    %246 = arith.sitofp %245 : vector<2x34xi32> to vector<2x34xf32>
    %cst_142 = arith.constant dense<0.000000e+00> : vector<2x8xf32>
    %247 = tpu.matmul %246, %25, %cst_142 {dimension_numbers = #tpu.dot_dimension_numbers<[1], [0], [0], [1], [0, 0, 1, 1], [], []>} : vector<2x34xf32>, vector<34x8xf32>, vector<2x8xf32> -> vector<2x8xf32>
    %cst_143 = arith.constant dense<0.000000e+00> : vector<2x96xf32>
    %248 = tpu.matmul %213, %8, %cst_143 {dimension_numbers = #tpu.dot_dimension_numbers<[1], [0], [0], [1], [0, 0, 1, 1], [], []>} : vector<2x19xf32>, vector<19x96xf32>, vector<2x96xf32> -> vector<2x96xf32>
    %cst_144 = arith.constant dense<0.000000e+00> : vector<2x96xf32>
    %249 = tpu.matmul %247, %9, %cst_144 {dimension_numbers = #tpu.dot_dimension_numbers<[1], [0], [0], [1], [0, 0, 1, 1], [], []>} : vector<2x8xf32>, vector<8x96xf32>, vector<2x96xf32> -> vector<2x96xf32>
    %250 = arith.addf %248, %249 : vector<2x96xf32>
    %cst_145 = arith.constant dense<0.000000e+00> : vector<2x96xf32>
    %251 = tpu.matmul %188, %10, %cst_145 {dimension_numbers = #tpu.dot_dimension_numbers<[1], [0], [0], [1], [0, 0, 1, 1], [], []>} : vector<2x32xf32>, vector<32x96xf32>, vector<2x96xf32> -> vector<2x96xf32>
    %252 = arith.addf %250, %251 : vector<2x96xf32>
    %253 = vector.broadcast %11 : vector<1x96xf32> to vector<2x96xf32>
    %254 = arith.addf %252, %253 : vector<2x96xf32>
    %cst_146 = arith.constant dense<0.000000e+00> : vector<2x32xf32>
    %255 = tpu.matmul %188, %12, %cst_146 {dimension_numbers = #tpu.dot_dimension_numbers<[1], [0], [0], [1], [0, 0, 1, 1], [], []>} : vector<2x32xf32>, vector<32x32xf32>, vector<2x32xf32> -> vector<2x32xf32>
    %256 = vector.broadcast %13 : vector<1x32xf32> to vector<2x32xf32>
    %257 = arith.addf %255, %256 : vector<2x32xf32>
    %258 = vector.extract_strided_slice %254 {offsets = [0, 0], sizes = [2, 32], strides = [1, 1]} : vector<2x96xf32> to vector<2x32xf32>
    %cst_147 = arith.constant 0.000000e+00 : f32
    %259 = vector.broadcast %cst_147 : f32 to vector<2x32xf32>
    %260 = arith.subf %259, %258 : vector<2x32xf32>
    %261 = math.exp %260 : vector<2x32xf32>
    %cst_148 = arith.constant 1.000000e+00 : f32
    %262 = vector.broadcast %cst_148 : f32 to vector<2x32xf32>
    %263 = arith.addf %262, %261 : vector<2x32xf32>
    %cst_149 = arith.constant 1.000000e+00 : f32
    %264 = vector.broadcast %cst_149 : f32 to vector<2x32xf32>
    %265 = arith.divf %264, %263 : vector<2x32xf32>
    %266 = vector.extract_strided_slice %254 {offsets = [0, 32], sizes = [2, 32], strides = [1, 1]} : vector<2x96xf32> to vector<2x32xf32>
    %cst_150 = arith.constant 0.000000e+00 : f32
    %267 = vector.broadcast %cst_150 : f32 to vector<2x32xf32>
    %268 = arith.subf %267, %266 : vector<2x32xf32>
    %269 = math.exp %268 : vector<2x32xf32>
    %cst_151 = arith.constant 1.000000e+00 : f32
    %270 = vector.broadcast %cst_151 : f32 to vector<2x32xf32>
    %271 = arith.addf %270, %269 : vector<2x32xf32>
    %cst_152 = arith.constant 1.000000e+00 : f32
    %272 = vector.broadcast %cst_152 : f32 to vector<2x32xf32>
    %273 = arith.divf %272, %271 : vector<2x32xf32>
    %274 = vector.extract_strided_slice %254 {offsets = [0, 64], sizes = [2, 32], strides = [1, 1]} : vector<2x96xf32> to vector<2x32xf32>
    %cst_153 = arith.constant 1.000000e+00 : f32
    %275 = vector.broadcast %cst_153 : f32 to vector<2x32xf32>
    %276 = arith.subf %265, %275 : vector<2x32xf32>
    %277 = arith.mulf %276, %257 : vector<2x32xf32>
    %278 = arith.addf %274, %277 : vector<2x32xf32>
    %279 = math.tanh %278 : vector<2x32xf32>
    %cst_154 = arith.constant 1.000000e+00 : f32
    %280 = vector.broadcast %cst_154 : f32 to vector<2x32xf32>
    %281 = arith.subf %280, %273 : vector<2x32xf32>
    %282 = arith.mulf %281, %279 : vector<2x32xf32>
    %283 = arith.mulf %273, %188 : vector<2x32xf32>
    %284 = arith.addf %282, %283 : vector<2x32xf32>
    %cst_155 = arith.constant dense<0.000000e+00> : vector<2x32xf32>
    %285 = tpu.matmul %284, %14, %cst_155 {dimension_numbers = #tpu.dot_dimension_numbers<[1], [0], [0], [1], [0, 0, 1, 1], [], []>} : vector<2x32xf32>, vector<32x32xf32>, vector<2x32xf32> -> vector<2x32xf32>
    %286 = vector.broadcast %15 : vector<1x32xf32> to vector<2x32xf32>
    %287 = arith.addf %285, %286 : vector<2x32xf32>
    %cst_156 = arith.constant 0.000000e+00 : f32
    %288 = vector.broadcast %cst_156 : f32 to vector<2x32xf32>
    %289 = arith.maximumf %287, %288 : vector<2x32xf32>
    %cst_157 = arith.constant dense<0.000000e+00> : vector<2x32xf32>
    %290 = tpu.matmul %289, %16, %cst_157 {dimension_numbers = #tpu.dot_dimension_numbers<[1], [0], [0], [1], [0, 0, 1, 1], [], []>} : vector<2x32xf32>, vector<32x32xf32>, vector<2x32xf32> -> vector<2x32xf32>
    %291 = vector.broadcast %17 : vector<1x32xf32> to vector<2x32xf32>
    %292 = arith.addf %290, %291 : vector<2x32xf32>
    %cst_158 = arith.constant 0.000000e+00 : f32
    %293 = vector.broadcast %cst_158 : f32 to vector<2x32xf32>
    %294 = arith.maximumf %292, %293 : vector<2x32xf32>
    %cst_159 = arith.constant dense<0.000000e+00> : vector<2x22xf32>
    %295 = tpu.matmul %294, %51, %cst_159 {dimension_numbers = #tpu.dot_dimension_numbers<[1], [0], [0], [1], [0, 0, 1, 1], [], []>} : vector<2x32xf32>, vector<32x22xf32>, vector<2x22xf32> -> vector<2x22xf32>
    %296 = arith.addf %295, %7 : vector<2x22xf32>
    %cst_160 = arith.constant dense<0xFF800000> : vector<2xf32>
    %297 = vector.multi_reduction <maximumf>, %296, %cst_160 [1] : vector<2x22xf32> to vector<2xf32>
    %298 = vector.shape_cast %297 : vector<2xf32> to vector<2x1xf32>
    %299 = vector.broadcast %298 : vector<2x1xf32> to vector<2x22xf32>
    %300 = arith.cmpf oeq, %296, %299 : vector<2x22xf32>
    %c22_i32_161 = arith.constant 22 : i32
    %301 = vector.broadcast %c22_i32_161 : i32 to vector<2x22xi32>
    %302 = arith.select %300, %52, %301 : vector<2x22xi1>, vector<2x22xi32>
    %cst_162 = arith.constant dense<2147483647> : vector<2xi32>
    %303 = vector.multi_reduction <minsi>, %302, %cst_162 [1] : vector<2x22xi32> to vector<2xi32>
    %304 = vector.shape_cast %303 : vector<2xi32> to vector<2x1xi32>
    %305 = vector.broadcast %304 : vector<2x1xi32> to vector<2x22xi32>
    %306 = arith.cmpi eq, %52, %305 : vector<2x22xi32>
    %307 = arith.extui %306 : vector<2x22xi1> to vector<2x22xi32>
    %308 = arith.sitofp %307 : vector<2x22xi32> to vector<2x22xf32>
    %cst_163 = arith.constant dense<0.000000e+00> : vector<2x19xf32>
    %309 = tpu.matmul %308, %6, %cst_163 {dimension_numbers = #tpu.dot_dimension_numbers<[1], [0], [0], [1], [0, 0, 1, 1], [], []>} : vector<2x22xf32>, vector<22x19xf32>, vector<2x19xf32> -> vector<2x19xf32>
    %cst_164 = arith.constant dense<0.000000e+00> : vector<2x32xf32>
    %310 = tpu.matmul %294, %18, %cst_164 {dimension_numbers = #tpu.dot_dimension_numbers<[1], [0], [0], [1], [0, 0, 1, 1], [], []>} : vector<2x32xf32>, vector<32x32xf32>, vector<2x32xf32> -> vector<2x32xf32>
    %cst_165 = arith.constant dense<0.000000e+00> : vector<2x32xf32>
    %311 = tpu.matmul %309, %19, %cst_165 {dimension_numbers = #tpu.dot_dimension_numbers<[1], [0], [0], [1], [0, 0, 1, 1], [], []>} : vector<2x19xf32>, vector<19x32xf32>, vector<2x32xf32> -> vector<2x32xf32>
    %312 = arith.addf %310, %311 : vector<2x32xf32>
    %313 = vector.broadcast %20 : vector<1x32xf32> to vector<2x32xf32>
    %314 = arith.addf %312, %313 : vector<2x32xf32>
    %cst_166 = arith.constant 0.000000e+00 : f32
    %315 = vector.broadcast %cst_166 : f32 to vector<2x32xf32>
    %316 = arith.maximumf %314, %315 : vector<2x32xf32>
    %cst_167 = arith.constant dense<0.000000e+00> : vector<2x32xf32>
    %317 = tpu.matmul %316, %21, %cst_167 {dimension_numbers = #tpu.dot_dimension_numbers<[1], [0], [0], [1], [0, 0, 1, 1], [], []>} : vector<2x32xf32>, vector<32x32xf32>, vector<2x32xf32> -> vector<2x32xf32>
    %318 = vector.broadcast %22 : vector<1x32xf32> to vector<2x32xf32>
    %319 = arith.addf %317, %318 : vector<2x32xf32>
    %cst_168 = arith.constant 0.000000e+00 : f32
    %320 = vector.broadcast %cst_168 : f32 to vector<2x32xf32>
    %321 = arith.maximumf %319, %320 : vector<2x32xf32>
    %cst_169 = arith.constant dense<0.000000e+00> : vector<2x34xf32>
    %322 = tpu.matmul %321, %23, %cst_169 {dimension_numbers = #tpu.dot_dimension_numbers<[1], [0], [0], [1], [0, 0, 1, 1], [], []>} : vector<2x32xf32>, vector<32x34xf32>, vector<2x34xf32> -> vector<2x34xf32>
    %323 = vector.broadcast %24 : vector<1x34xf32> to vector<2x34xf32>
    %324 = arith.addf %322, %323 : vector<2x34xf32>
    %cst_170 = arith.constant dense<0.000000e+00> : vector<2x128xf32>
    %325 = tpu.matmul %295, %26, %cst_170 {dimension_numbers = #tpu.dot_dimension_numbers<[1], [0], [0], [1], [0, 0, 1, 1], [], []>} : vector<2x22xf32>, vector<22x128xf32>, vector<2x128xf32> -> vector<2x128xf32>
    %cst_171 = arith.constant dense<0.000000e+00> : vector<2x128xf32>
    %326 = tpu.matmul %324, %27, %cst_171 {dimension_numbers = #tpu.dot_dimension_numbers<[1], [0], [0], [1], [0, 0, 1, 1], [], []>} : vector<2x34xf32>, vector<34x128xf32>, vector<2x128xf32> -> vector<2x128xf32>
    %327 = arith.addf %325, %326 : vector<2x128xf32>
    %c2 = arith.constant 2 : index
    %c0_172 = arith.constant 0 : index
    %c0_173 = arith.constant 0 : index
    %328 = vector.load %arg34[%c2, %c0_172, %c0_173] : memref<5x2x128xf32, #tpu.memory_space<vmem>>, vector<1x2x128xf32>
    %329 = vector.shape_cast %328 : vector<1x2x128xf32> to vector<2x128xf32>
    %330 = vector.shape_cast %327 : vector<2x128xf32> to vector<1x2x128xf32>
    tpu.vector_store %arg34[%c2, %c0_172, %c0_173], %330 {strides = array<i32>} : memref<5x2x128xf32, #tpu.memory_space<vmem>>, vector<1x2x128xf32>,
    %cst_174 = arith.constant dense<0xFF800000> : vector<2xf32>
    %331 = vector.multi_reduction <maximumf>, %324, %cst_174 [1] : vector<2x34xf32> to vector<2xf32>
    %332 = vector.shape_cast %331 : vector<2xf32> to vector<2x1xf32>
    %333 = vector.broadcast %332 : vector<2x1xf32> to vector<2x34xf32>
    %334 = arith.cmpf oeq, %324, %333 : vector<2x34xf32>
    %c34_i32_175 = arith.constant 34 : i32
    %335 = vector.broadcast %c34_i32_175 : i32 to vector<2x34xi32>
    %336 = arith.select %334, %53, %335 : vector<2x34xi1>, vector<2x34xi32>
    %cst_176 = arith.constant dense<2147483647> : vector<2xi32>
    %337 = vector.multi_reduction <minsi>, %336, %cst_176 [1] : vector<2x34xi32> to vector<2xi32>
    %338 = vector.shape_cast %337 : vector<2xi32> to vector<2x1xi32>
    %339 = vector.broadcast %338 : vector<2x1xi32> to vector<2x34xi32>
    %340 = arith.cmpi eq, %53, %339 : vector<2x34xi32>
    %341 = arith.extui %340 : vector<2x34xi1> to vector<2x34xi32>
    %342 = arith.sitofp %341 : vector<2x34xi32> to vector<2x34xf32>
    %cst_177 = arith.constant dense<0.000000e+00> : vector<2x8xf32>
    %343 = tpu.matmul %342, %25, %cst_177 {dimension_numbers = #tpu.dot_dimension_numbers<[1], [0], [0], [1], [0, 0, 1, 1], [], []>} : vector<2x34xf32>, vector<34x8xf32>, vector<2x8xf32> -> vector<2x8xf32>
    %cst_178 = arith.constant dense<0.000000e+00> : vector<2x96xf32>
    %344 = tpu.matmul %309, %8, %cst_178 {dimension_numbers = #tpu.dot_dimension_numbers<[1], [0], [0], [1], [0, 0, 1, 1], [], []>} : vector<2x19xf32>, vector<19x96xf32>, vector<2x96xf32> -> vector<2x96xf32>
    %cst_179 = arith.constant dense<0.000000e+00> : vector<2x96xf32>
    %345 = tpu.matmul %343, %9, %cst_179 {dimension_numbers = #tpu.dot_dimension_numbers<[1], [0], [0], [1], [0, 0, 1, 1], [], []>} : vector<2x8xf32>, vector<8x96xf32>, vector<2x96xf32> -> vector<2x96xf32>
    %346 = arith.addf %344, %345 : vector<2x96xf32>
    %cst_180 = arith.constant dense<0.000000e+00> : vector<2x96xf32>
    %347 = tpu.matmul %284, %10, %cst_180 {dimension_numbers = #tpu.dot_dimension_numbers<[1], [0], [0], [1], [0, 0, 1, 1], [], []>} : vector<2x32xf32>, vector<32x96xf32>, vector<2x96xf32> -> vector<2x96xf32>
    %348 = arith.addf %346, %347 : vector<2x96xf32>
    %349 = vector.broadcast %11 : vector<1x96xf32> to vector<2x96xf32>
    %350 = arith.addf %348, %349 : vector<2x96xf32>
    %cst_181 = arith.constant dense<0.000000e+00> : vector<2x32xf32>
    %351 = tpu.matmul %284, %12, %cst_181 {dimension_numbers = #tpu.dot_dimension_numbers<[1], [0], [0], [1], [0, 0, 1, 1], [], []>} : vector<2x32xf32>, vector<32x32xf32>, vector<2x32xf32> -> vector<2x32xf32>
    %352 = vector.broadcast %13 : vector<1x32xf32> to vector<2x32xf32>
    %353 = arith.addf %351, %352 : vector<2x32xf32>
    %354 = vector.extract_strided_slice %350 {offsets = [0, 0], sizes = [2, 32], strides = [1, 1]} : vector<2x96xf32> to vector<2x32xf32>
    %cst_182 = arith.constant 0.000000e+00 : f32
    %355 = vector.broadcast %cst_182 : f32 to vector<2x32xf32>
    %356 = arith.subf %355, %354 : vector<2x32xf32>
    %357 = math.exp %356 : vector<2x32xf32>
    %cst_183 = arith.constant 1.000000e+00 : f32
    %358 = vector.broadcast %cst_183 : f32 to vector<2x32xf32>
    %359 = arith.addf %358, %357 : vector<2x32xf32>
    %cst_184 = arith.constant 1.000000e+00 : f32
    %360 = vector.broadcast %cst_184 : f32 to vector<2x32xf32>
    %361 = arith.divf %360, %359 : vector<2x32xf32>
    %362 = vector.extract_strided_slice %350 {offsets = [0, 32], sizes = [2, 32], strides = [1, 1]} : vector<2x96xf32> to vector<2x32xf32>
    %cst_185 = arith.constant 0.000000e+00 : f32
    %363 = vector.broadcast %cst_185 : f32 to vector<2x32xf32>
    %364 = arith.subf %363, %362 : vector<2x32xf32>
    %365 = math.exp %364 : vector<2x32xf32>
    %cst_186 = arith.constant 1.000000e+00 : f32
    %366 = vector.broadcast %cst_186 : f32 to vector<2x32xf32>
    %367 = arith.addf %366, %365 : vector<2x32xf32>
    %cst_187 = arith.constant 1.000000e+00 : f32
    %368 = vector.broadcast %cst_187 : f32 to vector<2x32xf32>
    %369 = arith.divf %368, %367 : vector<2x32xf32>
    %370 = vector.extract_strided_slice %350 {offsets = [0, 64], sizes = [2, 32], strides = [1, 1]} : vector<2x96xf32> to vector<2x32xf32>
    %cst_188 = arith.constant 1.000000e+00 : f32
    %371 = vector.broadcast %cst_188 : f32 to vector<2x32xf32>
    %372 = arith.subf %361, %371 : vector<2x32xf32>
    %373 = arith.mulf %372, %353 : vector<2x32xf32>
    %374 = arith.addf %370, %373 : vector<2x32xf32>
    %375 = math.tanh %374 : vector<2x32xf32>
    %cst_189 = arith.constant 1.000000e+00 : f32
    %376 = vector.broadcast %cst_189 : f32 to vector<2x32xf32>
    %377 = arith.subf %376, %369 : vector<2x32xf32>
    %378 = arith.mulf %377, %375 : vector<2x32xf32>
    %379 = arith.mulf %369, %284 : vector<2x32xf32>
    %380 = arith.addf %378, %379 : vector<2x32xf32>
    %cst_190 = arith.constant dense<0.000000e+00> : vector<2x32xf32>
    %381 = tpu.matmul %380, %14, %cst_190 {dimension_numbers = #tpu.dot_dimension_numbers<[1], [0], [0], [1], [0, 0, 1, 1], [], []>} : vector<2x32xf32>, vector<32x32xf32>, vector<2x32xf32> -> vector<2x32xf32>
    %382 = vector.broadcast %15 : vector<1x32xf32> to vector<2x32xf32>
    %383 = arith.addf %381, %382 : vector<2x32xf32>
    %cst_191 = arith.constant 0.000000e+00 : f32
    %384 = vector.broadcast %cst_191 : f32 to vector<2x32xf32>
    %385 = arith.maximumf %383, %384 : vector<2x32xf32>
    %cst_192 = arith.constant dense<0.000000e+00> : vector<2x32xf32>
    %386 = tpu.matmul %385, %16, %cst_192 {dimension_numbers = #tpu.dot_dimension_numbers<[1], [0], [0], [1], [0, 0, 1, 1], [], []>} : vector<2x32xf32>, vector<32x32xf32>, vector<2x32xf32> -> vector<2x32xf32>
    %387 = vector.broadcast %17 : vector<1x32xf32> to vector<2x32xf32>
    %388 = arith.addf %386, %387 : vector<2x32xf32>
    %cst_193 = arith.constant 0.000000e+00 : f32
    %389 = vector.broadcast %cst_193 : f32 to vector<2x32xf32>
    %390 = arith.maximumf %388, %389 : vector<2x32xf32>
    %cst_194 = arith.constant dense<0.000000e+00> : vector<2x22xf32>
    %391 = tpu.matmul %390, %51, %cst_194 {dimension_numbers = #tpu.dot_dimension_numbers<[1], [0], [0], [1], [0, 0, 1, 1], [], []>} : vector<2x32xf32>, vector<32x22xf32>, vector<2x22xf32> -> vector<2x22xf32>
    %392 = arith.addf %391, %7 : vector<2x22xf32>
    %cst_195 = arith.constant dense<0xFF800000> : vector<2xf32>
    %393 = vector.multi_reduction <maximumf>, %392, %cst_195 [1] : vector<2x22xf32> to vector<2xf32>
    %394 = vector.shape_cast %393 : vector<2xf32> to vector<2x1xf32>
    %395 = vector.broadcast %394 : vector<2x1xf32> to vector<2x22xf32>
    %396 = arith.cmpf oeq, %392, %395 : vector<2x22xf32>
    %c22_i32_196 = arith.constant 22 : i32
    %397 = vector.broadcast %c22_i32_196 : i32 to vector<2x22xi32>
    %398 = arith.select %396, %52, %397 : vector<2x22xi1>, vector<2x22xi32>
    %cst_197 = arith.constant dense<2147483647> : vector<2xi32>
    %399 = vector.multi_reduction <minsi>, %398, %cst_197 [1] : vector<2x22xi32> to vector<2xi32>
    %400 = vector.shape_cast %399 : vector<2xi32> to vector<2x1xi32>
    %401 = vector.broadcast %400 : vector<2x1xi32> to vector<2x22xi32>
    %402 = arith.cmpi eq, %52, %401 : vector<2x22xi32>
    %403 = arith.extui %402 : vector<2x22xi1> to vector<2x22xi32>
    %404 = arith.sitofp %403 : vector<2x22xi32> to vector<2x22xf32>
    %cst_198 = arith.constant dense<0.000000e+00> : vector<2x19xf32>
    %405 = tpu.matmul %404, %6, %cst_198 {dimension_numbers = #tpu.dot_dimension_numbers<[1], [0], [0], [1], [0, 0, 1, 1], [], []>} : vector<2x22xf32>, vector<22x19xf32>, vector<2x19xf32> -> vector<2x19xf32>
    %cst_199 = arith.constant dense<0.000000e+00> : vector<2x32xf32>
    %406 = tpu.matmul %390, %18, %cst_199 {dimension_numbers = #tpu.dot_dimension_numbers<[1], [0], [0], [1], [0, 0, 1, 1], [], []>} : vector<2x32xf32>, vector<32x32xf32>, vector<2x32xf32> -> vector<2x32xf32>
    %cst_200 = arith.constant dense<0.000000e+00> : vector<2x32xf32>
    %407 = tpu.matmul %405, %19, %cst_200 {dimension_numbers = #tpu.dot_dimension_numbers<[1], [0], [0], [1], [0, 0, 1, 1], [], []>} : vector<2x19xf32>, vector<19x32xf32>, vector<2x32xf32> -> vector<2x32xf32>
    %408 = arith.addf %406, %407 : vector<2x32xf32>
    %409 = vector.broadcast %20 : vector<1x32xf32> to vector<2x32xf32>
    %410 = arith.addf %408, %409 : vector<2x32xf32>
    %cst_201 = arith.constant 0.000000e+00 : f32
    %411 = vector.broadcast %cst_201 : f32 to vector<2x32xf32>
    %412 = arith.maximumf %410, %411 : vector<2x32xf32>
    %cst_202 = arith.constant dense<0.000000e+00> : vector<2x32xf32>
    %413 = tpu.matmul %412, %21, %cst_202 {dimension_numbers = #tpu.dot_dimension_numbers<[1], [0], [0], [1], [0, 0, 1, 1], [], []>} : vector<2x32xf32>, vector<32x32xf32>, vector<2x32xf32> -> vector<2x32xf32>
    %414 = vector.broadcast %22 : vector<1x32xf32> to vector<2x32xf32>
    %415 = arith.addf %413, %414 : vector<2x32xf32>
    %cst_203 = arith.constant 0.000000e+00 : f32
    %416 = vector.broadcast %cst_203 : f32 to vector<2x32xf32>
    %417 = arith.maximumf %415, %416 : vector<2x32xf32>
    %cst_204 = arith.constant dense<0.000000e+00> : vector<2x34xf32>
    %418 = tpu.matmul %417, %23, %cst_204 {dimension_numbers = #tpu.dot_dimension_numbers<[1], [0], [0], [1], [0, 0, 1, 1], [], []>} : vector<2x32xf32>, vector<32x34xf32>, vector<2x34xf32> -> vector<2x34xf32>
    %419 = vector.broadcast %24 : vector<1x34xf32> to vector<2x34xf32>
    %420 = arith.addf %418, %419 : vector<2x34xf32>
    %cst_205 = arith.constant dense<0.000000e+00> : vector<2x128xf32>
    %421 = tpu.matmul %391, %26, %cst_205 {dimension_numbers = #tpu.dot_dimension_numbers<[1], [0], [0], [1], [0, 0, 1, 1], [], []>} : vector<2x22xf32>, vector<22x128xf32>, vector<2x128xf32> -> vector<2x128xf32>
    %cst_206 = arith.constant dense<0.000000e+00> : vector<2x128xf32>
    %422 = tpu.matmul %420, %27, %cst_206 {dimension_numbers = #tpu.dot_dimension_numbers<[1], [0], [0], [1], [0, 0, 1, 1], [], []>} : vector<2x34xf32>, vector<34x128xf32>, vector<2x128xf32> -> vector<2x128xf32>
    %423 = arith.addf %421, %422 : vector<2x128xf32>
    %c3 = arith.constant 3 : index
    %c0_207 = arith.constant 0 : index
    %c0_208 = arith.constant 0 : index
    %424 = vector.load %arg34[%c3, %c0_207, %c0_208] : memref<5x2x128xf32, #tpu.memory_space<vmem>>, vector<1x2x128xf32>
    %425 = vector.shape_cast %424 : vector<1x2x128xf32> to vector<2x128xf32>
    %426 = vector.shape_cast %423 : vector<2x128xf32> to vector<1x2x128xf32>
    tpu.vector_store %arg34[%c3, %c0_207, %c0_208], %426 {strides = array<i32>} : memref<5x2x128xf32, #tpu.memory_space<vmem>>, vector<1x2x128xf32>,
    %cst_209 = arith.constant dense<0xFF800000> : vector<2xf32>
    %427 = vector.multi_reduction <maximumf>, %420, %cst_209 [1] : vector<2x34xf32> to vector<2xf32>
    %428 = vector.shape_cast %427 : vector<2xf32> to vector<2x1xf32>
    %429 = vector.broadcast %428 : vector<2x1xf32> to vector<2x34xf32>
    %430 = arith.cmpf oeq, %420, %429 : vector<2x34xf32>
    %c34_i32_210 = arith.constant 34 : i32
    %431 = vector.broadcast %c34_i32_210 : i32 to vector<2x34xi32>
    %432 = arith.select %430, %53, %431 : vector<2x34xi1>, vector<2x34xi32>
    %cst_211 = arith.constant dense<2147483647> : vector<2xi32>
    %433 = vector.multi_reduction <minsi>, %432, %cst_211 [1] : vector<2x34xi32> to vector<2xi32>
    %434 = vector.shape_cast %433 : vector<2xi32> to vector<2x1xi32>
    %435 = vector.broadcast %434 : vector<2x1xi32> to vector<2x34xi32>
    %436 = arith.cmpi eq, %53, %435 : vector<2x34xi32>
    %437 = arith.extui %436 : vector<2x34xi1> to vector<2x34xi32>
    %438 = arith.sitofp %437 : vector<2x34xi32> to vector<2x34xf32>
    %cst_212 = arith.constant dense<0.000000e+00> : vector<2x8xf32>
    %439 = tpu.matmul %438, %25, %cst_212 {dimension_numbers = #tpu.dot_dimension_numbers<[1], [0], [0], [1], [0, 0, 1, 1], [], []>} : vector<2x34xf32>, vector<34x8xf32>, vector<2x8xf32> -> vector<2x8xf32>
    %cst_213 = arith.constant dense<0.000000e+00> : vector<2x96xf32>
    %440 = tpu.matmul %405, %8, %cst_213 {dimension_numbers = #tpu.dot_dimension_numbers<[1], [0], [0], [1], [0, 0, 1, 1], [], []>} : vector<2x19xf32>, vector<19x96xf32>, vector<2x96xf32> -> vector<2x96xf32>
    %cst_214 = arith.constant dense<0.000000e+00> : vector<2x96xf32>
    %441 = tpu.matmul %439, %9, %cst_214 {dimension_numbers = #tpu.dot_dimension_numbers<[1], [0], [0], [1], [0, 0, 1, 1], [], []>} : vector<2x8xf32>, vector<8x96xf32>, vector<2x96xf32> -> vector<2x96xf32>
    %442 = arith.addf %440, %441 : vector<2x96xf32>
    %cst_215 = arith.constant dense<0.000000e+00> : vector<2x96xf32>
    %443 = tpu.matmul %380, %10, %cst_215 {dimension_numbers = #tpu.dot_dimension_numbers<[1], [0], [0], [1], [0, 0, 1, 1], [], []>} : vector<2x32xf32>, vector<32x96xf32>, vector<2x96xf32> -> vector<2x96xf32>
    %444 = arith.addf %442, %443 : vector<2x96xf32>
    %445 = vector.broadcast %11 : vector<1x96xf32> to vector<2x96xf32>
    %446 = arith.addf %444, %445 : vector<2x96xf32>
    %cst_216 = arith.constant dense<0.000000e+00> : vector<2x32xf32>
    %447 = tpu.matmul %380, %12, %cst_216 {dimension_numbers = #tpu.dot_dimension_numbers<[1], [0], [0], [1], [0, 0, 1, 1], [], []>} : vector<2x32xf32>, vector<32x32xf32>, vector<2x32xf32> -> vector<2x32xf32>
    %448 = vector.broadcast %13 : vector<1x32xf32> to vector<2x32xf32>
    %449 = arith.addf %447, %448 : vector<2x32xf32>
    %450 = vector.extract_strided_slice %446 {offsets = [0, 0], sizes = [2, 32], strides = [1, 1]} : vector<2x96xf32> to vector<2x32xf32>
    %cst_217 = arith.constant 0.000000e+00 : f32
    %451 = vector.broadcast %cst_217 : f32 to vector<2x32xf32>
    %452 = arith.subf %451, %450 : vector<2x32xf32>
    %453 = math.exp %452 : vector<2x32xf32>
    %cst_218 = arith.constant 1.000000e+00 : f32
    %454 = vector.broadcast %cst_218 : f32 to vector<2x32xf32>
    %455 = arith.addf %454, %453 : vector<2x32xf32>
    %cst_219 = arith.constant 1.000000e+00 : f32
    %456 = vector.broadcast %cst_219 : f32 to vector<2x32xf32>
    %457 = arith.divf %456, %455 : vector<2x32xf32>
    %458 = vector.extract_strided_slice %446 {offsets = [0, 32], sizes = [2, 32], strides = [1, 1]} : vector<2x96xf32> to vector<2x32xf32>
    %cst_220 = arith.constant 0.000000e+00 : f32
    %459 = vector.broadcast %cst_220 : f32 to vector<2x32xf32>
    %460 = arith.subf %459, %458 : vector<2x32xf32>
    %461 = math.exp %460 : vector<2x32xf32>
    %cst_221 = arith.constant 1.000000e+00 : f32
    %462 = vector.broadcast %cst_221 : f32 to vector<2x32xf32>
    %463 = arith.addf %462, %461 : vector<2x32xf32>
    %cst_222 = arith.constant 1.000000e+00 : f32
    %464 = vector.broadcast %cst_222 : f32 to vector<2x32xf32>
    %465 = arith.divf %464, %463 : vector<2x32xf32>
    %466 = vector.extract_strided_slice %446 {offsets = [0, 64], sizes = [2, 32], strides = [1, 1]} : vector<2x96xf32> to vector<2x32xf32>
    %cst_223 = arith.constant 1.000000e+00 : f32
    %467 = vector.broadcast %cst_223 : f32 to vector<2x32xf32>
    %468 = arith.subf %457, %467 : vector<2x32xf32>
    %469 = arith.mulf %468, %449 : vector<2x32xf32>
    %470 = arith.addf %466, %469 : vector<2x32xf32>
    %471 = math.tanh %470 : vector<2x32xf32>
    %cst_224 = arith.constant 1.000000e+00 : f32
    %472 = vector.broadcast %cst_224 : f32 to vector<2x32xf32>
    %473 = arith.subf %472, %465 : vector<2x32xf32>
    %474 = arith.mulf %473, %471 : vector<2x32xf32>
    %475 = arith.mulf %465, %380 : vector<2x32xf32>
    %476 = arith.addf %474, %475 : vector<2x32xf32>
    %cst_225 = arith.constant dense<0.000000e+00> : vector<2x32xf32>
    %477 = tpu.matmul %476, %14, %cst_225 {dimension_numbers = #tpu.dot_dimension_numbers<[1], [0], [0], [1], [0, 0, 1, 1], [], []>} : vector<2x32xf32>, vector<32x32xf32>, vector<2x32xf32> -> vector<2x32xf32>
    %478 = vector.broadcast %15 : vector<1x32xf32> to vector<2x32xf32>
    %479 = arith.addf %477, %478 : vector<2x32xf32>
    %cst_226 = arith.constant 0.000000e+00 : f32
    %480 = vector.broadcast %cst_226 : f32 to vector<2x32xf32>
    %481 = arith.maximumf %479, %480 : vector<2x32xf32>
    %cst_227 = arith.constant dense<0.000000e+00> : vector<2x32xf32>
    %482 = tpu.matmul %481, %16, %cst_227 {dimension_numbers = #tpu.dot_dimension_numbers<[1], [0], [0], [1], [0, 0, 1, 1], [], []>} : vector<2x32xf32>, vector<32x32xf32>, vector<2x32xf32> -> vector<2x32xf32>
    %483 = vector.broadcast %17 : vector<1x32xf32> to vector<2x32xf32>
    %484 = arith.addf %482, %483 : vector<2x32xf32>
    %cst_228 = arith.constant 0.000000e+00 : f32
    %485 = vector.broadcast %cst_228 : f32 to vector<2x32xf32>
    %486 = arith.maximumf %484, %485 : vector<2x32xf32>
    %cst_229 = arith.constant dense<0.000000e+00> : vector<2x22xf32>
    %487 = tpu.matmul %486, %51, %cst_229 {dimension_numbers = #tpu.dot_dimension_numbers<[1], [0], [0], [1], [0, 0, 1, 1], [], []>} : vector<2x32xf32>, vector<32x22xf32>, vector<2x22xf32> -> vector<2x22xf32>
    %488 = arith.addf %487, %7 : vector<2x22xf32>
    %cst_230 = arith.constant dense<0xFF800000> : vector<2xf32>
    %489 = vector.multi_reduction <maximumf>, %488, %cst_230 [1] : vector<2x22xf32> to vector<2xf32>
    %490 = vector.shape_cast %489 : vector<2xf32> to vector<2x1xf32>
    %491 = vector.broadcast %490 : vector<2x1xf32> to vector<2x22xf32>
    %492 = arith.cmpf oeq, %488, %491 : vector<2x22xf32>
    %c22_i32_231 = arith.constant 22 : i32
    %493 = vector.broadcast %c22_i32_231 : i32 to vector<2x22xi32>
    %494 = arith.select %492, %52, %493 : vector<2x22xi1>, vector<2x22xi32>
    %cst_232 = arith.constant dense<2147483647> : vector<2xi32>
    %495 = vector.multi_reduction <minsi>, %494, %cst_232 [1] : vector<2x22xi32> to vector<2xi32>
    %496 = vector.shape_cast %495 : vector<2xi32> to vector<2x1xi32>
    %497 = vector.broadcast %496 : vector<2x1xi32> to vector<2x22xi32>
    %498 = arith.cmpi eq, %52, %497 : vector<2x22xi32>
    %499 = arith.extui %498 : vector<2x22xi1> to vector<2x22xi32>
    %500 = arith.sitofp %499 : vector<2x22xi32> to vector<2x22xf32>
    %cst_233 = arith.constant dense<0.000000e+00> : vector<2x19xf32>
    %501 = tpu.matmul %500, %6, %cst_233 {dimension_numbers = #tpu.dot_dimension_numbers<[1], [0], [0], [1], [0, 0, 1, 1], [], []>} : vector<2x22xf32>, vector<22x19xf32>, vector<2x19xf32> -> vector<2x19xf32>
    %cst_234 = arith.constant dense<0.000000e+00> : vector<2x32xf32>
    %502 = tpu.matmul %486, %18, %cst_234 {dimension_numbers = #tpu.dot_dimension_numbers<[1], [0], [0], [1], [0, 0, 1, 1], [], []>} : vector<2x32xf32>, vector<32x32xf32>, vector<2x32xf32> -> vector<2x32xf32>
    %cst_235 = arith.constant dense<0.000000e+00> : vector<2x32xf32>
    %503 = tpu.matmul %501, %19, %cst_235 {dimension_numbers = #tpu.dot_dimension_numbers<[1], [0], [0], [1], [0, 0, 1, 1], [], []>} : vector<2x19xf32>, vector<19x32xf32>, vector<2x32xf32> -> vector<2x32xf32>
    %504 = arith.addf %502, %503 : vector<2x32xf32>
    %505 = vector.broadcast %20 : vector<1x32xf32> to vector<2x32xf32>
    %506 = arith.addf %504, %505 : vector<2x32xf32>
    %cst_236 = arith.constant 0.000000e+00 : f32
    %507 = vector.broadcast %cst_236 : f32 to vector<2x32xf32>
    %508 = arith.maximumf %506, %507 : vector<2x32xf32>
    %cst_237 = arith.constant dense<0.000000e+00> : vector<2x32xf32>
    %509 = tpu.matmul %508, %21, %cst_237 {dimension_numbers = #tpu.dot_dimension_numbers<[1], [0], [0], [1], [0, 0, 1, 1], [], []>} : vector<2x32xf32>, vector<32x32xf32>, vector<2x32xf32> -> vector<2x32xf32>
    %510 = vector.broadcast %22 : vector<1x32xf32> to vector<2x32xf32>
    %511 = arith.addf %509, %510 : vector<2x32xf32>
    %cst_238 = arith.constant 0.000000e+00 : f32
    %512 = vector.broadcast %cst_238 : f32 to vector<2x32xf32>
    %513 = arith.maximumf %511, %512 : vector<2x32xf32>
    %cst_239 = arith.constant dense<0.000000e+00> : vector<2x34xf32>
    %514 = tpu.matmul %513, %23, %cst_239 {dimension_numbers = #tpu.dot_dimension_numbers<[1], [0], [0], [1], [0, 0, 1, 1], [], []>} : vector<2x32xf32>, vector<32x34xf32>, vector<2x34xf32> -> vector<2x34xf32>
    %515 = vector.broadcast %24 : vector<1x34xf32> to vector<2x34xf32>
    %516 = arith.addf %514, %515 : vector<2x34xf32>
    %cst_240 = arith.constant dense<0.000000e+00> : vector<2x128xf32>
    %517 = tpu.matmul %487, %26, %cst_240 {dimension_numbers = #tpu.dot_dimension_numbers<[1], [0], [0], [1], [0, 0, 1, 1], [], []>} : vector<2x22xf32>, vector<22x128xf32>, vector<2x128xf32> -> vector<2x128xf32>
    %cst_241 = arith.constant dense<0.000000e+00> : vector<2x128xf32>
    %518 = tpu.matmul %516, %27, %cst_241 {dimension_numbers = #tpu.dot_dimension_numbers<[1], [0], [0], [1], [0, 0, 1, 1], [], []>} : vector<2x34xf32>, vector<34x128xf32>, vector<2x128xf32> -> vector<2x128xf32>
    %519 = arith.addf %517, %518 : vector<2x128xf32>
    %c4 = arith.constant 4 : index
    %c0_242 = arith.constant 0 : index
    %c0_243 = arith.constant 0 : index
    %520 = vector.load %arg34[%c4, %c0_242, %c0_243] : memref<5x2x128xf32, #tpu.memory_space<vmem>>, vector<1x2x128xf32>
    %521 = vector.shape_cast %520 : vector<1x2x128xf32> to vector<2x128xf32>
    %522 = vector.shape_cast %519 : vector<2x128xf32> to vector<1x2x128xf32>
    tpu.vector_store %arg34[%c4, %c0_242, %c0_243], %522 {strides = array<i32>} : memref<5x2x128xf32, #tpu.memory_space<vmem>>, vector<1x2x128xf32>,
    return
  }
}

</mosaic_0001>

<bundles_post_ra>
// kernel: trancenet_forward.2
= control target key start
LH: loop header
LB: loop body
LE: loop exit
PB: predicated region body
PF: predicated region fallthrough
CT: control target
= control target key end

     0   :  { %v153_v0 = vmov 0.0|0.0   ;;  %vm154_vm0 = vmmov 0   ;;  %v155_v4 = vmov 0.0   ;;  %v156_v7 = vmov 0   ;;  %s207_s0 = inlined_call_operand.vmem [shape: f32[54,128], index: 0, kind: input, shape index: {}]   ;;  %s208_s2 = inlined_call_operand.vmem [shape: f32[8,1], index: 2, kind: input, shape index: {}]   ;;  %s209_s1 = inlined_call_operand.vmem [shape: f32[8,54], index: 1, kind: input, shape index: {}]   ;;  %s210_s3 = inlined_call_operand.vmem [shape: f32[8,128], index: 3, kind: output, shape index: {}]  }
   0x1   :  { %139 = vmatprep.subr.bf16.mxu0 %v153_v0  ;;  %v15_v1 = vld [vmem:[%s207_s0] sm:$0xff]  ;;  %v16_v2 = vld [vmem:[%s207_s0 + $0x8] sm:$0xff]  ;;  %v17_v3 = vld [vmem:[%s207_s0 + $0x10] sm:$0xff]  ;;  %136 = vmatprep.mubr.msk.f32.mxu0 %vm154_vm0, %v155_v4  ;;  %vm32_vm1 = vcmask 1045504   ;;  %vm28_vm2 = vcmask 441344  }
   0x2   :  { %v140_v5 = vpack.c.bf16 %v16_v2, %v15_v1  ;;  %v18_v6 = vld [vmem:[%s207_s0 + $0x18] sm:$0xff]  ;;  %152 = vset.pattern.permute.xlu0 %v156_v7  ;;  %v22_v8 = vld [vmem:[%s208_s2] sm:$0xff]  ;;  %v20_v11 = vld [vmem:[%s207_s0 + $0x28] sm:$0xff] }
   0x3   :  { %v143_v9 = vpack.c.bf16 %v18_v6, %v17_v3  ;;  %25 = vperm.xlu0 %152, %v22_v8   ;;  %v19_v10 = vld [vmem:[%s207_s0 + $0x20] sm:$0xff]  ;;  %v21_v13 = vld [vmem:[%s207_s0 + $0x30] sm:$0x3f] }
   0x4   :  { %141 = vmatpush3.bf16.msra.mxu0 %v140_v5  ;;  %v146_v12 = vpack.c.bf16 %v20_v11, %v19_v10  ;;  %v14_v14 = vld [vmem:[%s209_s1] sm:$0xff] }
   0x5   :  { %142 = vmatprep.subr.bf16.mxu0 %v153_v0 }
   0x8   :  { %144 = vmatpush3.bf16.msra.mxu0 %v143_v9 }
   0x9   :  { %145 = vmatprep.subr.bf16.mxu0 %v153_v0 }
   0xc   :  { %147 = vmatpush3.bf16.msra.mxu0 %v146_v12 }
   0xd   :  { %134 = vmatprep.subr.mxu0 %v155_v4 }
  0x10   :  { %135 = vmatpush3.msk.msra.mxu0 %vm32_vm1, %v21_v13 }
  0x11   :  { %137 = vmatmul.mubr.msk.f32.vlgmr.msra.gmra.mrb[0].mxu0 %vm28_vm2, %v14_v14 }
  0x82   :  { %v26_v15 = vpop.permute.xlu0 %25 }
  0xe4   :  { %v102_v16 = vpop.f32.mrb[0].mxu0 }
  0xe5   :  { %v103_v17 = vadd.f32 %v102_v16, %v26_v15  ;;  %v138_v18 = vpop.f32.mrb[1].mxu0 }
  0xe7   :  { %v106_v19 = vmax.f32 %v103_v17, 0.0 }
  0xe9   :  { %107 = vst [vmem:[%s210_s3] sm:$0xff] %v106_v19 }

// kernel: trancenet_forward.3
= control target key start
LH: loop header
LB: loop body
LE: loop exit
PB: predicated region body
PF: predicated region fallthrough
CT: control target
= control target key end

     0   :  { %s8639_s3 = smov 1   ;;  %v374_v25 = vlaneseq  ;;  %v8640_v26 = vmov 1983009808   ;;  %s8641_s10 = smov 3   ;;  %vm8645_vm0 = vmmov 0   ;;  %vm633_vm1 = vcmask 523264   ;;  %s9912_s0 = inlined_call_operand.smem [shape: u32[35], index: -1, kind: input, shape index: {}] }
   0x1   :  { %s8688_s6 = sld [smem:[%s9912_s0 + %s8639_s3]]   ;;  %v387_v27 = vunpack.c.l.s4 %v8640_v26  ;;  %s8643_s14 = smov 2   ;;  %vm849_vm2 = vcmask 64512   ;;  %vm752_vm3 = vcmask 1042432   ;;  %vm739_vm4 = vcmask 154624  }
   0x2   :  { %s1_s9 = sld [smem:[%s9912_s0]]   ;;  %v8716_v34 = vshrl.u32 %v374_v25, 7  ;;  %s8644_s18 = smov 5   ;;  %vm999_vm5 = vcmask 261120   ;;  %vm1418_vm6 = vcmask 173056   ;;  %vm1446_vm9 = vcmask 1045504  }
   0x3   :  { %v388_v35 = vunpack.c.0.s8 %v387_v27  ;;  %s8752_s13 = sld [smem:[%s9912_s0 + %s8641_s10]]   ;;  %s8647_s22 = smov 4   ;;  %vm1442_vm10 = vcmask 179200   ;;  %vm1837_vm12 = vcmask 1041408   ;;  %vm1833_vm13 = vcmask 277504  }
   0x4   :  { %s6649_s17 = sld [smem:[%s9912_s0 + %s8643_s14]]   ;;  %s8648_s26 = smov 13   ;;  %vm1988_vm14 = vcmask 271360  }
   0x5   :  { %v8723_v42 = vsub.s32 %v388_v35, %v8716_v34  ;;  %s6652_s21 = sld [smem:[%s9912_s0 + %s8644_s18]]   ;;  %s8649_s30 = smov 12  }
   0x6   :  { %s6651_s25 = sld [smem:[%s9912_s0 + %s8647_s22]]   ;;  %s8650_s4 = smov 11  }
   0x7   :  { %v143_v0 = vld [vmem:[%s8688_s6 + $0x8] sm:$0xff]  ;;  %v145_v1 = vld [vmem:[%s8688_s6 + $0x18] sm:$0xff]  ;;  %v142_v2 = vld [vmem:[%s8688_s6] sm:$0xff]  ;;  %s8902_s29 = sld [smem:[%s9912_s0 + %s8648_s26]]   ;;  %s8651_s8 = smov 14  }
   0x8   :  { %v8006_v3 = vpack.c.bf16 %v145_v1, %v143_v0  ;;  %v144_v4 = vld [vmem:[%s8688_s6 + $0x10] sm:$0xff]  ;;  %v147_v5 = vld [vmem:[%s8688_s6 + $0x28] sm:$0xff]  ;;  %v149_v6 = vld [vmem:[%s8688_s6 + $0x38] sm:$0xff]  ;;  %s8907_s3 = sld [smem:[%s9912_s0 + %s8649_s30]]   ;;  %s8652_s12 = smov 10  }
   0x9   :  { %v8008_v7 = vpack.c.bf16 %v144_v4, %v142_v2  ;;  %v8010_v8 = vpack.c.bf16 %v149_v6, %v147_v5  ;;  %v146_v9 = vld [vmem:[%s8688_s6 + $0x20] sm:$0xff]  ;;  %v148_v10 = vld [vmem:[%s8688_s6 + $0x30] sm:$0xff]  ;;  %v151_v11 = vld [vmem:[%s8688_s6 + $0x48] sm:$0xff]  ;;  %s6658_s7 = sld [smem:[%s9912_s0 + %s8650_s4]]   ;;  %s8653_s16 = smov 6  }
   0xa   :  { %8007 = vmatprep.subr.bf16.mxu0 %v8006_v3  ;;  %v153_v12 = vld [vmem:[%s8688_s6 + $0x58] sm:$0xff]  ;;  %v8012_v13 = vpack.c.bf16 %v148_v10, %v146_v9  ;;  %v150_v15 = vld [vmem:[%s8688_s6 + $0x40] sm:$0xff]  ;;  %v152_v16 = vld [vmem:[%s8688_s6 + $0x50] sm:$0xff]  ;;  %s8915_s11 = sld [smem:[%s9912_s0 + %s8651_s8]]   ;;  %s8654_s20 = smov 16  }
   0xb   :  { %8009 = vmatpush1.bf16.msra.mxu0 %v8008_v7  ;;  %v8014_v14 = vpack.c.bf16 %v153_v12, %v151_v11  ;;  %v155_v17 = vld [vmem:[%s8688_s6 + $0x68] sm:$0xff]  ;;  %v157_v18 = vld [vmem:[%s8688_s6 + $0x78] sm:$0xff]  ;;  %v8016_v19 = vpack.c.bf16 %v152_v16, %v150_v15  ;;  %v154_v21 = vld [vmem:[%s8688_s6 + $0x60] sm:$0xff]  ;;  %s6657_s15 = sld [smem:[%s9912_s0 + %s8652_s12]]   ;;  %s8655_s24 = smov 32  }
   0xc   :  { %8011 = vmatprep.subr.bf16.mxu0 %v8010_v8  ;;  %v8018_v20 = vpack.c.bf16 %v157_v18, %v155_v17  ;;  %v156_v22 = vld [vmem:[%s8688_s6 + $0x70] sm:$0xff]  ;;  %v159_v23 = vld [vmem:[%s8688_s6 + $0x88] sm:$0xff]  ;;  %v161_v24 = vld [vmem:[%s8688_s6 + $0x98] sm:$0xff]  ;;  %s6653_s19 = sld [smem:[%s9912_s0 + %s8653_s16]]   ;;  %s8657_s30 = smov 17  }
   0xd   :  { %v8020_v28 = vpack.c.bf16 %v156_v22, %v154_v21  ;;  %v8022_v29 = vpack.c.bf16 %v161_v24, %v159_v23  ;;  %v158_v30 = vld [vmem:[%s8688_s6 + $0x80] sm:$0xff]  ;;  %v160_v31 = vld [vmem:[%s8688_s6 + $0x90] sm:$0xff]  ;;  %v163_v32 = vld [vmem:[%s8688_s6 + $0xa8] sm:$0xff]  ;;  %s6663_s23 = sld [smem:[%s9912_s0 + %s8654_s20]]   ;;  %s8658_s5 = smov 64  }
   0xe   :  { %v165_v33 = vld [vmem:[%s8688_s6 + $0xb8] sm:$0xff]  ;;  %v8024_v36 = vpack.c.bf16 %v160_v31, %v158_v30  ;;  %v162_v38 = vld [vmem:[%s8688_s6 + $0xa0] sm:$0xff]  ;;  %v164_v39 = vld [vmem:[%s8688_s6 + $0xb0] sm:$0xff]  ;;  %s8990_s4 = sld [smem:[%s9912_s0 + %s8657_s30]]   ;;  %s8660_s10 = smov 96  }
   0xf   :  { %8013 = vmatpush1.bf16.msra.mxu0 %v8012_v13  ;;  %v8026_v37 = vpack.c.bf16 %v165_v33, %v163_v32  ;;  %v167_v40 = vld [vmem:[%s8688_s6 + $0xc8] sm:$0xff]  ;;  %v169_v41 = vld [vmem:[%s8688_s6 + $0xd8] sm:$0xff]  ;;  %v8028_v43 = vpack.c.bf16 %v164_v39, %v162_v38  ;;  %v166_v45 = vld [vmem:[%s8688_s6 + $0xc0] sm:$0xff]  ;;  %s8666_s30 = smov 21   ;;  %s8668_s12 = smov 9  }
  0x10   :  { %8015 = vmatprep.subr.bf16.mxu0 %v8014_v14  ;;  %v8030_v44 = vpack.c.bf16 %v169_v41, %v167_v40  ;;  %v168_v46 = vld [vmem:[%s8688_s6 + $0xd0] sm:$0xff]  ;;  %v8727_v47 = vld [vmem:[%s1_s9] sm:$0xff]  ;;  %v171_v48 = vld [vmem:[%s8688_s6 + $0xe8] sm:$0xff]  ;;  %s8669_s16 = smov 8   ;;  %s8670_s20 = smov 25  }
  0x11   :  { %v173_v49 = vld [vmem:[%s8688_s6 + $0xf8] sm:$0xff]  ;;  %v8733_v50 = vrot.slane %v8727_v47, %v8723_v42  ;;  %v8032_v51 = vpack.c.bf16 %v168_v46, %v166_v45  ;;  %v170_v54 = vld [vmem:[%s8688_s6 + $0xe0] sm:$0xff]  ;;  %v172_v55 = vld [vmem:[%s8688_s6 + $0xf0] sm:$0xff]  ;;  %s8672_s1 = smov 27  }
  0x12   :  { %v8034_v53 = vpack.c.bf16 %v173_v49, %v171_v48  ;;  %v175_v56 = vld [vmem:[%s8688_s6 + $0x108] sm:$0xff]  ;;  %v177_v57 = vld [vmem:[%s8688_s6 + $0x118] sm:$0xff]  ;;  %v8036_v58 = vpack.c.bf16 %v172_v55, %v170_v54  ;;  %v174_v60 = vld [vmem:[%s8688_s6 + $0x100] sm:$0xff]  ;;  %s6674_s8 = sld [smem:[%s9912_s0 + %s8672_s1]]  }
  0x13   :  { %8017 = vmatpush1.bf16.msra.mxu0 %v8016_v19  ;;  %v400_v52 = vcombine.high %v8733_v50, %v8733_v50  ;;  %v8038_v59 = vpack.c.bf16 %v177_v57, %v175_v56  ;;  %v176_v61 = vld [vmem:[%s8688_s6 + $0x110] sm:$0xff]  ;;  %v179_v62 = vld [vmem:[%s8688_s6 + $0x128] sm:$0xff]  ;;  %v181_v63 = vld [vmem:[%s8688_s6 + $0x138] sm:$0xff] }
  0x14   :  { %8019 = vmatprep.subr.bf16.mxu0 %v8018_v20  ;;  %v8040_v0 = vpack.c.bf16 %v176_v61, %v174_v60  ;;  %v8042_v1 = vpack.c.bf16 %v181_v63, %v179_v62  ;;  %v178_v2 = vld [vmem:[%s8688_s6 + $0x120] sm:$0xff]  ;;  %v180_v3 = vld [vmem:[%s8688_s6 + $0x130] sm:$0xff]  ;;  %v183_v4 = vld [vmem:[%s8688_s6 + $0x148] sm:$0xff] }
  0x15   :  { %470 = vmatprep.mubr.f32.mxu0 %v400_v52  ;;  %v185_v5 = vld [vmem:[%s8688_s6 + $0x158] sm:$0xff]  ;;  %v8044_v6 = vpack.c.bf16 %v180_v3, %v178_v2  ;;  %v182_v8 = vld [vmem:[%s8688_s6 + $0x140] sm:$0xff]  ;;  %v184_v9 = vld [vmem:[%s8688_s6 + $0x150] sm:$0xff] }
  0x16   :  { %v8046_v7 = vpack.c.bf16 %v185_v5, %v183_v4  ;;  %v187_v10 = vld [vmem:[%s8688_s6 + $0x168] sm:$0xff]  ;;  %v189_v11 = vld [vmem:[%s8688_s6 + $0x178] sm:$0xff]  ;;  %v8048_v12 = vpack.c.bf16 %v184_v9, %v182_v8  ;;  %v186_v14 = vld [vmem:[%s8688_s6 + $0x160] sm:$0xff]  ;;  %v385_v5 = vcombine.high %v8727_v47, %v8727_v47 }
  0x17   :  { %8021 = vmatpush1.bf16.msra.mxu0 %v8020_v28  ;;  %v8050_v13 = vpack.c.bf16 %v189_v11, %v187_v10  ;;  %v188_v15 = vld [vmem:[%s8688_s6 + $0x170] sm:$0xff]  ;;  %v191_v16 = vld [vmem:[%s8688_s6 + $0x188] sm:$0xff]  ;;  %v193_v17 = vld [vmem:[%s8688_s6 + $0x198] sm:$0xff] }
  0x18   :  { %8023 = vmatprep.subr.bf16.mxu0 %v8022_v29  ;;  %v190_v18 = vld [vmem:[%s8688_s6 + $0x180] sm:$0xff]  ;;  %v192_v19 = vld [vmem:[%s8688_s6 + $0x190] sm:$0xff]  ;;  %v288_v21 = vld [vmem:[%s8752_s13 + $0x88] sm:$0xff]  ;;  %v8052_v23 = vpack.c.bf16 %v188_v15, %v186_v14  ;;  %v8054_v29 = vpack.c.bf16 %v193_v17, %v191_v16  ;;  %v8803_v16 = vrot.slane %v385_v5, %v8723_v42 }
  0x19   :  { %v287_v20 = vld [vmem:[%s8752_s13 + $0x80] sm:$0xff]  ;;  %v272_v26 = vld [vmem:[%s8752_s13 + $0x8] sm:$0xff]  ;;  %v289_v27 = vld [vmem:[%s8752_s13 + $0x90] sm:$0xff]  ;;  %v8056_v40 = vpack.c.bf16 %v192_v19, %v190_v18 }
  0x1a   :  { %v271_v22 = vld [vmem:[%s8752_s13] sm:$0xff]  ;;  %v8134_v24 = vpack.c.bf16 %v288_v21, %v287_v20  ;;  %v290_v28 = vld [vmem:[%s8752_s13 + $0x98] sm:$0xff]  ;;  %v273_v32 = vld [vmem:[%s8752_s13 + $0x10] sm:$0xff] }
  0x1b   :  { %8025 = vmatpush1.bf16.msra.mxu0 %v8024_v36  ;;  %v8136_v30 = vpack.c.bf16 %v272_v26, %v271_v22  ;;  %v8138_v31 = vpack.c.bf16 %v290_v28, %v289_v27  ;;  %v274_v33 = vld [vmem:[%s8752_s13 + $0x18] sm:$0xff]  ;;  %v291_v35 = vld [vmem:[%s8752_s13 + $0xa0] sm:$0xff]  ;;  %v195_v36 = vld [vmem:[%s8688_s6 + $0x1a8] sm:$0xff] }
  0x1c   :  { %8027 = vmatprep.subr.bf16.mxu0 %v8026_v37  ;;  %v197_v37 = vld [vmem:[%s8688_s6 + $0x1b8] sm:$0xff]  ;;  %8135 = vmatprep.subr.bf16.mxu1 %v8134_v24  ;;  %v292_v38 = vld [vmem:[%s8752_s13 + $0xa8] sm:$0xff]  ;;  %v8140_v39 = vpack.c.bf16 %v274_v33, %v273_v32  ;;  %v194_v41 = vld [vmem:[%s8688_s6 + $0x1a0] sm:$0xff] }
  0x1d   :  { %8137 = vmatpush3.bf16.msra.mxu1 %v8136_v30  ;;  %v276_v45 = vld [vmem:[%s8752_s13 + $0x28] sm:$0xff]  ;;  %v8058_v46 = vpack.c.bf16 %v197_v37, %v195_v36  ;;  %v196_v48 = vld [vmem:[%s8688_s6 + $0x1b0] sm:$0xff]  ;;  %v198_v56 = vld [vmem:[%s8688_s6 + $0x1c0] sm:$0xff] }
  0x1e   :  { %8139 = vmatprep.subr.bf16.mxu1 %v8138_v31  ;;  %v293_v49 = vld [vmem:[%s8752_s13 + $0xb0] sm:$0xff]  ;;  %v199_v52 = vld [vmem:[%s8688_s6 + $0x1c8] sm:$0xff]  ;;  %v8060_v55 = vpack.c.bf16 %v196_v48, %v194_v41  ;;  %v295_v62 = vld [vmem:[%s8752_s13 + $0xc0] sm:$0xff] }
  0x1f   :  { %8029 = vmatpush1.bf16.msra.mxu0 %v8028_v43  ;;  %v8142_v43 = vpack.c.bf16 %v292_v38, %v291_v35  ;;  %v200_v61 = vld [vmem:[%s8688_s6 + $0x1d0] sm:$0xff]  ;;  %v296_v63 = vld [vmem:[%s8752_s13 + $0xc8] sm:$0xff]  ;;  %v202_v4 = vld [vmem:[%s8688_s6 + $0x1e0] sm:$0xff] }
  0x20   :  { %8031 = vmatprep.subr.bf16.mxu0 %v8030_v44  ;;  %v275_v44 = vld [vmem:[%s8752_s13 + $0x20] sm:$0xff]  ;;  %v8064_v3 = vpack.c.bf16 %v200_v61, %v198_v56  ;;  %v280_v8 = vld [vmem:[%s8752_s13 + $0x48] sm:$0xff]  ;;  %v204_v10 = vld [vmem:[%s8688_s6 + $0x1f0] sm:$0xff] }
  0x21   :  { %8141 = vmatpush3.bf16.msra.mxu1 %v8140_v39  ;;  %v8144_v54 = vpack.c.bf16 %v276_v45, %v275_v44  ;;  %v297_v11 = vld [vmem:[%s8752_s13 + $0xd0] sm:$0xff]  ;;  %v209_v14 = vld [vmem:[%s8688_s6 + $0x218] sm:$0xff]  ;;  %v8068_v15 = vpack.c.bf16 %v204_v10, %v202_v4  ;;  %v206_v21 = vld [vmem:[%s8688_s6 + $0x200] sm:$0xff] }
  0x22   :  { %8143 = vmatprep.subr.bf16.mxu1 %v8142_v43  ;;  %v281_v18 = vld [vmem:[%s8752_s13 + $0x50] sm:$0xff]  ;;  %v282_v19 = vld [vmem:[%s8752_s13 + $0x58] sm:$0xff]  ;;  %v299_v26 = vld [vmem:[%s8752_s13 + $0xe0] sm:$0xff] }
  0x23   :  { %8033 = vmatpush1.bf16.msra.mxu0 %v8032_v51  ;;  %v294_v51 = vld [vmem:[%s8752_s13 + $0xb8] sm:$0xff]  ;;  %v208_v22 = vld [vmem:[%s8688_s6 + $0x210] sm:$0xff]  ;;  %v300_v27 = vld [vmem:[%s8752_s13 + $0xe8] sm:$0xff]  ;;  %v8156_v28 = vpack.c.bf16 %v282_v19, %v281_v18 }
  0x24   :  { %8035 = vmatprep.subr.bf16.mxu0 %v8034_v53  ;;  %v201_v53 = vld [vmem:[%s8688_s6 + $0x1d8] sm:$0xff]  ;;  %v8146_v57 = vpack.c.bf16 %v294_v51, %v293_v49  ;;  %v8072_v42 = vpack.c.bf16 %v208_v22, %v206_v21  ;;  %v210_v31 = vld [vmem:[%s8688_s6 + $0x220] sm:$0xff]  ;;  %v212_v32 = vld [vmem:[%s8688_s6 + $0x230] sm:$0xff]  ;;  %v8158_v33 = vpack.c.bf16 %v300_v27, %v299_v26 }
  0x25   :  { %v8062_v60 = vpack.c.bf16 %v201_v53, %v199_v52  ;;  %8145 = vmatpush3.bf16.msra.mxu1 %v8144_v54  ;;  %v213_v24 = vld [vmem:[%s8688_s6 + $0x238] sm:$0xff]  ;;  %v215_v35 = vld [vmem:[%s8688_s6 + $0x248] sm:$0xff]  ;;  %v8076_v37 = vpack.c.bf16 %v212_v32, %v210_v31  ;;  %v214_v39 = vld [vmem:[%s8688_s6 + $0x240] sm:$0xff] }
  0x26   :  { %8147 = vmatprep.subr.bf16.mxu1 %v8146_v57  ;;  %v217_v36 = vld [vmem:[%s8688_s6 + $0x258] sm:$0xff]  ;;  %v219_v41 = vld [vmem:[%s8688_s6 + $0x268] sm:$0xff]  ;;  %v218_v45 = vld [vmem:[%s8688_s6 + $0x260] sm:$0xff] }
  0x27   :  { %8037 = vmatpush1.bf16.msra.mxu0 %v8036_v58  ;;  %v277_v58 = vld [vmem:[%s8752_s13 + $0x30] sm:$0xff]  ;;  %v8078_v38 = vpack.c.bf16 %v217_v36, %v215_v35  ;;  %v221_v43 = vld [vmem:[%s8688_s6 + $0x278] sm:$0xff]  ;;  %v223_v48 = vld [vmem:[%s8688_s6 + $0x288] sm:$0xff] }
  0x28   :  { %8039 = vmatprep.subr.bf16.mxu0 %v8038_v59  ;;  %v278_v59 = vld [vmem:[%s8752_s13 + $0x38] sm:$0xff]  ;;  %v8082_v44 = vpack.c.bf16 %v221_v43, %v219_v41  ;;  %v222_v53 = vld [vmem:[%s8688_s6 + $0x280] sm:$0xff]  ;;  %v224_v54 = vld [vmem:[%s8688_s6 + $0x290] sm:$0xff] }
  0x29   :  { %v8148_v2 = vpack.c.bf16 %v278_v59, %v277_v58  ;;  %v225_v49 = vld [vmem:[%s8688_s6 + $0x298] sm:$0xff]  ;;  %v8088_v57 = vpack.c.bf16 %v224_v54, %v222_v53  ;;  %v226_v59 = vld [vmem:[%s8688_s6 + $0x2a0] sm:$0xff]  ;;  %v231_v61 = vld [vmem:[%s8688_s6 + $0x2c8] sm:$0xff] }
  0x2a   :  { %v8086_v52 = vpack.c.bf16 %v225_v49, %v223_v48  ;;  %v229_v56 = vld [vmem:[%s8688_s6 + $0x2b8] sm:$0xff]  ;;  %v242_v19 = vld [vmem:[%s8688_s6 + $0x320] sm:$0xff]  ;;  %v247_v21 = vld [vmem:[%s8688_s6 + $0x348] sm:$0xff] }
  0x2b   :  { %8041 = vmatpush1.bf16.msra.mxu0 %v8040_v0  ;;  %v203_v0 = vld [vmem:[%s8688_s6 + $0x1e8] sm:$0xff]  ;;  %8149 = vmatpush3.bf16.msra.mxu1 %v8148_v2  ;;  %v232_v2 = vld [vmem:[%s8688_s6 + $0x2d0] sm:$0xff]  ;;  %v237_v4 = vld [vmem:[%s8688_s6 + $0x2f8] sm:$0xff] }
  0x2c   :  { %8043 = vmatprep.subr.bf16.mxu0 %v8042_v1  ;;  %v205_v1 = vld [vmem:[%s8688_s6 + $0x1f8] sm:$0xff]  ;;  %v246_v26 = vld [vmem:[%s8688_s6 + $0x340] sm:$0xff]  ;;  %v248_v27 = vld [vmem:[%s8688_s6 + $0x350] sm:$0xff] }
  0x2d   :  { %v8066_v9 = vpack.c.bf16 %v205_v1, %v203_v0  ;;  %v230_v1 = vld [vmem:[%s8688_s6 + $0x2c0] sm:$0xff]  ;;  %v241_v10 = vld [vmem:[%s8688_s6 + $0x318] sm:$0xff]  ;;  %v252_v32 = vld [vmem:[%s8688_s6 + $0x370] sm:$0xff] }
  0x2e   :  { %v8096_v5 = vpack.c.bf16 %v232_v2, %v230_v1  ;;  %v249_v22 = vld [vmem:[%s8688_s6 + $0x358] sm:$0xff]  ;;  %v250_v31 = vld [vmem:[%s8688_s6 + $0x360] sm:$0xff]  ;;  %v264_v53 = vld [vmem:[%s8688_s6 + $0x3d0] sm:$0xff] }
  0x2f   :  { %8045 = vmatpush1.bf16.msra.mxu0 %v8044_v6  ;;  %v8150_v6 = vpack.c.bf16 %v296_v63, %v295_v62  ;;  %v233_v62 = vld [vmem:[%s8688_s6 + $0x2d8] sm:$0xff]  ;;  %v8116_v36 = vpack.c.bf16 %v252_v32, %v250_v31  ;;  %v267_v54 = vld [vmem:[%s8688_s6 + $0x3e8] sm:$0xff] }
  0x30   :  { %8047 = vmatprep.subr.bf16.mxu0 %v8046_v7  ;;  %v279_v7 = vld [vmem:[%s8752_s13 + $0x40] sm:$0xff]  ;;  %v8094_v0 = vpack.c.bf16 %v233_v62, %v231_v61  ;;  %v257_v35 = vld [vmem:[%s8688_s6 + $0x398] sm:$0xff]  ;;  %v284_v62 = vld [vmem:[%s8752_s13 + $0x68] sm:$0xff] }
  0x31   :  { %v8152_v47 = vpack.c.bf16 %v280_v8, %v279_v7  ;;  %8151 = vmatprep.subr.bf16.mxu1 %v8150_v6  ;;  %v234_v7 = vld [vmem:[%s8688_s6 + $0x2e0] sm:$0xff]  ;;  %v236_v8 = vld [vmem:[%s8688_s6 + $0x2f0] sm:$0xff]  ;;  %v261_v41 = vld [vmem:[%s8688_s6 + $0x3b8] sm:$0xff] }
  0x32   :  { %v265_v48 = vld [vmem:[%s8688_s6 + $0x3d8] sm:$0xff]  ;;  %v283_v61 = vld [vmem:[%s8752_s13 + $0x60] sm:$0xff] }
  0x33   :  { %8049 = vmatpush1.bf16.msra.mxu0 %v8048_v12  ;;  %v298_v12 = vld [vmem:[%s8752_s13 + $0xd8] sm:$0xff]  ;;  %8153 = vmatpush3.bf16.msra.mxu1 %v8152_v47  ;;  %v243_v47 = vld [vmem:[%s8688_s6 + $0x328] sm:$0xff] }
  0x34   :  { %8051 = vmatprep.subr.bf16.mxu0 %v8050_v13  ;;  %v207_v13 = vld [vmem:[%s8688_s6 + $0x208] sm:$0xff]  ;;  %v8154_v17 = vpack.c.bf16 %v298_v12, %v297_v11  ;;  %v8100_v11 = vpack.c.bf16 %v236_v8, %v234_v7  ;;  %v302_v1 = vld [vmem:[%s8752_s13 + $0xf8] sm:$0xff]  ;;  %v270_v7 = vld [vmem:[%s6649_s17] sm:$0x3]  ;;  %v380_v8 = vsub.s32 1, %v8716_v34 }
  0x35   :  { %v8070_v20 = vpack.c.bf16 %v209_v14, %v207_v13  ;;  %v238_v13 = vld [vmem:[%s8688_s6 + $0x300] sm:$0xff]  ;;  %v240_v14 = vld [vmem:[%s8688_s6 + $0x310] sm:$0xff] }
  0x36   :  { %8155 = vmatprep.subr.bf16.mxu1 %v8154_v17  ;;  %v8104_v17 = vpack.c.bf16 %v240_v14, %v238_v13  ;;  %v304_v14 = vld [vmem:[%s6652_s21] sm:$0xff] }
  0x37   :  { %8053 = vmatpush1.bf16.msra.mxu0 %v8052_v23  ;;  %v211_v23 = vld [vmem:[%s8688_s6 + $0x228] sm:$0xff]  ;;  %8157 = vmatpush3.bf16.msra.mxu1 %v8156_v28 }
  0x38   :  { %8055 = vmatprep.subr.bf16.mxu0 %v8054_v29  ;;  %v401_v29 = vcombine.high %v8803_v16, %v8803_v16  ;;  %v8074_v30 = vpack.c.bf16 %v213_v24, %v211_v23  ;;  %8159 = vmatprep.subr.bf16.mxu1 %v8158_v33  ;;  %v8110_v24 = vpack.c.bf16 %v249_v22, %v247_v21  ;;  %v251_v28 = vld [vmem:[%s8688_s6 + $0x368] sm:$0xff]  ;;  %v307_v21 = vld [vmem:[%s6652_s21 + $0x18] sm:$0xff] }
  0x39   :  { %v255_v33 = vld [vmem:[%s8688_s6 + $0x388] sm:$0xff] }
  0x3b   :  { %8057 = vmatpush1.bf16.msra.mxu0 %v8056_v40  ;;  %v216_v40 = vld [vmem:[%s8688_s6 + $0x250] sm:$0xff] }
  0x3c   :  { %8059 = vmatprep.subr.bf16.mxu0 %v8058_v46  ;;  %v220_v46 = vld [vmem:[%s8688_s6 + $0x270] sm:$0xff] }
  0x3d   :  { %v8084_v51 = vpack.c.bf16 %v220_v46, %v218_v45  ;;  %v260_v45 = vld [vmem:[%s8688_s6 + $0x3b0] sm:$0xff]  ;;  %v263_v46 = vld [vmem:[%s8688_s6 + $0x3c8] sm:$0xff] }
  0x3f   :  { %8061 = vmatpush1.bf16.msra.mxu0 %v8060_v55  ;;  %v227_v55 = vld [vmem:[%s8688_s6 + $0x2a8] sm:$0xff] }
  0x40   :  { %8063 = vmatprep.subr.bf16.mxu0 %v8062_v60  ;;  %v8090_v58 = vpack.c.bf16 %v229_v56, %v227_v55  ;;  %v228_v60 = vld [vmem:[%s8688_s6 + $0x2b0] sm:$0xff]  ;;  %v269_v55 = vld [vmem:[%s8688_s6 + $0x3f8] sm:$0xff] }
  0x41   :  { %v8092_v63 = vpack.c.bf16 %v228_v60, %v226_v59  ;;  %v268_v59 = vld [vmem:[%s8688_s6 + $0x3f0] sm:$0xff] }
  0x43   :  { %8065 = vmatpush1.bf16.msra.mxu0 %v8064_v3  ;;  %v235_v3 = vld [vmem:[%s8688_s6 + $0x2e8] sm:$0xff] }
  0x44   :  { %8067 = vmatprep.subr.bf16.mxu0 %v8066_v9  ;;  %v8098_v6 = vpack.c.bf16 %v237_v4, %v235_v3  ;;  %v239_v9 = vld [vmem:[%s8688_s6 + $0x308] sm:$0xff]  ;;  %v285_v3 = vld [vmem:[%s8752_s13 + $0x70] sm:$0xff]  ;;  %v286_v4 = vld [vmem:[%s8752_s13 + $0x78] sm:$0xff] }
  0x45   :  { %v8102_v12 = vpack.c.bf16 %v241_v10, %v239_v9  ;;  %v381_v10 = vrot.slane %v270_v7, %v380_v8 }
  0x47   :  { %8069 = vmatpush1.bf16.msra.mxu0 %v8068_v15  ;;  %v245_v15 = vld [vmem:[%s8688_s6 + $0x338] sm:$0xff] }
  0x48   :  { %8071 = vmatprep.subr.bf16.mxu0 %v8070_v20  ;;  %v8106_v18 = vpack.c.bf16 %v245_v15, %v243_v47  ;;  %v244_v20 = vld [vmem:[%s8688_s6 + $0x330] sm:$0xff]  ;;  %v305_v47 = vld [vmem:[%s6652_s21 + $0x8] sm:$0xff] }
  0x49   :  { %v8108_v23 = vpack.c.bf16 %v244_v20, %v242_v19  ;;  %v306_v20 = vld [vmem:[%s6652_s21 + $0x10] sm:$0xff] }
  0x4a   :  { %471 = vmatmul.mubr.f32.vlgmr.msra.gmra.mrb[0].mxu0 %v8733_v50  ;;  %v8080_v50 = vpack.c.bf16 %v216_v40, %v214_v39  ;;  %v256_v39 = vld [vmem:[%s8688_s6 + $0x390] sm:$0xff]  ;;  %v259_v40 = vld [vmem:[%s8688_s6 + $0x3a8] sm:$0xff]  ;;  %v8170_v22 = vpack.c.bf16 %v307_v21, %v306_v20 }
  0x4b   :  { %8073 = vmatpush1.bf16.msra.mxu0 %v8072_v42  ;;  %541 = vmatprep.mubr.f32.mxu0 %v401_v29  ;;  %v253_v42 = vld [vmem:[%s8688_s6 + $0x378] sm:$0xff]  ;;  %v8112_v29 = vpack.c.bf16 %v248_v27, %v246_v26  ;;  %v310_v26 = vld [vmem:[%s6652_s21 + $0x30] sm:$0xff] }
  0x4c   :  { %8075 = vmatprep.subr.bf16.mxu0 %v8074_v30  ;;  %v8114_v30 = vpack.c.bf16 %v253_v42, %v251_v28  ;;  %v311_v27 = vld [vmem:[%s6652_s21 + $0x38] sm:$0xff]  ;;  %v8646_v42 = vmov 0.0  }
  0x4d   :  { %v8176_v28 = vpack.c.bf16 %v311_v27, %v310_v26 }
  0x4f   :  { %8077 = vmatpush1.bf16.msra.mxu0 %v8076_v37  ;;  %v8118_v37 = vpack.c.bf16 %v257_v35, %v255_v33 }
  0x50   :  { %8079 = vmatprep.subr.bf16.mxu0 %v8078_v38  ;;  %v254_v38 = vld [vmem:[%s8688_s6 + $0x380] sm:$0xff] }
  0x51   :  { %v8120_v43 = vpack.c.bf16 %v256_v39, %v254_v38  ;;  %v318_v38 = vld [vmem:[%s8907_s3 + $0x8] sm:$0xff]  ;;  %v848_v39 = vld [vmem:[%s6658_s7] sm:$0x3]  ;;  %s8667_s7 = smov 23  }
  0x53   :  { %8081 = vmatpush1.bf16.msra.mxu0 %v8080_v50  ;;  %v8122_v50 = vpack.c.bf16 %v261_v41, %v259_v40  ;;  %v321_v41 = vld [vmem:[%s8915_s11] sm:$0xff] }
  0x54   :  { %8083 = vmatprep.subr.bf16.mxu0 %v8082_v44  ;;  %v258_v44 = vld [vmem:[%s8688_s6 + $0x3a0] sm:$0xff] }
  0x55   :  { %v8124_v49 = vpack.c.bf16 %v260_v45, %v258_v44  ;;  %v847_v44 = vld [vmem:[%s6657_s15] sm:$0x3]  ;;  %s8662_s15 = smov 18  }
  0x56   :  { %s6665_s18 = sld [smem:[%s9912_s0 + %s8662_s15]]  }
  0x57   :  { %8085 = vmatpush1.bf16.msra.mxu0 %v8084_v51  ;;  %v8126_v51 = vpack.c.bf16 %v265_v48, %v263_v46  ;;  %v323_v46 = vld [vmem:[%s8915_s11 + $0x10] sm:$0xff]  ;;  %v324_v48 = vld [vmem:[%s8915_s11 + $0x18] sm:$0xff]  ;;  %s9088_s15 = sld [smem:[%s9912_s0 + %s8668_s12]]   ;;  %s8677_s12 = smov 30  }
  0x58   :  { %8087 = vmatprep.subr.bf16.mxu0 %v8086_v52  ;;  %v262_v52 = vld [vmem:[%s8688_s6 + $0x3c0] sm:$0xff] }
  0x59   :  { %v8128_v56 = vpack.c.bf16 %v264_v53, %v262_v52  ;;  %v326_v52 = vld [vmem:[%s6663_s23] sm:$0xff]  ;;  %v327_v53 = vld [vmem:[%s6663_s23 + $0x8] sm:$0xff] }
  0x5b   :  { %8089 = vmatpush1.bf16.msra.mxu0 %v8088_v57  ;;  %v8130_v57 = vpack.c.bf16 %v269_v55, %v267_v54 }
  0x5c   :  { %8091 = vmatprep.subr.bf16.mxu0 %v8090_v58  ;;  %v266_v58 = vld [vmem:[%s8688_s6 + $0x3e0] sm:$0xff]  ;;  %s8659_s6 = smov 20  }
  0x5d   :  { %v8132_v60 = vpack.c.bf16 %v268_v59, %v266_v58  ;;  %v328_v59 = vld [vmem:[%s6663_s23 + $0x10] sm:$0xff]  ;;  %s6667_s9 = sld [smem:[%s9912_s0 + %s8659_s6]]  }
  0x5e   :  { %s9051_s6 = sld [smem:[%s9912_s0 + %s8666_s30]]  }
  0x5f   :  { %8093 = vmatpush1.bf16.msra.mxu0 %v8092_v63  ;;  %v8160_v63 = vpack.c.bf16 %v284_v62, %v283_v61 }
  0x60   :  { %8095 = vmatprep.subr.bf16.mxu0 %v8094_v0  ;;  %v301_v0 = vld [vmem:[%s8752_s13 + $0xf0] sm:$0xff] }
  0x61   :  { %8161 = vmatpush3.bf16.msra.mxu1 %v8160_v63  ;;  %v8162_v2 = vpack.c.bf16 %v302_v1, %v301_v0 }
  0x63   :  { %8097 = vmatpush1.bf16.msra.mxu0 %v8096_v5  ;;  %v8164_v5 = vpack.c.bf16 %v286_v4, %v285_v3  ;;  %8163 = vmatprep.subr.bf16.mxu1 %v8162_v2  ;;  %v331_v21 = vld [vmem:[%s6667_s9] sm:$0xff]  ;;  %v334_v26 = vld [vmem:[%s6667_s9 + $0x18] sm:$0xff] }
  0x64   :  { %8099 = vmatprep.subr.bf16.mxu0 %v8098_v6  ;;  %v8642_v6 = vmov 0.0|0.0  }
  0x65   :  { %8165 = vmatpush3.bf16.msra.mxu1 %v8164_v5 }
  0x66   :  { %8166 = vmatprep.subr.bf16.mxu1 %v8642_v6 }
  0x67   :  { %8101 = vmatpush1.bf16.msra.mxu0 %v8100_v11 }
  0x68   :  { %8103 = vmatprep.subr.bf16.mxu0 %v8102_v12 }
  0x6b   :  { %8105 = vmatpush1.bf16.msra.mxu0 %v8104_v17 }
  0x6c   :  { %8107 = vmatprep.subr.bf16.mxu0 %v8106_v18  ;;  %v8167_v18 = vpack.c.bf16 %v305_v47, %v304_v14  ;;  %v8993_v14 = vld [vmem:[%s8990_s4] ss:$0 sm:$0xff] }
  0x6f   :  { %8109 = vmatpush1.bf16.msra.mxu0 %v8108_v23  ;;  %v309_v23 = vld [vmem:[%s6652_s21 + $0x28] sm:$0xff] }
  0x70   :  { %8111 = vmatprep.subr.bf16.mxu0 %v8110_v24 }
  0x73   :  { %8113 = vmatpush1.bf16.msra.mxu0 %v8112_v29 }
  0x74   :  { %8115 = vmatprep.subr.bf16.mxu0 %v8114_v30  ;;  %v6682_v30 = vld [vmem:[%s6651_s25] ss:$0 sm:$0xff]  ;;  %s8656_s25 = smov 15  }
  0x75   :  { %s8981_s28 = sld [smem:[%s9912_s0 + %s8656_s25]]   ;;  %s8671_s25 = smov 24  }
  0x76   :  { %s6671_s30 = sld [smem:[%s9912_s0 + %s8671_s25]]  }
  0x77   :  { %8117 = vmatpush1.bf16.msra.mxu0 %v8116_v36  ;;  %v8918_v36 = vld [vmem:[%s8902_s29] sm:$0xff] }
  0x78   :  { %8119 = vmatprep.subr.bf16.mxu0 %v8118_v37  ;;  %v317_v37 = vld [vmem:[%s8907_s3] sm:$0xff] }
  0x79   :  { %v8928_v40 = vpack.c.bf16 %v318_v38, %v317_v37 }
  0x7b   :  { %8121 = vmatpush1.bf16.msra.mxu0 %v8120_v43  ;;  %v322_v43 = vld [vmem:[%s8915_s11 + $0x8] sm:$0xff]  ;;  %v8984_v3 = vld [vmem:[%s8981_s28] ss:$0 sm:$0xff]  ;;  %s8661_s11 = smov 7  }
  0x7c   :  { %8123 = vmatprep.subr.bf16.mxu0 %v8122_v50  ;;  %v8939_v50 = vld [vmem:[%s8907_s3 + $0x10] sm:$0x7]  ;;  %v8941_v45 = vpack.c.bf16 %v322_v43, %v321_v41  ;;  %s6654_s14 = sld [smem:[%s9912_s0 + %s8661_s11]]   ;;  %v709_v43 = vld [vmem:[%s6665_s18 + $0x8] sm:$0xff] }
  0x7d   :  { %s9071_s11 = sld [smem:[%s9912_s0 + %s8667_s7]]  }
  0x7f   :  { %8125 = vmatpush1.bf16.msra.mxu0 %v8124_v49  ;;  %v8953_v49 = vpack.c.bf16 %v324_v48, %v323_v46  ;;  %v711_v46 = vld [vmem:[%s6665_s18 + $0x18] sm:$0xff] }
  0x80   :  { %8127 = vmatprep.subr.bf16.mxu0 %v8126_v51  ;;  %v6683_v51 = vld [vmem:[%s6653_s19] ss:$0 sm:$0xff]  ;;  %s8663_s19 = smov 22  }
  0x81   :  { %s6669_s22 = sld [smem:[%s9912_s0 + %s8663_s19]]  }
  0x82   :  { %s9106_s19 = sld [smem:[%s9912_s0 + %s8669_s16]]   ;;  %s8674_s16 = smov 26  }
  0x83   :  { %8129 = vmatpush1.bf16.msra.mxu0 %v8128_v56 }
  0x84   :  { %8131 = vmatprep.subr.bf16.mxu0 %v8130_v57  ;;  %v8963_v57 = vpack.c.bf16 %v327_v53, %v326_v52 }
  0x87   :  { %8133 = vmatpush1.bf16.msra.mxu0 %v8132_v60  ;;  %v329_v60 = vld [vmem:[%s6663_s23 + $0x18] sm:$0xff]  ;;  %v336_v48 = vld [vmem:[%s6669_s22] sm:$0xff]  ;;  %s8665_s23 = smov 19  }
  0x88   :  { %v8968_v63 = vpack.c.bf16 %v329_v60, %v328_v59  ;;  %s6666_s27 = sld [smem:[%s9912_s0 + %s8665_s23]]  }
  0x89   :  { %s9123_s23 = sld [smem:[%s9912_s0 + %s8670_s20]]  }
  0x8a   :  { %542 = vmatmul.mubr.f32.vlgmr.msra.gmra.mrb[0].mxu0 %v8803_v16  ;;  %v376_v16 = vsub.s32 0, %v8716_v34  ;;  %v308_v34 = vld [vmem:[%s6652_s21 + $0x20] sm:$0xff]  ;;  %s9185_s20 = sld [smem:[%s9912_s0 + %s8674_s16]]   ;;  %s8675_s21 = smov 33  }
  0x8b   :  { %v8173_v24 = vpack.c.bf16 %v309_v23, %v308_v34  ;;  %v333_v34 = vld [vmem:[%s6667_s9 + $0x10] sm:$0xff]  ;;  %s9201_s26 = sld [smem:[%s9912_s0 + %s8675_s21]]  }
  0x8c   :  { %v377_v9 = vrot.slane %v270_v7, %v376_v16  ;;  %v9004_v27 = vpack.c.bf16 %v334_v26, %v333_v34  ;;  %v9074_v26 = vld [vmem:[%s9071_s11] ss:$0 sm:$0xff]  ;;  %s9242_s16 = sld [smem:[%s9912_s0 + %s8677_s12]]  }
  0x8e   :  { %v715_v59 = vld [vmem:[%s6666_s27] sm:$0xff]  ;;  %v716_v60 = vld [vmem:[%s6666_s27 + $0x8] sm:$0xff] }
 0x15d   :  { %v543_v11 = vpop.f32.mrb[0].mxu0 }
 0x15e   :  { %v8536_v12 = vadd.f32 %v543_v11, %v377_v9  ;;  %v545_v13 = vpop.f32.mrb[1].mxu0 }
 0x15f   :  { %v8537_v15 = vadd.f32 %v545_v13, %v381_v10 }
 0x160   :  { %v548_v19 = vmax.f32 %v8536_v12, 0.0 }
 0x161   :  { %v549_v17 = vmax.f32 %v8537_v15, 0.0 }
 0x163   :  { %620 = vmatprep.mubr.f32.mxu1 %v549_v17 }
 0x164   :  { %621 = vmatmul.mubr.f32.vlgmr.msra.gmra.mrb[0].mxu1 %v548_v19 }
 0x165   :  { %8168 = vmatpush3.bf16.msra.mxu1 %v8167_v18  ;;  %7229 = vmatprep.mubr.msk.f32.mxu1 %vm8645_vm0, %v8646_v42 }
 0x166   :  { %8169 = vmatprep.subr.bf16.mxu1 %v8642_v6 }
 0x169   :  { %8171 = vmatpush3.bf16.msra.mxu1 %v8170_v22  ;;  %v332_v22 = vld [vmem:[%s6667_s9 + $0x8] sm:$0xff]  ;;  %s8673_s9 = smov 29  }
 0x16a   :  { %8172 = vmatprep.subr.bf16.mxu1 %v8642_v6 }
 0x16d   :  { %8174 = vmatpush3.bf16.msra.mxu1 %v8173_v24  ;;  %v9000_v24 = vpack.c.bf16 %v332_v22, %v331_v21 }
 0x16e   :  { %8175 = vmatprep.subr.bf16.mxu1 %v8642_v6 }
 0x171   :  { %8177 = vmatpush3.bf16.msra.mxu1 %v8176_v28 }
 0x172   :  { %7244 = vmatprep.subr.mxu1 %v8646_v42 }
 0x237   :  { %v6850_v29 = vpop.f32.mrb[0].mxu1 }
 0x238   :  { %v6851_v31 = vpop.f32.mrb[1].mxu1 }
 0x239   :  { %v6852_v32 = vadd.f32 %v6851_v31, %v6850_v29  ;;  %v712_v29 = vld [vmem:[%s6654_s14] sm:$0xff] }
 0x23b   :  { %v623_v33 = vadd.f32 %v6852_v32, %v6682_v30  ;;  %v713_v30 = vld [vmem:[%s6654_s14 + $0x8] sm:$0xff] }
 0x23d   :  { %v626_v35 = vmax.f32 %v623_v33, 0.0  ;;  %v8178_v33 = vpack.c.bf16 %v713_v30, %v712_v29 }
 0x23f   :  { %7230 = vmatmul.mubr.msk.f32.vlgmr.msra.gmra.mrb[2].mxu1 %vm633_vm1, %v626_v35  ;;  %v708_v35 = vld [vmem:[%s6665_s18] sm:$0xff]  ;;  %8179 = vmatprep.subr.bf16.mxu0 %v8178_v33 }
 0x240   :  { %7245 = vmatpush3.msra.mxu1 %v8918_v36  ;;  %7246 = vmatprep.mubr.msk.f32.mxu1 %vm8645_vm0, %v8646_v42 }
 0x241   :  { %8182 = vmatprep.subr.bf16.mxu1 %v8642_v6  ;;  %7238 = vmatprep.mubr.msk.f32.mxu0 %vm739_vm4, %v708_v35 }
 0x242   :  { %8181 = vmatpush3.bf16.msra.mxu0 %v8178_v33 }
 0x243   :  { %7247 = vmatmul.mubr.msk.f32.vlgmr.msra.gmra.mrb[4].mxu1 %vm849_vm2, %v848_v39  ;;  %v714_v39 = vld [vmem:[%s6654_s14 + $0x10] sm:$0x7]  ;;  %s6676_s14 = sld [smem:[%s9912_s0 + %s8673_s9]]  }
 0x244   :  { %8184 = vmatpush3.bf16.msra.mxu1 %v8928_v40  ;;  %7255 = vmatprep.mubr.msk.f32.mxu1 %vm8645_vm0, %v8646_v42  ;;  %s9237_s9 = sld [smem:[%s9912_s0 + %s8655_s24]]  }
 0x245   :  { %7253 = vmatprep.subr.mxu1 %v8646_v42  ;;  %7236 = vmatprep.subr.msk.mxu0 %vm752_vm3, %v714_v39 }
 0x246   :  { %7237 = vmatpush3.msk.msra.mxu0 %vm752_vm3, %v714_v39  ;;  %v9099_v39 = vand.u32 127, %v374_v25  ;;  %v313_v25 = vld [vmem:[%s9106_s19] sm:$0xff] }
 0x247   :  { %7239 = vmatmul.mubr.msk.f32.vlgmr.msra.gmra.mrb[2].mxu0 %vm739_vm4, %v709_v43  ;;  %8227 = vmatprep.subr.bf16.mxu0 %v8642_v6 }
 0x248   :  { %7254 = vmatpush3.msk.msra.mxu1 %vm752_vm3, %v8939_v50 }
 0x249   :  { %7256 = vmatmul.mubr.msk.f32.vlgmr.msra.gmra.mrb[6].mxu1 %vm739_vm4, %v847_v44  ;;  %8185 = vmatprep.subr.bf16.mxu1 %v8642_v6  ;;  %v710_v44 = vld [vmem:[%s6665_s18 + $0x10] sm:$0xff] }
 0x24a   :  { %8187 = vmatpush3.bf16.msra.mxu1 %v8941_v45  ;;  %7266 = vmatprep.mubr.msk.f32.mxu1 %vm8645_vm0, %v8646_v42 }
 0x24b   :  { %8188 = vmatprep.subr.bf16.mxu1 %v8642_v6  ;;  %7241 = vmatprep.mubr.msk.f32.mxu0 %vm739_vm4, %v710_v44 }
 0x24c   :  { %7242 = vmatmul.mubr.msk.f32.gmra.mrb[4].mxu0 %vm739_vm4, %v711_v46 }
 0x24d   :  { %7350 = vmatprep.mubr.msk.f32.mxu0 %vm8645_vm0, %v8646_v42 }
 0x24e   :  { %8190 = vmatpush3.bf16.msra.mxu1 %v8953_v49 }
 0x24f   :  { %8191 = vmatprep.subr.bf16.mxu1 %v8642_v6 }
 0x312   :  { %v703_v54 = vpop.f32.mrb[2].mxu1 }
 0x313   :  { %v704_v55 = vadd.f32 %v6683_v51, %v703_v54  ;;  %v7231_v56 = vpop.f32.mrb[3].mxu1  ;;  %v337_v51 = vld [vmem:[%s6669_s22 + $0x8] sm:$0xff]  ;;  %v338_v54 = vld [vmem:[%s6669_s22 + $0x10] sm:$0xff] }
 0x314   :  { %v9031_v52 = vpack.c.bf16 %v337_v51, %v336_v48 }
 0x315   :  { %v707_v58 = vmax.f32 %v704_v55, 0.0  ;;  %v339_v55 = vld [vmem:[%s6669_s22 + $0x18] sm:$0xff]  ;;  %s8679_s22 = smov 34  }
 0x316   :  { %v919_v61 = vpop.f32.mrb[4].mxu1  ;;  %v9041_v56 = vpack.c.bf16 %v339_v55, %v338_v54 }
 0x317   :  { %1177 = vrot.lane.b32.xlu1 %v707_v58, %s8655_s24  ;;  %7267 = vmatmul.mubr.msk.f32.vlgmr.msra.gmra.mrb[8].mxu1 %vm999_vm5, %v707_v58  ;;  %v7248_v62 = vpop.f32.mrb[5].mxu1  ;;  %s8678_s24 = smov 31  }
 0x318   :  { %8193 = vmatpush3.bf16.msra.mxu1 %v8963_v57  ;;  %7277 = vmatprep.mubr.msk.f32.mxu1 %vm8645_vm0, %v8646_v42  ;;  %v717_v62 = vld [vmem:[%s6666_s27 + $0x10] sm:$0xff]  ;;  %s9285_s21 = sld [smem:[%s9912_s0 + %s8678_s24]]  }
 0x319   :  { %8194 = vmatprep.subr.bf16.mxu1 %v8642_v6 }
 0x31c   :  { %8196 = vmatpush3.bf16.msra.mxu1 %v8968_v63  ;;  %v995_v0 = vpop.f32.mrb[6].mxu1 }
 0x31d   :  { %v996_v1 = vadd.f32 %v995_v0, %v919_v61  ;;  %v7257_v2 = vpop.f32.mrb[7].mxu1  ;;  %8197 = vmatprep.subr.bf16.mxu1 %v8642_v6  ;;  %v718_v61 = vld [vmem:[%s6666_s27 + $0x18] sm:$0xff]  ;;  %v7240_v0 = vpop.f32.mrb[2].mxu0  ;;  %s8676_s27 = smov 28  }
 0x31e   :  { %s9218_s2 = sld [smem:[%s9912_s0 + %s8676_s27]]  }
 0x31f   :  { %7278 = vmatmul.mubr.msk.f32.vlgmr.msra.gmra.mrb[10].mxu1 %vm999_vm5, %v707_v58  ;;  %v8664_v58 = vmov 0  }
 0x320   :  { %7288 = vmatprep.mubr.msk.f32.mxu1 %vm8645_vm0, %v8646_v42  ;;  %8199 = vmatpush3.bf16.msra.mxu1 %v9000_v24 }
 0x321   :  { %8200 = vmatprep.subr.bf16.mxu1 %v8642_v6  ;;  %8592 = vset.pattern.permute.xlu1 %v8664_v58 }
 0x322   :  { %8591 = vset.pattern.permute.xlu0 %v8664_v58 }
 0x324   :  { %8202 = vmatpush3.bf16.msra.mxu1 %v9004_v27 }
 0x325   :  { %8203 = vmatprep.subr.bf16.mxu1 %v8642_v6 }
 0x389   :  { %v1178_v31 = vpop.permute.xlu1 %1177 }
 0x3ea   :  { %v1069_v4 = vpop.f32.mrb[8].mxu1 }
 0x3eb   :  { %v1073_v5 = vadd.f32 %v1069_v4, %v996_v1  ;;  %v7268_v16 = vpop.f32.mrb[9].mxu1  ;;  %v822_v1 = vpop.f32.mrb[3].mxu0 }
 0x3ec   :  { %v7243_v2 = vpop.f32.mrb[4].mxu0 }
 0x3ed   :  { %v1080_v7 = vadd.f32 %v8984_v3, %v1073_v5  ;;  %v832_v4 = vpop.f32.mrb[5].mxu0  ;;  %v9054_v5 = vld [vmem:[%s9051_s6] ss:$0 sm:$0xff] }
 0x3ef   :  { %v1157_v8 = vsub.f32 0.0, %v1080_v7 }
 0x3f1   :  { %v1158_v9 = vmul.f32 1.442695, %v1157_v8 }
 0x3f2   :  { %v1153_v10 = vpop.f32.mrb[10].mxu1 }
 0x3f3   :  { %8594 = vpow2.f32 %v1158_v9  ;;  %v7279_v11 = vpop.f32.mrb[11].mxu1  ;;  %v1154_v15 = vadd.f32 %v8993_v14, %v1153_v10 }
 0x3fd   :  { %v8595_v12 = vpop.eup %8594 }
 0x3fe   :  { %v1160_v13 = vadd.f32 1.0, %v8595_v12 }
 0x400   :  { %8596 = vrcp.f32 %v1160_v13 }
 0x40a   :  { %v8597_v47 = vpop.eup %8596 }
 0x40b   :  { %v6697_v17 = vadd.f32 -1.0, %v8597_v47  ;;  %v1171_v28 = vsub.f32 1.0, %v8597_v47  ;;  %v1180_v37 = vmul.f32 %v8597_v47, %v1178_v31 }
 0x40d   :  { %v1164_v18 = vmul.f32 %v6697_v17, %v1154_v15 }
 0x40f   :  { %1166 = vrot.lane.b32.xlu0 %v1164_v18, %s8658_s5 }
 0x481   :  { %v1167_v19 = vpop.permute.xlu0 %1166 }
 0x482   :  { %v1169_v20 = vadd.f32 %v1167_v19, %v1080_v7 }
 0x484   :  { %8598 = vtanh.f32 %v1169_v20 }
 0x48e   :  { %v8599_v23 = vpop.eup %8598 }
 0x48f   :  { %1173 = vrot.lane.b32.xlu0 %v8599_v23, %s8660_s10 }
 0x493   :  { %721 = vperm.xlu0 %8591, %v715_v59  }
 0x497   :  { %736 = vperm.xlu0 %8591, %v718_v61  }
 0x501   :  { %v1174_v32 = vpop.permute.xlu0 %1173 }
 0x502   :  { %v1176_v38 = vmul.f32 %v1174_v32, %v1171_v28  ;;  %v9091_v32 = vld [vmem:[%s9088_s15] sm:$0x3] }
 0x504   :  { %v9016_v41 = vadd.f32 %v1180_v37, %v1176_v38 }
 0x506   :  { %1189 = vrot.lane.b32.xlu1 %v9016_v41, %s8660_s10 }
 0x50a   :  { %726 = vperm.xlu1 %8592, %v716_v60   ;;  %v314_v60 = vld [vmem:[%s9106_s19 + $0x8] sm:$0xff] }
 0x50b   :  { %v9110_v61 = vpack.c.bf16 %v314_v60, %v313_v25  ;;  %v357_v25 = vld [vmem:[%s6676_s14 + $0x18] sm:$0xff] }
 0x50e   :  { %731 = vperm.xlu1 %8592, %v717_v62   ;;  %v9115_v62 = vld [vmem:[%s9106_s19 + $0x10] sm:$0x3f] }
 0x512   :  { %v722_v11 = vpop.permute.xlu0 %721 }
 0x513   :  { %v823_v13 = vadd.f32 %v822_v1, %v722_v11  ;;  %v9137_v11 = vld [vmem:[%s9123_s23 + $0x10] sm:$0x7] }
 0x515   :  { %v841_v15 = vmax.f32 %v823_v13, 0.0  ;;  %v342_v13 = vld [vmem:[%s6671_s30 + $0x8] sm:$0xff] }
 0x516   :  { %v737_v18 = vpop.permute.xlu0 %736 }
 0x517   :  { %v838_v21 = vadd.f32 %v7243_v2, %v737_v18 }
 0x519   :  { %v844_v34 = vmax.f32 %v838_v21, 0.0 }
 0x578   :  { %v9033_v53 = vpop.permute.xlu1 %1189 }
 0x579   :  { %7289 = vmatmul.mubr.msk.f32.vlgmr.msra.gmra.mrb[12].mxu1 %vm999_vm5, %v9033_v53 }
 0x57a   :  { %8205 = vmatpush3.bf16.msra.mxu1 %v9031_v52  ;;  %7299 = vmatprep.mubr.msk.f32.mxu1 %vm8645_vm0, %v8646_v42 }
 0x57b   :  { %8206 = vmatprep.subr.bf16.mxu1 %v8642_v6 }
 0x57e   :  { %8208 = vmatpush3.bf16.msra.mxu1 %v9041_v56 }
 0x57f   :  { %8209 = vmatprep.subr.bf16.mxu1 %v8642_v6 }
 0x589   :  { %v727_v10 = vpop.permute.xlu1 %726 }
 0x58a   :  { %v828_v12 = vadd.f32 %v7240_v0, %v727_v10 }
 0x58c   :  { %v842_v47 = vmax.f32 %v828_v12, 0.0  ;;  %v341_v12 = vld [vmem:[%s6671_s30] sm:$0xff] }
 0x58d   :  { %v732_v17 = vpop.permute.xlu1 %731 }
 0x58e   :  { %v9060_v19 = vpack.c.bf16 %v842_v47, %v841_v15  ;;  %v833_v20 = vadd.f32 %v832_v4, %v732_v17  ;;  %v9145_v47 = vpack.c.bf16 %v342_v13, %v341_v12  ;;  %v343_v15 = vld [vmem:[%s6671_s30 + $0x10] sm:$0xff]  ;;  %v344_v17 = vld [vmem:[%s6671_s30 + $0x18] sm:$0xff]  ;;  %s9296_s30 = sld [smem:[%s9912_s0 + %s8679_s22]]  }
 0x58f   :  { %v9152_v21 = vpack.c.bf16 %v344_v17, %v343_v15  ;;  %v9228_v17 = vld [vmem:[%s9201_s26 + $0x20] sm:$0x3] }
 0x590   :  { %v843_v22 = vmax.f32 %v833_v20, 0.0 }
 0x592   :  { %v9064_v23 = vpack.c.bf16 %v844_v34, %v843_v22  ;;  %v349_v22 = vld [vmem:[%s6674_s8] sm:$0xff]  ;;  %v350_v34 = vld [vmem:[%s6674_s8 + $0x8] sm:$0xff] }
 0x64c   :  { %v1259_v16 = vpop.f32.mrb[12].mxu1 }
 0x64d   :  { %v1260_v7 = vadd.f32 %v9054_v5, %v1259_v16  ;;  %v7290_v8 = vpop.f32.mrb[13].mxu1  ;;  %v345_v16 = vld [vmem:[%s9123_s23] sm:$0xff] }
 0x64f   :  { %v1263_v9 = vmax.f32 %v1260_v7, 0.0  ;;  %v346_v7 = vld [vmem:[%s9123_s23 + $0x8] sm:$0xff] }
 0x651   :  { %7300 = vmatmul.mubr.msk.f32.vlgmr.msra.gmra.mrb[14].mxu1 %vm999_vm5, %v1263_v9  ;;  %v9127_v9 = vpack.c.bf16 %v346_v7, %v345_v16  ;;  %v370_v16 = vld [vmem:[%s9201_s26 + $0x18] sm:$0xff] }
 0x652   :  { %7310 = vmatprep.mubr.msk.f32.mxu1 %vm8645_vm0, %v8646_v42  ;;  %8211 = vmatpush3.bf16.msra.mxu1 %v9060_v19 }
 0x653   :  { %8212 = vmatprep.subr.bf16.mxu1 %v8642_v6 }
 0x656   :  { %8214 = vmatpush3.bf16.msra.mxu1 %v9064_v23 }
 0x657   :  { %8215 = vmatprep.subr.bf16.mxu1 %v8642_v6 }
 0x724   :  { %v1339_v28 = vpop.f32.mrb[14].mxu1 }
 0x725   :  { %v9077_v29 = vadd.f32 %v9074_v26, %v1339_v28  ;;  %v7301_v30 = vpop.f32.mrb[15].mxu1  ;;  %v9167_v28 = vpack.c.bf16 %v350_v34, %v349_v22  ;;  %v365_v22 = vld [vmem:[%s9237_s9 + $0x8] sm:$0xff]  ;;  %v9247_v34 = vld [vmem:[%s9242_s16] ss:$0 sm:$0xff] }
 0x726   :  { %v351_v30 = vld [vmem:[%s6674_s8 + $0x10] sm:$0xff] }
 0x727   :  { %v1343_v31 = vmax.f32 %v9077_v29, 0.0  ;;  %8229 = vmatpush3.bf16.msra.mxu0 %v9167_v28  ;;  %v352_v29 = vld [vmem:[%s6674_s8 + $0x18] sm:$0xff] }
 0x728   :  { %8230 = vmatprep.subr.bf16.mxu0 %v8642_v6 }
 0x729   :  { %7311 = vmatmul.mubr.msk.f32.vlgmr.msra.gmra.mrb[16].mxu1 %vm999_vm5, %v1343_v31 }
 0x72a   :  { %7319 = vmatprep.mubr.msk.f32.mxu1 %vm8645_vm0, %v8646_v42  ;;  %8217 = vmatpush3.bf16.msra.mxu1 %v9110_v61 }
 0x72b   :  { %7317 = vmatprep.subr.mxu1 %v8646_v42 }
 0x72e   :  { %7318 = vmatpush3.msk.msra.mxu1 %vm1446_vm9, %v9115_v62 }
 0x72f   :  { %8218 = vmatprep.subr.bf16.mxu1 %v8642_v6 }
 0x7fc   :  { %v9093_v33 = vpop.f32.mrb[16].mxu1 }
 0x7fd   :  { %v1417_v35 = vadd.f32 %v9093_v33, %v9091_v32  ;;  %v7312_v37 = vpop.f32.mrb[17].mxu1 }
 0x7fe   :  { %v355_v37 = vld [vmem:[%s6676_s14 + $0x8] sm:$0xff] }
 0x7ff   :  { %v1419_v38 = vsel %vm1418_vm6, %v1417_v35, -inf }
 0x800   :  { %1420 = vmax.xlane.f32.xlu1 %v1419_v38 }
 0x88d   :  { %v1421_v43 = vpop.xlane.xlu1 %1420 }
 0x88e   :  { %vm1422_vm7 = vcmp.eq.f32.partialorder %v1417_v35, %v1421_v43  ;;  %v9171_v35 = vpack.c.bf16 %v352_v29, %v351_v30 }
 0x88f   :  { %v1423_v44 = vsel %vm1422_vm7, %v9099_v39, 22 }
 0x890   :  { %v1424_v46 = vsel %vm1418_vm6, %v1423_v44, 2147483647  ;;  %8232 = vmatpush3.bf16.msra.mxu0 %v9171_v35 }
 0x891   :  { %v1426_v48 = vshra.s32 %v1424_v46, 16  ;;  %v1425_v54 = vand.u32 65535, %v1424_v46  ;;  %8239 = vmatprep.subr.bf16.mxu0 %v8642_v6  ;;  %v9188_v46 = vld [vmem:[%s9185_s20] ss:$0 sm:$0xff] }
 0x893   :  { %v1428_v51 = vcvt.s32.f32 %v1426_v48  ;;  %v1427_v58 = vcvt.s32.f32 %v1425_v54 }
 0x895   :  { %1429 = vmin.xlane.f32.xlu0 %v1428_v51 }
 0x922   :  { %v1430_v55 = vpop.xlane.xlu0 %1429 }
 0x923   :  { %vm1431_vm8 = vcmp.eq.f32.partialorder %v1428_v51, %v1430_v55  ;;  %v1436_v0 = vcvt.f32.s32 %v1430_v55 }
 0x924   :  { %v1432_v59 = vsel %vm1431_vm8, %v1427_v58, inf }
 0x925   :  { %1433 = vmin.xlane.f32.xlu0 %v1432_v59  ;;  %v1437_v2 = vshll.u32 %v1436_v0, 16  ;;  %v356_v59 = vld [vmem:[%s6676_s14 + $0x10] sm:$0xff]  ;;  %v367_v0 = vld [vmem:[%s9201_s26] sm:$0xff] }
 0x926   :  { %v9194_v60 = vpack.c.bf16 %v357_v25, %v356_v59  ;;  %v360_v59 = vld [vmem:[%s9285_s21 + $0x8] sm:$0xff] }
 0x9b2   :  { %v1434_v1 = vpop.xlane.xlu0 %1433 }
 0x9b3   :  { %v1435_v4 = vcvt.f32.s32 %v1434_v1  ;;  %v368_v1 = vld [vmem:[%s9201_s26 + $0x8] sm:$0xff] }
 0x9b5   :  { %v1438_v8 = vadd.s32 %v1437_v2, %v1435_v4  ;;  %v369_v2 = vld [vmem:[%s9201_s26 + $0x10] sm:$0xff]  ;;  %v9206_v4 = vpack.c.bf16 %v368_v1, %v367_v0 }
 0x9b6   :  { %v9210_v7 = vpack.c.bf16 %v370_v16, %v369_v2 }
 0x9b7   :  { %vm1439_vm11 = vcmp.eq.s32.totalorder %v9099_v39, %v1438_v8  ;;  %v9221_v8 = vld [vmem:[%s9218_s2] ss:$0 sm:$0xff] }
 0x9b8   :  { %v6703_v10 = vsel %vm1439_vm11, 1.0, %v8646_v42 }
 0x9b9   :  { %7320 = vmatmul.mubr.msk.f32.vlgmr.msra.gmra.mrb[18].mxu1 %vm1442_vm10, %v6703_v10 }
 0x9ba   :  { %8220 = vmatpush3.bf16.msra.mxu1 %v9127_v9  ;;  %7328 = vmatprep.mubr.msk.f32.mxu1 %vm8645_vm0, %v8646_v42 }
 0x9bb   :  { %7326 = vmatprep.subr.mxu1 %v8646_v42 }
 0x9be   :  { %7327 = vmatpush3.msk.msra.mxu1 %vm752_vm3, %v9137_v11 }
 0x9bf   :  { %8221 = vmatprep.subr.bf16.mxu1 %v8642_v6 }
 0xa8c   :  { %v9147_v18 = vpop.f32.mrb[18].mxu1 }
 0xa8d   :  { %v7321_v20 = vpop.f32.mrb[19].mxu1  ;;  %7329 = vmatmul.mubr.msk.f32.vlgmr.msra.gmra.mrb[20].mxu1 %vm739_vm4, %v9147_v18 }
 0xa8e   :  { %8223 = vmatpush3.bf16.msra.mxu1 %v9145_v47  ;;  %7339 = vmatprep.mubr.msk.f32.mxu1 %vm8645_vm0, %v8646_v42  ;;  %v364_v20 = vld [vmem:[%s9237_s9] sm:$0xff] }
 0xa8f   :  { %8224 = vmatprep.subr.bf16.mxu1 %v8642_v6  ;;  %v9249_v29 = vpack.c.bf16 %v365_v22, %v364_v20  ;;  %v361_v20 = vld [vmem:[%s9285_s21 + $0x10] sm:$0xff]  ;;  %v362_v22 = vld [vmem:[%s9285_s21 + $0x18] sm:$0xff] }
 0xa92   :  { %8226 = vmatpush3.bf16.msra.mxu1 %v9152_v21 }
 0xa93   :  { %8233 = vmatprep.subr.bf16.mxu1 %v8642_v6 }
 0xa95   :  { %7340 = vmatmul.mubr.msk.f32.vlgmr.msra.gmra.mrb[22].mxu1 %vm999_vm5, %v1343_v31  ;;  %v354_v31 = vld [vmem:[%s6676_s14] sm:$0xff] }
 0xa96   :  { %7361 = vmatprep.mubr.msk.f32.mxu1 %vm8645_vm0, %v8646_v42  ;;  %v9178_v38 = vpack.c.bf16 %v355_v37, %v354_v31 }
 0xa98   :  { %8235 = vmatpush3.bf16.msra.mxu1 %v9178_v38 }
 0xa99   :  { %8236 = vmatprep.subr.bf16.mxu1 %v8642_v6 }
 0xa9c   :  { %8238 = vmatpush3.bf16.msra.mxu1 %v9194_v60 }
 0xa9d   :  { %8248 = vmatprep.subr.bf16.mxu1 %v8642_v6 }
 0xb60   :  { %v1592_v43 = vpop.f32.mrb[20].mxu1 }
 0xb61   :  { %v7330_v44 = vpop.f32.mrb[21].mxu1 }
 0xb62   :  { %v9257_v44 = vld [vmem:[%s9237_s9 + $0x10] sm:$0x3f] }
 0xb68   :  { %v1662_v48 = vpop.f32.mrb[22].mxu1 }
 0xb69   :  { %v1663_v51 = vadd.f32 %v1662_v48, %v1592_v43  ;;  %v7341_v54 = vpop.f32.mrb[23].mxu1 }
 0xb6b   :  { %v1672_v55 = vadd.f32 %v9188_v46, %v1663_v51 }
 0xb6d   :  { %v1673_v58 = vmax.f32 %v1672_v55, 0.0 }
 0xb6f   :  { %7351 = vmatmul.mubr.msk.f32.vlgmr.msra.gmra.mrb[6].mxu0 %vm999_vm5, %v1673_v58  ;;  %v359_v58 = vld [vmem:[%s9285_s21] sm:$0xff] }
 0xb70   :  { %7374 = vmatprep.mubr.msk.f32.mxu0 %vm8645_vm0, %v8646_v42  ;;  %8241 = vmatpush3.bf16.msra.mxu0 %v9206_v4  ;;  %v9289_v25 = vpack.c.bf16 %v360_v59, %v359_v58 }
 0xb71   :  { %8242 = vmatprep.subr.bf16.mxu0 %v8642_v6 }
 0xb74   :  { %8244 = vmatpush3.bf16.msra.mxu0 %v9210_v7 }
 0xb75   :  { %7372 = vmatprep.subr.mxu0 %v8646_v42 }
 0xb78   :  { %7373 = vmatpush3.msk.msra.mxu0 %vm1837_vm12, %v9228_v17 }
 0xb79   :  { %8245 = vmatprep.subr.bf16.mxu0 %v8642_v6 }
 0xc42   :  { %v1749_v10 = vpop.f32.mrb[6].mxu0 }
 0xc43   :  { %v1750_v12 = vadd.f32 %v9221_v8, %v1749_v10  ;;  %v7352_v13 = vpop.f32.mrb[7].mxu0 }
 0xc45   :  { %v1753_v15 = vmax.f32 %v1750_v12, 0.0 }
 0xc47   :  { %7362 = vmatmul.mubr.msk.f32.vlgmr.msra.gmra.mrb[24].mxu1 %vm999_vm5, %v1753_v15 }
 0xc48   :  { %7396 = vmatprep.mubr.msk.f32.mxu1 %vm8645_vm0, %v8646_v42  ;;  %8250 = vmatpush3.bf16.msra.mxu1 %v9289_v25 }
 0xc49   :  { %8251 = vmatprep.subr.bf16.mxu1 %v8642_v6 }
 0xd1a   :  { %v1829_v30 = vpop.f32.mrb[24].mxu1 }
 0xd1b   :  { %v1830_v31 = vadd.f32 %v9247_v34, %v1829_v30  ;;  %v7363_v37 = vpop.f32.mrb[25].mxu1  ;;  %v9301_v30 = vpack.c.bf16 %v362_v22, %v361_v20 }
 0xd1d   :  { %7375 = vmatmul.mubr.msk.f32.vlgmr.msra.gmra.mrb[8].mxu0 %vm1833_vm13, %v1830_v31  ;;  %v1989_v43 = vsel %vm1988_vm14, %v1830_v31, -inf  ;;  %8253 = vmatpush3.bf16.msra.mxu1 %v9301_v30 }
 0xd1e   :  { %1990 = vmax.xlane.f32.xlu1 %v1989_v43  ;;  %8247 = vmatpush3.bf16.msra.mxu0 %v9249_v29 }
 0xd1f   :  { %7381 = vmatprep.subr.mxu0 %v8646_v42  ;;  %7383 = vmatprep.mubr.msk.f32.mxu0 %vm8645_vm0, %v8646_v42 }
 0xd20   :  { %7394 = vmatprep.subr.mxu1 %v8646_v42 }
 0xd22   :  { %7382 = vmatpush3.msk.msra.mxu0 %vm1446_vm9, %v9257_v44 }
 0xd23   :  { %8257 = vmatprep.subr.bf16.mxu0 %v8642_v6 }
 0xd25   :  { %7384 = vmatmul.mubr.msk.f32.vlgmr.msra.gmra.mrb[8].mxu0 %vm1442_vm10, %v9093_v33 }
 0xd26   :  { %8259 = vmatpush3.bf16.msra.mxu0 %v8941_v45  ;;  %7421 = vmatprep.mubr.msk.f32.mxu0 %vm8645_vm0, %v8646_v42 }
 0xd27   :  { %8260 = vmatprep.subr.bf16.mxu0 %v8642_v6 }
 0xd2a   :  { %8262 = vmatpush3.bf16.msra.mxu0 %v8953_v49 }
 0xd2b   :  { %8269 = vmatprep.subr.bf16.mxu0 %v8642_v6 }
 0xd2d   :  { %7422 = vmatmul.mubr.msk.f32.vlgmr.msra.gmra.mrb[10].mxu0 %vm999_vm5, %v9033_v53 }
 0xd2e   :  { %8271 = vmatpush3.bf16.msra.mxu0 %v9000_v24  ;;  %7443 = vmatprep.mubr.msk.f32.mxu0 %vm8645_vm0, %v8646_v42 }
 0xd2f   :  { %8272 = vmatprep.subr.bf16.mxu0 %v8642_v6 }
 0xd32   :  { %8274 = vmatpush3.bf16.msra.mxu0 %v9004_v27 }
 0xd33   :  { %8281 = vmatprep.subr.bf16.mxu0 %v8642_v6 }
 0xdab   :  { %v1991_v33 = vpop.xlane.xlu1 %1990 }
 0xdac   :  { %vm1992_vm15 = vcmp.eq.f32.partialorder %v1830_v31, %v1991_v33  ;;  %v9306_v31 = vld [vmem:[%s9285_s21 + $0x20] sm:$0x3] }
 0xdad   :  { %v1993_v48 = vsel %vm1992_vm15, %v9099_v39, 34  ;;  %7395 = vmatpush3.msk.msra.mxu1 %vm1837_vm12, %v9306_v31 }
 0xdae   :  { %v1994_v51 = vsel %vm1988_vm14, %v1993_v48, 2147483647  ;;  %7399 = vmatprep.subr.mxu1 %v8646_v42 }
 0xdaf   :  { %v1996_v54 = vshra.s32 %v1994_v51, 16  ;;  %v1995_v10 = vand.u32 65535, %v1994_v51 }
 0xdb1   :  { %v1998_v55 = vcvt.s32.f32 %v1996_v54  ;;  %v1997_v13 = vcvt.s32.f32 %v1995_v10 }
 0xdb3   :  { %1999 = vmin.xlane.f32.xlu0 %v1998_v55 }
 0xdf8   :  { %v1983_v0 = vpop.f32.mrb[8].mxu0 }
 0xdf9   :  { %1987 = vst [vmem:[%s9296_s30] sm:$0x3] %v1983_v0  ;;  %v7385_v1 = vpop.f32.mrb[9].mxu0 }
 0xe00   :  { %v2297_v2 = vpop.f32.mrb[10].mxu0 }
 0xe01   :  { %v7423_v16 = vpop.f32.mrb[11].mxu0 }
 0xe40   :  { %v2000_v12 = vpop.xlane.xlu0 %1999 }
 0xe41   :  { %vm2001_vm1 = vcmp.eq.f32.partialorder %v1998_v55, %v2000_v12  ;;  %v2006_v37 = vcvt.f32.s32 %v2000_v12 }
 0xe42   :  { %v2002_v15 = vsel %vm2001_vm1, %v1997_v13, inf }
 0xe43   :  { %2003 = vmin.xlane.f32.xlu1 %v2002_v15  ;;  %v2007_v33 = vshll.u32 %v2006_v37, 16 }
 0xed0   :  { %v2004_v43 = vpop.xlane.xlu1 %2003 }
 0xed1   :  { %v2005_v48 = vcvt.f32.s32 %v2004_v43 }
 0xed3   :  { %v2008_v51 = vadd.s32 %v2007_v33, %v2005_v48 }
 0xed5   :  { %vm2009_vm7 = vcmp.eq.s32.totalorder %v9099_v39, %v2008_v51 }
 0xed6   :  { %v6718_v54 = vsel %vm2009_vm7, 1.0, %v8646_v42 }
 0xed7   :  { %7397 = vmatmul.mubr.msk.f32.vlgmr.msra.gmra.mrb[26].mxu1 %vm1833_vm13, %v6718_v54 }
 0xed8   :  { %7400 = vmatpush3.msra.mxu1 %v8918_v36  ;;  %7401 = vmatprep.mubr.msk.f32.mxu1 %vm8645_vm0, %v8646_v42 }
 0xed9   :  { %8254 = vmatprep.subr.bf16.mxu1 %v8642_v6 }
 0xfaa   :  { %v2084_v55 = vpop.f32.mrb[26].mxu1 }
 0xfab   :  { %v7398_v58 = vpop.f32.mrb[27].mxu1  ;;  %7402 = vmatmul.mubr.msk.f32.vlgmr.msra.gmra.mrb[28].mxu1 %vm849_vm2, %v2084_v55 }
 0xfac   :  { %8256 = vmatpush3.bf16.msra.mxu1 %v8928_v40  ;;  %7410 = vmatprep.mubr.msk.f32.mxu1 %vm8645_vm0, %v8646_v42 }
 0xfad   :  { %7408 = vmatprep.subr.mxu1 %v8646_v42 }
 0xfb0   :  { %7409 = vmatpush3.msk.msra.mxu1 %vm752_vm3, %v8939_v50 }
 0xfb1   :  { %7411 = vmatmul.mubr.msk.f32.vlgmr.msra.gmra.mrb[30].mxu1 %vm739_vm4, %v9147_v18  ;;  %8263 = vmatprep.subr.bf16.mxu1 %v8642_v6 }
 0xfb2   :  { %8265 = vmatpush3.bf16.msra.mxu1 %v8963_v57  ;;  %7432 = vmatprep.mubr.msk.f32.mxu1 %vm8645_vm0, %v8646_v42 }
 0xfb3   :  { %8266 = vmatprep.subr.bf16.mxu1 %v8642_v6 }
 0xfb6   :  { %8268 = vmatpush3.bf16.msra.mxu1 %v8968_v63 }
 0xfb7   :  { %8275 = vmatprep.subr.bf16.mxu1 %v8642_v6 }
 0xfb9   :  { %7433 = vmatmul.mubr.msk.f32.vlgmr.msra.gmra.mrb[32].mxu1 %vm999_vm5, %v9033_v53 }
 0xfba   :  { %8277 = vmatpush3.bf16.msra.mxu1 %v9031_v52  ;;  %7454 = vmatprep.mubr.msk.f32.mxu1 %vm8645_vm0, %v8646_v42 }
 0xfbb   :  { %8278 = vmatprep.subr.bf16.mxu1 %v8642_v6 }
 0xfbe   :  { %8280 = vmatpush3.bf16.msra.mxu1 %v9041_v56 }
 0xfbf   :  { %8287 = vmatprep.subr.bf16.mxu1 %v8642_v6 }
0x107e   :  { %v2157_v36 = vpop.f32.mrb[28].mxu1 }
0x107f   :  { %v7403_v50 = vpop.f32.mrb[29].mxu1 }
0x1084   :  { %v2227_v18 = vpop.f32.mrb[30].mxu1 }
0x1085   :  { %v2228_v59 = vadd.f32 %v2227_v18, %v2157_v36  ;;  %v7412_v0 = vpop.f32.mrb[31].mxu1 }
0x1087   :  { %v2301_v1 = vadd.f32 %v2297_v2, %v2228_v59 }
0x1089   :  { %v2302_v16 = vadd.f32 %v8984_v3, %v2301_v1 }
0x108b   :  { %v2373_v53 = vsub.f32 0.0, %v2302_v16 }
0x108c   :  { %v2369_v10 = vpop.f32.mrb[32].mxu1 }
0x108d   :  { %v2374_v12 = vmul.f32 1.442695, %v2373_v53  ;;  %v7434_v13 = vpop.f32.mrb[33].mxu1  ;;  %v2370_v37 = vadd.f32 %v8993_v14, %v2369_v10 }
0x108f   :  { %8600 = vpow2.f32 %v2374_v12 }
0x1099   :  { %v8601_v15 = vpop.eup %8600 }
0x109a   :  { %v2376_v20 = vadd.f32 1.0, %v8601_v15 }
0x109c   :  { %8602 = vrcp.f32 %v2376_v20 }
0x10a6   :  { %v8603_v22 = vpop.eup %8602 }
0x10a7   :  { %v6726_v43 = vadd.f32 -1.0, %v8603_v22  ;;  %v2387_v3 = vsub.f32 1.0, %v8603_v22  ;;  %v2393_v55 = vmul.f32 %v8603_v22, %v9016_v41 }
0x10a9   :  { %v2380_v33 = vmul.f32 %v6726_v43, %v2370_v37 }
0x10ab   :  { %2382 = vrot.lane.b32.xlu0 %v2380_v33, %s8658_s5 }
0x111d   :  { %v2383_v48 = vpop.permute.xlu0 %2382 }
0x111e   :  { %v2385_v51 = vadd.f32 %v2383_v48, %v2302_v16 }
0x1120   :  { %8604 = vtanh.f32 %v2385_v51 }
0x112a   :  { %v8605_v2 = vpop.eup %8604 }
0x112b   :  { %2389 = vrot.lane.b32.xlu1 %v8605_v2, %s8660_s10 }
0x119d   :  { %v2390_v54 = vpop.permute.xlu1 %2389 }
0x119e   :  { %v2392_v58 = vmul.f32 %v2390_v54, %v2387_v3 }
0x11a0   :  { %v9347_v36 = vadd.f32 %v2393_v55, %v2392_v58 }
0x11a2   :  { %2396 = vrot.lane.b32.xlu1 %v9347_v36, %s8660_s10 }
0x1214   :  { %v9351_v14 = vpop.permute.xlu1 %2396 }
0x1215   :  { %7444 = vmatmul.mubr.msk.f32.vlgmr.msra.gmra.mrb[12].mxu0 %vm999_vm5, %v9351_v14 }
0x1216   :  { %8283 = vmatpush3.bf16.msra.mxu0 %v9060_v19  ;;  %7465 = vmatprep.mubr.msk.f32.mxu0 %vm8645_vm0, %v8646_v42 }
0x1217   :  { %8284 = vmatprep.subr.bf16.mxu0 %v8642_v6 }
0x121a   :  { %8286 = vmatpush3.bf16.msra.mxu0 %v9064_v23 }
0x121b   :  { %8290 = vmatprep.subr.bf16.mxu0 %v8642_v6 }
0x12e8   :  { %v2466_v41 = vpop.f32.mrb[12].mxu0 }
0x12e9   :  { %v2467_v50 = vadd.f32 %v9054_v5, %v2466_v41  ;;  %v7445_v18 = vpop.f32.mrb[13].mxu0 }
0x12eb   :  { %v2470_v59 = vmax.f32 %v2467_v50, 0.0 }
0x12ed   :  { %7455 = vmatmul.mubr.msk.f32.vlgmr.msra.gmra.mrb[34].mxu1 %vm999_vm5, %v2470_v59 }
0x12ee   :  { %8289 = vmatpush3.bf16.msra.mxu1 %v9110_v61  ;;  %7474 = vmatprep.mubr.msk.f32.mxu1 %vm8645_vm0, %v8646_v42 }
0x12ef   :  { %7472 = vmatprep.subr.mxu1 %v8646_v42 }
0x12f2   :  { %7473 = vmatpush3.msk.msra.mxu1 %vm1446_vm9, %v9115_v62 }
0x12f3   :  { %8293 = vmatprep.subr.bf16.mxu1 %v8642_v6 }
0x13c0   :  { %v2540_v0 = vpop.f32.mrb[34].mxu1 }
0x13c1   :  { %v2541_v1 = vadd.f32 %v9074_v26, %v2540_v0  ;;  %v7456_v16 = vpop.f32.mrb[35].mxu1 }
0x13c3   :  { %v2544_v53 = vmax.f32 %v2541_v1, 0.0 }
0x13c5   :  { %7466 = vmatmul.mubr.msk.f32.vlgmr.msra.gmra.mrb[14].mxu0 %vm999_vm5, %v2544_v53 }
0x13c6   :  { %8292 = vmatpush3.bf16.msra.mxu0 %v9127_v9  ;;  %7483 = vmatprep.mubr.msk.f32.mxu0 %vm8645_vm0, %v8646_v42 }
0x13c7   :  { %7481 = vmatprep.subr.mxu0 %v8646_v42 }
0x13ca   :  { %7482 = vmatpush3.msk.msra.mxu0 %vm752_vm3, %v9137_v11 }
0x13cb   :  { %8299 = vmatprep.subr.bf16.mxu0 %v8642_v6 }
0x1498   :  { %v9379_v10 = vpop.f32.mrb[14].mxu0 }
0x1499   :  { %v2618_v12 = vadd.f32 %v9379_v10, %v9091_v32  ;;  %v7467_v13 = vpop.f32.mrb[15].mxu0 }
0x149b   :  { %v2619_v15 = vsel %vm1418_vm6, %v2618_v12, -inf }
0x149c   :  { %2620 = vmax.xlane.f32.xlu0 %v2619_v15 }
0x1529   :  { %v2621_v20 = vpop.xlane.xlu0 %2620 }
0x152a   :  { %vm2622_vm8 = vcmp.eq.f32.partialorder %v2618_v12, %v2621_v20 }
0x152b   :  { %v2623_v22 = vsel %vm2622_vm8, %v9099_v39, 22 }
0x152c   :  { %v2624_v37 = vsel %vm1418_vm6, %v2623_v22, 2147483647 }
0x152d   :  { %v2626_v43 = vshra.s32 %v2624_v37, 16  ;;  %v2625_v48 = vand.u32 65535, %v2624_v37 }
0x152f   :  { %v2628_v33 = vcvt.s32.f32 %v2626_v43  ;;  %v2627_v2 = vcvt.s32.f32 %v2625_v48 }
0x1531   :  { %2629 = vmin.xlane.f32.xlu1 %v2628_v33 }
0x15be   :  { %v2630_v51 = vpop.xlane.xlu1 %2629 }
0x15bf   :  { %vm2631_vm11 = vcmp.eq.f32.partialorder %v2628_v33, %v2630_v51  ;;  %v2636_v54 = vcvt.f32.s32 %v2630_v51 }
0x15c0   :  { %v2632_v3 = vsel %vm2631_vm11, %v2627_v2, inf }
0x15c1   :  { %2633 = vmin.xlane.f32.xlu0 %v2632_v3  ;;  %v2637_v58 = vshll.u32 %v2636_v54, 16  ;;  %v9448_v54 = vld [vmem:[%s8907_s3 + $0x10] sm:$0x7] }
0x164e   :  { %v2634_v55 = vpop.xlane.xlu0 %2633 }
0x164f   :  { %v2635_v41 = vcvt.f32.s32 %v2634_v55 }
0x1651   :  { %v2638_v50 = vadd.s32 %v2637_v58, %v2635_v41 }
0x1653   :  { %vm2639_vm15 = vcmp.eq.s32.totalorder %v9099_v39, %v2638_v50 }
0x1654   :  { %v6730_v18 = vsel %vm2639_vm15, 1.0, %v8646_v42 }
0x1655   :  { %7475 = vmatmul.mubr.msk.f32.vlgmr.msra.gmra.mrb[36].mxu1 %vm1442_vm10, %v6730_v18 }
0x1656   :  { %8295 = vmatpush3.bf16.msra.mxu1 %v9145_v47  ;;  %7494 = vmatprep.mubr.msk.f32.mxu1 %vm8645_vm0, %v8646_v42 }
0x1657   :  { %8296 = vmatprep.subr.bf16.mxu1 %v8642_v6 }
0x165a   :  { %8298 = vmatpush3.bf16.msra.mxu1 %v9152_v21 }
0x165b   :  { %8305 = vmatprep.subr.bf16.mxu1 %v8642_v6 }
0x165d   :  { %7495 = vmatmul.mubr.msk.f32.vlgmr.msra.gmra.mrb[38].mxu1 %vm999_vm5, %v2544_v53 }
0x165e   :  { %8307 = vmatpush3.bf16.msra.mxu1 %v9178_v38  ;;  %7516 = vmatprep.mubr.msk.f32.mxu1 %vm8645_vm0, %v8646_v42 }
0x165f   :  { %8308 = vmatprep.subr.bf16.mxu1 %v8642_v6 }
0x1662   :  { %8310 = vmatpush3.bf16.msra.mxu1 %v9194_v60 }
0x1663   :  { %8320 = vmatprep.subr.bf16.mxu1 %v8642_v6 }
0x1728   :  { %v2711_v59 = vpop.f32.mrb[36].mxu1 }
0x1729   :  { %v7476_v0 = vpop.f32.mrb[37].mxu1  ;;  %7484 = vmatmul.mubr.msk.f32.vlgmr.msra.gmra.mrb[16].mxu0 %vm739_vm4, %v2711_v59 }
0x172a   :  { %8301 = vmatpush3.bf16.msra.mxu0 %v9167_v28  ;;  %7505 = vmatprep.mubr.msk.f32.mxu0 %vm8645_vm0, %v8646_v42 }
0x172b   :  { %8302 = vmatprep.subr.bf16.mxu0 %v8642_v6 }
0x172e   :  { %8304 = vmatpush3.bf16.msra.mxu0 %v9171_v35 }
0x172f   :  { %8311 = vmatprep.subr.bf16.mxu0 %v8642_v6 }
0x1730   :  { %v2854_v1 = vpop.f32.mrb[38].mxu1 }
0x1731   :  { %v7496_v16 = vpop.f32.mrb[39].mxu1 }
0x17fc   :  { %v2784_v53 = vpop.f32.mrb[16].mxu0 }
0x17fd   :  { %v2855_v12 = vadd.f32 %v2854_v1, %v2784_v53  ;;  %v7485_v13 = vpop.f32.mrb[17].mxu0 }
0x17ff   :  { %v2858_v15 = vadd.f32 %v9188_v46, %v2855_v12 }
0x1801   :  { %v2859_v20 = vmax.f32 %v2858_v15, 0.0 }
0x1803   :  { %7506 = vmatmul.mubr.msk.f32.vlgmr.msra.gmra.mrb[18].mxu0 %vm999_vm5, %v2859_v20 }
0x1804   :  { %8313 = vmatpush3.bf16.msra.mxu0 %v9206_v4  ;;  %7529 = vmatprep.mubr.msk.f32.mxu0 %vm8645_vm0, %v8646_v42 }
0x1805   :  { %8314 = vmatprep.subr.bf16.mxu0 %v8642_v6 }
0x1808   :  { %8316 = vmatpush3.bf16.msra.mxu0 %v9210_v7 }
0x1809   :  { %7527 = vmatprep.subr.mxu0 %v8646_v42 }
0x180c   :  { %7528 = vmatpush3.msk.msra.mxu0 %vm1837_vm12, %v9228_v17 }
0x180d   :  { %8317 = vmatprep.subr.bf16.mxu0 %v8642_v6 }
0x18d6   :  { %v2929_v22 = vpop.f32.mrb[18].mxu0 }
0x18d7   :  { %v2930_v37 = vadd.f32 %v9221_v8, %v2929_v22  ;;  %v7507_v43 = vpop.f32.mrb[19].mxu0 }
0x18d9   :  { %v2933_v33 = vmax.f32 %v2930_v37, 0.0 }
0x18db   :  { %7517 = vmatmul.mubr.msk.f32.vlgmr.msra.gmra.mrb[40].mxu1 %vm999_vm5, %v2933_v33 }
0x18dc   :  { %8322 = vmatpush3.bf16.msra.mxu1 %v9289_v25  ;;  %7551 = vmatprep.mubr.msk.f32.mxu1 %vm8645_vm0, %v8646_v42 }
0x18dd   :  { %8323 = vmatprep.subr.bf16.mxu1 %v8642_v6 }
0x18e0   :  { %8325 = vmatpush3.bf16.msra.mxu1 %v9301_v30 }
0x18e1   :  { %7549 = vmatprep.subr.mxu1 %v8646_v42 }
0x18e4   :  { %7550 = vmatpush3.msk.msra.mxu1 %vm1837_vm12, %v9306_v31 }
0x18e5   :  { %7554 = vmatprep.subr.mxu1 %v8646_v42 }
0x19ae   :  { %v3003_v48 = vpop.f32.mrb[40].mxu1 }
0x19af   :  { %v3004_v51 = vadd.f32 %v9247_v34, %v3003_v48  ;;  %v7518_v2 = vpop.f32.mrb[41].mxu1 }
0x19b0   :  { %v9475_v2 = vld [vmem:[%s8902_s29] sm:$0xff] }
0x19b1   :  { %7530 = vmatmul.mubr.msk.f32.vlgmr.msra.gmra.mrb[20].mxu0 %vm1833_vm13, %v3004_v51  ;;  %v3155_v3 = vsel %vm1988_vm14, %v3004_v51, -inf }
0x19b2   :  { %3156 = vmax.xlane.f32.xlu0 %v3155_v3  ;;  %8319 = vmatpush3.bf16.msra.mxu0 %v9249_v29 }
0x19b3   :  { %7536 = vmatprep.subr.mxu0 %v8646_v42  ;;  %7538 = vmatprep.mubr.msk.f32.mxu0 %vm8645_vm0, %v8646_v42 }
0x19b6   :  { %7537 = vmatpush3.msk.msra.mxu0 %vm1446_vm9, %v9257_v44 }
0x19b7   :  { %8326 = vmatprep.subr.bf16.mxu0 %v8642_v6 }
0x19b9   :  { %7539 = vmatmul.mubr.msk.f32.vlgmr.msra.gmra.mrb[20].mxu0 %vm1442_vm10, %v9379_v10 }
0x19ba   :  { %8328 = vmatpush3.bf16.msra.mxu0 %v8928_v40  ;;  %7565 = vmatprep.mubr.msk.f32.mxu0 %vm8645_vm0, %v8646_v42 }
0x19bb   :  { %7563 = vmatprep.subr.mxu0 %v8646_v42 }
0x19be   :  { %7564 = vmatpush3.msk.msra.mxu0 %vm752_vm3, %v9448_v54 }
0x19bf   :  { %7566 = vmatmul.mubr.msk.f32.vlgmr.msra.gmra.mrb[22].mxu0 %vm739_vm4, %v2711_v59  ;;  %8335 = vmatprep.subr.bf16.mxu0 %v8642_v6 }
0x19c0   :  { %8337 = vmatpush3.bf16.msra.mxu0 %v8963_v57  ;;  %7587 = vmatprep.mubr.msk.f32.mxu0 %vm8645_vm0, %v8646_v42 }
0x19c1   :  { %8338 = vmatprep.subr.bf16.mxu0 %v8642_v6 }
0x19c4   :  { %8340 = vmatpush3.bf16.msra.mxu0 %v8968_v63 }
0x19c5   :  { %8347 = vmatprep.subr.bf16.mxu0 %v8642_v6 }
0x19c7   :  { %7588 = vmatmul.mubr.msk.f32.vlgmr.msra.gmra.mrb[24].mxu0 %vm999_vm5, %v9351_v14 }
0x19c8   :  { %8349 = vmatpush3.bf16.msra.mxu0 %v9031_v52  ;;  %7609 = vmatprep.mubr.msk.f32.mxu0 %vm8645_vm0, %v8646_v42 }
0x19c9   :  { %8350 = vmatprep.subr.bf16.mxu0 %v8642_v6 }
0x19cc   :  { %8352 = vmatpush3.bf16.msra.mxu0 %v9041_v56 }
0x19cd   :  { %8359 = vmatprep.subr.bf16.mxu0 %v8642_v6 }
0x1a3f   :  { %v3157_v10 = vpop.xlane.xlu0 %3156 }
0x1a40   :  { %vm3158_vm1 = vcmp.eq.f32.partialorder %v3004_v51, %v3157_v10 }
0x1a41   :  { %v3159_v55 = vsel %vm3158_vm1, %v9099_v39, 34 }
0x1a42   :  { %v3160_v58 = vsel %vm1988_vm14, %v3159_v55, 2147483647 }
0x1a43   :  { %v3162_v41 = vshra.s32 %v3160_v58, 16  ;;  %v3161_v12 = vand.u32 65535, %v3160_v58 }
0x1a45   :  { %v3164_v50 = vcvt.s32.f32 %v3162_v41  ;;  %v3163_v15 = vcvt.s32.f32 %v3161_v12 }
0x1a47   :  { %3165 = vmin.xlane.f32.xlu1 %v3164_v50 }
0x1a8c   :  { %v3149_v18 = vpop.f32.mrb[20].mxu0 }
0x1a8d   :  { %6742 = vst [vmem:[%s9296_s30 + $0x2] sm:$0x3] %v3149_v18  ;;  %v7540_v59 = vpop.f32.mrb[21].mxu0 }
0x1a92   :  { %v3390_v0 = vpop.f32.mrb[22].mxu0 }
0x1a93   :  { %v7567_v1 = vpop.f32.mrb[23].mxu0 }
0x1a94   :  { %v9497_v1 = vld [vmem:[%s8981_s28] ss:$0 sm:$0xff] }
0x1a9a   :  { %v3532_v16 = vpop.f32.mrb[24].mxu0 }
0x1a9b   :  { %v7589_v53 = vpop.f32.mrb[25].mxu0 }
0x1ad4   :  { %v3166_v13 = vpop.xlane.xlu1 %3165 }
0x1ad5   :  { %vm3167_vm7 = vcmp.eq.f32.partialorder %v3164_v50, %v3166_v13  ;;  %v3172_v22 = vcvt.f32.s32 %v3166_v13 }
0x1ad6   :  { %v3168_v20 = vsel %vm3167_vm7, %v3163_v15, inf }
0x1ad7   :  { %3169 = vmin.xlane.f32.xlu0 %v3168_v20  ;;  %v3173_v43 = vshll.u32 %v3172_v22, 16  ;;  %v9501_v22 = vld [vmem:[%s8990_s4] ss:$0 sm:$0xff] }
0x1b64   :  { %v3170_v37 = vpop.xlane.xlu0 %3169 }
0x1b65   :  { %v3171_v33 = vcvt.f32.s32 %v3170_v37  ;;  %v3533_v37 = vadd.f32 %v9501_v22, %v3532_v16 }
0x1b67   :  { %v3174_v48 = vadd.s32 %v3173_v43, %v3171_v33 }
0x1b69   :  { %vm3175_vm8 = vcmp.eq.s32.totalorder %v9099_v39, %v3174_v48 }
0x1b6a   :  { %v6743_v51 = vsel %vm3175_vm8, 1.0, %v8646_v42 }
0x1b6b   :  { %7552 = vmatmul.mubr.msk.f32.vlgmr.msra.gmra.mrb[42].mxu1 %vm1833_vm13, %v6743_v51 }
0x1b6c   :  { %7555 = vmatpush3.msra.mxu1 %v9475_v2  ;;  %7556 = vmatprep.mubr.msk.f32.mxu1 %vm8645_vm0, %v8646_v42 }
0x1b6d   :  { %8329 = vmatprep.subr.bf16.mxu1 %v8642_v6 }
0x1c3e   :  { %v3247_v3 = vpop.f32.mrb[42].mxu1 }
0x1c3f   :  { %v7553_v10 = vpop.f32.mrb[43].mxu1  ;;  %7557 = vmatmul.mubr.msk.f32.vlgmr.msra.gmra.mrb[44].mxu1 %vm849_vm2, %v3247_v3 }
0x1c40   :  { %8331 = vmatpush3.bf16.msra.mxu1 %v8941_v45  ;;  %7576 = vmatprep.mubr.msk.f32.mxu1 %vm8645_vm0, %v8646_v42 }
0x1c41   :  { %8332 = vmatprep.subr.bf16.mxu1 %v8642_v6 }
0x1c44   :  { %8334 = vmatpush3.bf16.msra.mxu1 %v8953_v49 }
0x1c45   :  { %8341 = vmatprep.subr.bf16.mxu1 %v8642_v6 }
0x1c47   :  { %7577 = vmatmul.mubr.msk.f32.vlgmr.msra.gmra.mrb[46].mxu1 %vm999_vm5, %v9351_v14 }
0x1c48   :  { %8343 = vmatpush3.bf16.msra.mxu1 %v9000_v24  ;;  %7598 = vmatprep.mubr.msk.f32.mxu1 %vm8645_vm0, %v8646_v42 }
0x1c49   :  { %8344 = vmatprep.subr.bf16.mxu1 %v8642_v6 }
0x1c4c   :  { %8346 = vmatpush3.bf16.msra.mxu1 %v9004_v27 }
0x1c4d   :  { %8353 = vmatprep.subr.bf16.mxu1 %v8642_v6 }
0x1d12   :  { %v3320_v55 = vpop.f32.mrb[44].mxu1 }
0x1d13   :  { %v3391_v58 = vadd.f32 %v3390_v0, %v3320_v55  ;;  %v7558_v41 = vpop.f32.mrb[45].mxu1 }
0x1d1a   :  { %v3460_v50 = vpop.f32.mrb[46].mxu1 }
0x1d1b   :  { %v3464_v18 = vadd.f32 %v3460_v50, %v3391_v58  ;;  %v7578_v59 = vpop.f32.mrb[47].mxu1 }
0x1d1d   :  { %v3465_v14 = vadd.f32 %v9497_v1, %v3464_v18 }
0x1d1f   :  { %v3536_v53 = vsub.f32 0.0, %v3465_v14 }
0x1d21   :  { %v3537_v12 = vmul.f32 1.442695, %v3536_v53 }
0x1d23   :  { %8606 = vpow2.f32 %v3537_v12 }
0x1d2d   :  { %v8607_v13 = vpop.eup %8606 }
0x1d2e   :  { %v3539_v15 = vadd.f32 1.0, %v8607_v13 }
0x1d30   :  { %8608 = vrcp.f32 %v3539_v15 }
0x1d3a   :  { %v8609_v20 = vpop.eup %8608 }
0x1d3b   :  { %v6751_v0 = vadd.f32 -1.0, %v8609_v20  ;;  %v3550_v3 = vsub.f32 1.0, %v8609_v20  ;;  %v3556_v55 = vmul.f32 %v8609_v20, %v9347_v36 }
0x1d3d   :  { %v3543_v43 = vmul.f32 %v6751_v0, %v3533_v37 }
0x1d3f   :  { %3545 = vrot.lane.b32.xlu1 %v3543_v43, %s8658_s5 }
0x1db1   :  { %v3546_v33 = vpop.permute.xlu1 %3545 }
0x1db2   :  { %v3548_v48 = vadd.f32 %v3546_v33, %v3465_v14 }
0x1db4   :  { %8610 = vtanh.f32 %v3548_v48 }
0x1dbe   :  { %v8611_v51 = vpop.eup %8610 }
0x1dbf   :  { %3552 = vrot.lane.b32.xlu0 %v8611_v51, %s8660_s10 }
0x1e31   :  { %v3553_v10 = vpop.permute.xlu0 %3552 }
0x1e32   :  { %v3555_v58 = vmul.f32 %v3553_v10, %v3550_v3 }
0x1e34   :  { %v9507_v41 = vadd.f32 %v3556_v55, %v3555_v58 }
0x1e36   :  { %3559 = vrot.lane.b32.xlu1 %v9507_v41, %s8660_s10 }
0x1ea8   :  { %v9511_v16 = vpop.permute.xlu1 %3559 }
0x1ea9   :  { %7599 = vmatmul.mubr.msk.f32.vlgmr.msra.gmra.mrb[48].mxu1 %vm999_vm5, %v9511_v16 }
0x1eaa   :  { %8355 = vmatpush3.bf16.msra.mxu1 %v9060_v19  ;;  %7620 = vmatprep.mubr.msk.f32.mxu1 %vm8645_vm0, %v8646_v42 }
0x1eab   :  { %8356 = vmatprep.subr.bf16.mxu1 %v8642_v6 }
0x1eae   :  { %8358 = vmatpush3.bf16.msra.mxu1 %v9064_v23 }
0x1eaf   :  { %8362 = vmatprep.subr.bf16.mxu1 %v8642_v6 }
0x1f7c   :  { %v3629_v36 = vpop.f32.mrb[48].mxu1 }
0x1f7d   :  { %v3630_v50 = vadd.f32 %v9054_v5, %v3629_v36  ;;  %v7600_v18 = vpop.f32.mrb[49].mxu1 }
0x1f7f   :  { %v3633_v59 = vmax.f32 %v3630_v50, 0.0 }
0x1f81   :  { %7610 = vmatmul.mubr.msk.f32.vlgmr.msra.gmra.mrb[26].mxu0 %vm999_vm5, %v3633_v59 }
0x1f82   :  { %8361 = vmatpush3.bf16.msra.mxu0 %v9110_v61  ;;  %7629 = vmatprep.mubr.msk.f32.mxu0 %vm8645_vm0, %v8646_v42 }
0x1f83   :  { %7627 = vmatprep.subr.mxu0 %v8646_v42 }
0x1f86   :  { %7628 = vmatpush3.msk.msra.mxu0 %vm1446_vm9, %v9115_v62 }
0x1f87   :  { %8365 = vmatprep.subr.bf16.mxu0 %v8642_v6 }
0x2054   :  { %v3703_v14 = vpop.f32.mrb[26].mxu0 }
0x2055   :  { %v3704_v53 = vadd.f32 %v9074_v26, %v3703_v14  ;;  %v7611_v5 = vpop.f32.mrb[27].mxu0 }
0x2057   :  { %v3707_v12 = vmax.f32 %v3704_v53, 0.0 }
0x2059   :  { %7621 = vmatmul.mubr.msk.f32.vlgmr.msra.gmra.mrb[50].mxu1 %vm999_vm5, %v3707_v12 }
0x205a   :  { %8364 = vmatpush3.bf16.msra.mxu1 %v9127_v9  ;;  %7638 = vmatprep.mubr.msk.f32.mxu1 %vm8645_vm0, %v8646_v42 }
0x205b   :  { %7636 = vmatprep.subr.mxu1 %v8646_v42 }
0x205e   :  { %7637 = vmatpush3.msk.msra.mxu1 %vm752_vm3, %v9137_v11 }
0x205f   :  { %8371 = vmatprep.subr.bf16.mxu1 %v8642_v6 }
0x212c   :  { %v9539_v62 = vpop.f32.mrb[50].mxu1 }
0x212d   :  { %v3781_v26 = vadd.f32 %v9539_v62, %v9091_v32  ;;  %v7622_v13 = vpop.f32.mrb[51].mxu1 }
0x212f   :  { %v3782_v15 = vsel %vm1418_vm6, %v3781_v26, -inf }
0x2130   :  { %3783 = vmax.xlane.f32.xlu1 %v3782_v15 }
0x21bd   :  { %v3784_v20 = vpop.xlane.xlu1 %3783 }
0x21be   :  { %vm3785_vm11 = vcmp.eq.f32.partialorder %v3781_v26, %v3784_v20 }
0x21bf   :  { %v3786_v37 = vsel %vm3785_vm11, %v9099_v39, 22 }
0x21c0   :  { %v3787_v0 = vsel %vm1418_vm6, %v3786_v37, 2147483647 }
0x21c1   :  { %v3789_v43 = vshra.s32 %v3787_v0, 16  ;;  %v3788_v11 = vand.u32 65535, %v3787_v0 }
0x21c3   :  { %v3791_v33 = vcvt.s32.f32 %v3789_v43  ;;  %v3790_v51 = vcvt.s32.f32 %v3788_v11 }
0x21c5   :  { %3792 = vmin.xlane.f32.xlu0 %v3791_v33 }
0x2252   :  { %v3793_v48 = vpop.xlane.xlu0 %3792 }
0x2253   :  { %vm3794_vm15 = vcmp.eq.f32.partialorder %v3791_v33, %v3793_v48  ;;  %v3799_v32 = vcvt.f32.s32 %v3793_v48 }
0x2254   :  { %v3795_v3 = vsel %vm3794_vm15, %v3790_v51, inf }
0x2255   :  { %3796 = vmin.xlane.f32.xlu0 %v3795_v3  ;;  %v3800_v55 = vshll.u32 %v3799_v32, 16 }
0x22e2   :  { %v3797_v10 = vpop.xlane.xlu0 %3796 }
0x22e3   :  { %v3798_v58 = vcvt.f32.s32 %v3797_v10 }
0x22e5   :  { %v3801_v36 = vadd.s32 %v3800_v55, %v3798_v58 }
0x22e7   :  { %vm3802_vm1 = vcmp.eq.s32.totalorder %v9099_v39, %v3801_v36 }
0x22e8   :  { %v6755_v50 = vsel %vm3802_vm1, 1.0, %v8646_v42 }
0x22e9   :  { %7630 = vmatmul.mubr.msk.f32.vlgmr.msra.gmra.mrb[28].mxu0 %vm1442_vm10, %v6755_v50 }
0x22ea   :  { %8367 = vmatpush3.bf16.msra.mxu0 %v9145_v47  ;;  %7649 = vmatprep.mubr.msk.f32.mxu0 %vm8645_vm0, %v8646_v42 }
0x22eb   :  { %8368 = vmatprep.subr.bf16.mxu0 %v8642_v6 }
0x22ee   :  { %8370 = vmatpush3.bf16.msra.mxu0 %v9152_v21 }
0x22ef   :  { %8377 = vmatprep.subr.bf16.mxu0 %v8642_v6 }
0x22f1   :  { %7650 = vmatmul.mubr.msk.f32.vlgmr.msra.gmra.mrb[30].mxu0 %vm999_vm5, %v3707_v12 }
0x22f2   :  { %8379 = vmatpush3.bf16.msra.mxu0 %v9178_v38  ;;  %7671 = vmatprep.mubr.msk.f32.mxu0 %vm8645_vm0, %v8646_v42 }
0x22f3   :  { %8380 = vmatprep.subr.bf16.mxu0 %v8642_v6 }
0x22f6   :  { %8382 = vmatpush3.bf16.msra.mxu0 %v9194_v60 }
0x22f7   :  { %8392 = vmatprep.subr.bf16.mxu0 %v8642_v6 }
0x23bc   :  { %v3874_v18 = vpop.f32.mrb[28].mxu0 }
0x23bd   :  { %v7631_v59 = vpop.f32.mrb[29].mxu0  ;;  %7639 = vmatmul.mubr.msk.f32.vlgmr.msra.gmra.mrb[52].mxu1 %vm739_vm4, %v3874_v18 }
0x23be   :  { %8373 = vmatpush3.bf16.msra.mxu1 %v9167_v28  ;;  %7660 = vmatprep.mubr.msk.f32.mxu1 %vm8645_vm0, %v8646_v42 }
0x23bf   :  { %8374 = vmatprep.subr.bf16.mxu1 %v8642_v6 }
0x23c2   :  { %8376 = vmatpush3.bf16.msra.mxu1 %v9171_v35 }
0x23c3   :  { %8383 = vmatprep.subr.bf16.mxu1 %v8642_v6 }
0x23c4   :  { %v4017_v14 = vpop.f32.mrb[30].mxu0 }
0x23c5   :  { %v7651_v53 = vpop.f32.mrb[31].mxu0 }
0x2490   :  { %v3947_v5 = vpop.f32.mrb[52].mxu1 }
0x2491   :  { %v4018_v12 = vadd.f32 %v4017_v14, %v3947_v5  ;;  %v7640_v26 = vpop.f32.mrb[53].mxu1 }
0x2493   :  { %v4021_v13 = vadd.f32 %v9188_v46, %v4018_v12 }
0x2495   :  { %v4022_v15 = vmax.f32 %v4021_v13, 0.0 }
0x2497   :  { %7661 = vmatmul.mubr.msk.f32.vlgmr.msra.gmra.mrb[54].mxu1 %vm999_vm5, %v4022_v15 }
0x2498   :  { %8385 = vmatpush3.bf16.msra.mxu1 %v9206_v4  ;;  %7684 = vmatprep.mubr.msk.f32.mxu1 %vm8645_vm0, %v8646_v42 }
0x2499   :  { %8386 = vmatprep.subr.bf16.mxu1 %v8642_v6 }
0x249c   :  { %8388 = vmatpush3.bf16.msra.mxu1 %v9210_v7 }
0x249d   :  { %7682 = vmatprep.subr.mxu1 %v8646_v42 }
0x24a0   :  { %7683 = vmatpush3.msk.msra.mxu1 %vm1837_vm12, %v9228_v17 }
0x24a1   :  { %8389 = vmatprep.subr.bf16.mxu1 %v8642_v6 }
0x256a   :  { %v4092_v46 = vpop.f32.mrb[54].mxu1 }
0x256b   :  { %v4093_v20 = vadd.f32 %v9221_v8, %v4092_v46  ;;  %v7662_v37 = vpop.f32.mrb[55].mxu1 }
0x256d   :  { %v4096_v0 = vmax.f32 %v4093_v20, 0.0 }
0x256f   :  { %7672 = vmatmul.mubr.msk.f32.vlgmr.msra.gmra.mrb[32].mxu0 %vm999_vm5, %v4096_v0 }
0x2570   :  { %8394 = vmatpush3.bf16.msra.mxu0 %v9289_v25  ;;  %7706 = vmatprep.mubr.msk.f32.mxu0 %vm8645_vm0, %v8646_v42 }
0x2571   :  { %8395 = vmatprep.subr.bf16.mxu0 %v8642_v6 }
0x2574   :  { %8397 = vmatpush3.bf16.msra.mxu0 %v9301_v30 }
0x2575   :  { %7704 = vmatprep.subr.mxu0 %v8646_v42 }
0x2578   :  { %7705 = vmatpush3.msk.msra.mxu0 %vm1837_vm12, %v9306_v31 }
0x2579   :  { %7709 = vmatprep.subr.mxu0 %v8646_v42 }
0x2642   :  { %v4166_v8 = vpop.f32.mrb[32].mxu0 }
0x2643   :  { %v4167_v17 = vadd.f32 %v9247_v34, %v4166_v8  ;;  %v7673_v43 = vpop.f32.mrb[33].mxu0 }
0x2645   :  { %7685 = vmatmul.mubr.msk.f32.vlgmr.msra.gmra.mrb[56].mxu1 %vm1833_vm13, %v4167_v17  ;;  %v4318_v33 = vsel %vm1988_vm14, %v4167_v17, -inf }
0x2646   :  { %4319 = vmax.xlane.f32.xlu1 %v4318_v33  ;;  %8391 = vmatpush3.bf16.msra.mxu1 %v9249_v29 }
0x2647   :  { %7691 = vmatprep.subr.mxu1 %v8646_v42  ;;  %7693 = vmatprep.mubr.msk.f32.mxu1 %vm8645_vm0, %v8646_v42 }
0x264a   :  { %7692 = vmatpush3.msk.msra.mxu1 %vm1446_vm9, %v9257_v44 }
0x264b   :  { %8398 = vmatprep.subr.bf16.mxu1 %v8642_v6 }
0x264d   :  { %7694 = vmatmul.mubr.msk.f32.vlgmr.msra.gmra.mrb[56].mxu1 %vm1442_vm10, %v9539_v62 }
0x264e   :  { %8400 = vmatpush3.bf16.msra.mxu1 %v8928_v40  ;;  %7720 = vmatprep.mubr.msk.f32.mxu1 %vm8645_vm0, %v8646_v42 }
0x264f   :  { %7718 = vmatprep.subr.mxu1 %v8646_v42 }
0x2652   :  { %7719 = vmatpush3.msk.msra.mxu1 %vm752_vm3, %v9448_v54 }
0x2653   :  { %7721 = vmatmul.mubr.msk.f32.vlgmr.msra.gmra.mrb[58].mxu1 %vm739_vm4, %v3874_v18  ;;  %8407 = vmatprep.subr.bf16.mxu1 %v8642_v6 }
0x2654   :  { %8409 = vmatpush3.bf16.msra.mxu1 %v8963_v57  ;;  %7742 = vmatprep.mubr.msk.f32.mxu1 %vm8645_vm0, %v8646_v42 }
0x2655   :  { %8410 = vmatprep.subr.bf16.mxu1 %v8642_v6 }
0x2658   :  { %8412 = vmatpush3.bf16.msra.mxu1 %v8968_v63 }
0x2659   :  { %8419 = vmatprep.subr.bf16.mxu1 %v8642_v6 }
0x265b   :  { %7743 = vmatmul.mubr.msk.f32.vlgmr.msra.gmra.mrb[60].mxu1 %vm999_vm5, %v9511_v16 }
0x265c   :  { %8421 = vmatpush3.bf16.msra.mxu1 %v9031_v52  ;;  %7764 = vmatprep.mubr.msk.f32.mxu1 %vm8645_vm0, %v8646_v42 }
0x265d   :  { %8422 = vmatprep.subr.bf16.mxu1 %v8642_v6 }
0x2660   :  { %8424 = vmatpush3.bf16.msra.mxu1 %v9041_v56 }
0x2661   :  { %8431 = vmatprep.subr.bf16.mxu1 %v8642_v6 }
0x26d3   :  { %v4320_v34 = vpop.xlane.xlu1 %4319 }
0x26d4   :  { %vm4321_vm7 = vcmp.eq.f32.partialorder %v4167_v17, %v4320_v34 }
0x26d5   :  { %v4322_v44 = vsel %vm4321_vm7, %v9099_v39, 34 }
0x26d6   :  { %v4323_v31 = vsel %vm1988_vm14, %v4322_v44, 2147483647 }
0x26d7   :  { %v4325_v62 = vshra.s32 %v4323_v31, 16  ;;  %v4324_v58 = vand.u32 65535, %v4323_v31 }
0x26d9   :  { %v4327_v11 = vcvt.s32.f32 %v4325_v62  ;;  %v4326_v50 = vcvt.s32.f32 %v4324_v58 }
0x26db   :  { %4328 = vmin.xlane.f32.xlu0 %v4327_v11 }
0x2720   :  { %v4312_v48 = vpop.f32.mrb[56].mxu1 }
0x2721   :  { %6767 = vst [vmem:[%s9296_s30 + $0x4] sm:$0x3] %v4312_v48  ;;  %v7695_v51 = vpop.f32.mrb[57].mxu1 }
0x2726   :  { %v4553_v3 = vpop.f32.mrb[58].mxu1 }
0x2727   :  { %v7722_v32 = vpop.f32.mrb[59].mxu1 }
0x272e   :  { %v4695_v10 = vpop.f32.mrb[60].mxu1 }
0x272f   :  { %v7744_v55 = vpop.f32.mrb[61].mxu1  ;;  %v4696_v62 = vadd.f32 %v9501_v22, %v4695_v10 }
0x2768   :  { %v4329_v36 = vpop.xlane.xlu0 %4328 }
0x2769   :  { %vm4330_vm8 = vcmp.eq.f32.partialorder %v4327_v11, %v4329_v36  ;;  %v4335_v59 = vcvt.f32.s32 %v4329_v36 }
0x276a   :  { %v4331_v18 = vsel %vm4330_vm8, %v4326_v50, inf }
0x276b   :  { %4332 = vmin.xlane.f32.xlu1 %v4331_v18  ;;  %v4336_v53 = vshll.u32 %v4335_v59, 16  ;;  %v9670_v59 = vld [vmem:[%s9051_s6] ss:$0 sm:$0xff] }
0x27f8   :  { %v4333_v14 = vpop.xlane.xlu1 %4332 }
0x27f9   :  { %v4334_v5 = vcvt.f32.s32 %v4333_v14 }
0x27fb   :  { %v4337_v12 = vadd.s32 %v4336_v53, %v4334_v5 }
0x27fd   :  { %vm4338_vm11 = vcmp.eq.s32.totalorder %v9099_v39, %v4337_v12  ;;  %v9679_v12 = vld [vmem:[%s9106_s19 + $0x10] sm:$0x3f] }
0x27fe   :  { %v6768_v26 = vsel %vm4338_vm11, 1.0, %v8646_v42 }
0x27ff   :  { %7707 = vmatmul.mubr.msk.f32.vlgmr.msra.gmra.mrb[34].mxu0 %vm1833_vm13, %v6768_v26 }
0x2800   :  { %7710 = vmatpush3.msra.mxu0 %v9475_v2  ;;  %7711 = vmatprep.mubr.msk.f32.mxu0 %vm8645_vm0, %v8646_v42 }
0x2801   :  { %8401 = vmatprep.subr.bf16.mxu0 %v8642_v6 }
0x28d2   :  { %v4410_v13 = vpop.f32.mrb[34].mxu0 }
0x28d3   :  { %v7708_v15 = vpop.f32.mrb[35].mxu0  ;;  %7712 = vmatmul.mubr.msk.f32.vlgmr.msra.gmra.mrb[36].mxu0 %vm849_vm2, %v4410_v13  ;;  %v9685_v13 = vld [vmem:[%s9071_s11] ss:$0 sm:$0xff] }
0x28d4   :  { %8403 = vmatpush3.bf16.msra.mxu0 %v8941_v45  ;;  %7731 = vmatprep.mubr.msk.f32.mxu0 %vm8645_vm0, %v8646_v42 }
0x28d5   :  { %8404 = vmatprep.subr.bf16.mxu0 %v8642_v6 }
0x28d8   :  { %8406 = vmatpush3.bf16.msra.mxu0 %v8953_v49 }
0x28d9   :  { %8413 = vmatprep.subr.bf16.mxu0 %v8642_v6 }
0x28db   :  { %7732 = vmatmul.mubr.msk.f32.vlgmr.msra.gmra.mrb[38].mxu0 %vm999_vm5, %v9511_v16 }
0x28dc   :  { %8415 = vmatpush3.bf16.msra.mxu0 %v9000_v24  ;;  %7753 = vmatprep.mubr.msk.f32.mxu0 %vm8645_vm0, %v8646_v42 }
0x28dd   :  { %8416 = vmatprep.subr.bf16.mxu0 %v8642_v6 }
0x28e0   :  { %8418 = vmatpush3.bf16.msra.mxu0 %v9004_v27 }
0x28e1   :  { %8425 = vmatprep.subr.bf16.mxu0 %v8642_v6 }
0x29a6   :  { %v4483_v46 = vpop.f32.mrb[36].mxu0 }
0x29a7   :  { %v4554_v20 = vadd.f32 %v4553_v3, %v4483_v46  ;;  %v7713_v37 = vpop.f32.mrb[37].mxu0 }
0x29a8   :  { %v9694_v37 = vld [vmem:[%s9123_s23 + $0x10] sm:$0x7] }
0x29ae   :  { %v4623_v0 = vpop.f32.mrb[38].mxu0 }
0x29af   :  { %v4627_v8 = vadd.f32 %v4623_v0, %v4554_v20  ;;  %v7733_v17 = vpop.f32.mrb[39].mxu0 }
0x29b1   :  { %v4628_v43 = vadd.f32 %v9497_v1, %v4627_v8  ;;  %v9702_v8 = vld [vmem:[%s9088_s15] sm:$0x3] }
0x29b3   :  { %v4699_v16 = vsub.f32 0.0, %v4628_v43 }
0x29b5   :  { %v4700_v33 = vmul.f32 1.442695, %v4699_v16 }
0x29b7   :  { %8612 = vpow2.f32 %v4700_v33 }
0x29c1   :  { %v8613_v34 = vpop.eup %8612 }
0x29c2   :  { %v4702_v44 = vadd.f32 1.0, %v8613_v34 }
0x29c4   :  { %8614 = vrcp.f32 %v4702_v44 }
0x29ce   :  { %v8615_v31 = vpop.eup %8614 }
0x29cf   :  { %v6776_v11 = vadd.f32 -1.0, %v8615_v31  ;;  %v4713_v55 = vsub.f32 1.0, %v8615_v31  ;;  %v4719_v36 = vmul.f32 %v8615_v31, %v9507_v41 }
0x29d1   :  { %v4706_v48 = vmul.f32 %v6776_v11, %v4696_v62 }
0x29d3   :  { %4708 = vrot.lane.b32.xlu0 %v4706_v48, %s8658_s5 }
0x2a45   :  { %v4709_v51 = vpop.permute.xlu0 %4708 }
0x2a46   :  { %v4711_v3 = vadd.f32 %v4709_v51, %v4628_v43 }
0x2a48   :  { %8616 = vtanh.f32 %v4711_v3 }
0x2a52   :  { %v8617_v32 = vpop.eup %8616 }
0x2a53   :  { %4715 = vrot.lane.b32.xlu1 %v8617_v32, %s8660_s10 }
0x2ac5   :  { %v4716_v58 = vpop.permute.xlu1 %4715 }
0x2ac6   :  { %v4718_v50 = vmul.f32 %v4716_v58, %v4713_v55 }
0x2ac8   :  { %v9655_v18 = vadd.f32 %v4719_v36, %v4718_v50 }
0x2aca   :  { %4722 = vrot.lane.b32.xlu1 %v9655_v18, %s8660_s10 }
0x2b3c   :  { %v9659_v10 = vpop.permute.xlu1 %4722 }
0x2b3d   :  { %7754 = vmatmul.mubr.msk.f32.vlgmr.msra.gmra.mrb[40].mxu0 %vm999_vm5, %v9659_v10 }
0x2b3e   :  { %8427 = vmatpush3.bf16.msra.mxu0 %v9060_v19  ;;  %7775 = vmatprep.mubr.msk.f32.mxu0 %vm8645_vm0, %v8646_v42 }
0x2b3f   :  { %8428 = vmatprep.subr.bf16.mxu0 %v8642_v6 }
0x2b42   :  { %8430 = vmatpush3.bf16.msra.mxu0 %v9064_v23 }
0x2b43   :  { %8434 = vmatprep.subr.bf16.mxu0 %v8642_v6 }
0x2c10   :  { %v4792_v41 = vpop.f32.mrb[40].mxu0 }
0x2c11   :  { %v4793_v14 = vadd.f32 %v9670_v59, %v4792_v41  ;;  %v7755_v53 = vpop.f32.mrb[41].mxu0 }
0x2c13   :  { %v4796_v5 = vmax.f32 %v4793_v14, 0.0 }
0x2c15   :  { %7765 = vmatmul.mubr.msk.f32.vlgmr.msra.gmra.mrb[62].mxu1 %vm999_vm5, %v4796_v5 }
0x2c16   :  { %8433 = vmatpush3.bf16.msra.mxu1 %v9110_v61  ;;  %7784 = vmatprep.mubr.msk.f32.mxu1 %vm8645_vm0, %v8646_v42 }
0x2c17   :  { %7782 = vmatprep.subr.mxu1 %v8646_v42 }
0x2c1a   :  { %7783 = vmatpush3.msk.msra.mxu1 %vm1446_vm9, %v9679_v12 }
0x2c1b   :  { %8437 = vmatprep.subr.bf16.mxu1 %v8642_v6 }
0x2ce8   :  { %v4866_v26 = vpop.f32.mrb[62].mxu1 }
0x2ce9   :  { %v4867_v15 = vadd.f32 %v9685_v13, %v4866_v26  ;;  %v7766_v46 = vpop.f32.mrb[63].mxu1 }
0x2ceb   :  { %v4870_v20 = vmax.f32 %v4867_v15, 0.0 }
0x2ced   :  { %7776 = vmatmul.mubr.msk.f32.vlgmr.msra.gmra.mrb[42].mxu0 %vm999_vm5, %v4870_v20 }
0x2cee   :  { %8436 = vmatpush3.bf16.msra.mxu0 %v9127_v9  ;;  %7793 = vmatprep.mubr.msk.f32.mxu0 %vm8645_vm0, %v8646_v42 }
0x2cef   :  { %7791 = vmatprep.subr.mxu0 %v8646_v42 }
0x2cf2   :  { %7792 = vmatpush3.msk.msra.mxu0 %vm752_vm3, %v9694_v37 }
0x2cf3   :  { %8443 = vmatprep.subr.bf16.mxu0 %v8642_v6 }
0x2dc0   :  { %v9699_v0 = vpop.f32.mrb[42].mxu0 }
0x2dc1   :  { %v4944_v17 = vadd.f32 %v9702_v8, %v9699_v0  ;;  %v7777_v43 = vpop.f32.mrb[43].mxu0 }
0x2dc3   :  { %v4945_v16 = vsel %vm1418_vm6, %v4944_v17, -inf }
0x2dc4   :  { %4946 = vmax.xlane.f32.xlu0 %v4945_v16 }
0x2e51   :  { %v4947_v33 = vpop.xlane.xlu0 %4946 }
0x2e52   :  { %vm4948_vm15 = vcmp.eq.f32.partialorder %v4944_v17, %v4947_v33  ;;  %v9733_v17 = vld [vmem:[%s9185_s20] ss:$0 sm:$0xff] }
0x2e53   :  { %v4949_v34 = vsel %vm4948_vm15, %v9099_v39, 22  ;;  %v9744_v33 = vld [vmem:[%s9201_s26 + $0x20] sm:$0x3] }
0x2e54   :  { %v4950_v44 = vsel %vm1418_vm6, %v4949_v34, 2147483647 }
0x2e55   :  { %v4952_v31 = vshra.s32 %v4950_v44, 16  ;;  %v4951_v11 = vand.u32 65535, %v4950_v44  ;;  %v9750_v44 = vld [vmem:[%s9218_s2] ss:$0 sm:$0xff] }
0x2e57   :  { %v4954_v62 = vcvt.s32.f32 %v4952_v31  ;;  %v4953_v51 = vcvt.s32.f32 %v4951_v11 }
0x2e59   :  { %4955 = vmin.xlane.f32.xlu1 %v4954_v62 }
0x2ee6   :  { %v4956_v48 = vpop.xlane.xlu1 %4955 }
0x2ee7   :  { %vm4957_vm1 = vcmp.eq.f32.partialorder %v4954_v62, %v4956_v48  ;;  %v4962_v32 = vcvt.f32.s32 %v4956_v48  ;;  %v8636_v48 = vld [vmem:[%s9285_s21 + $0x20] sm:$0x3] }
0x2ee8   :  { %v4958_v3 = vsel %vm4957_vm1, %v4953_v51, inf }
0x2ee9   :  { %4959 = vmin.xlane.f32.xlu0 %v4958_v3  ;;  %v4963_v58 = vshll.u32 %v4962_v32, 16  ;;  %v9764_v3 = vld [vmem:[%s9242_s16] ss:$0 sm:$0xff] }
0x2f76   :  { %v4960_v55 = vpop.xlane.xlu0 %4959 }
0x2f77   :  { %v4961_v36 = vcvt.f32.s32 %v4960_v55 }
0x2f79   :  { %v4964_v50 = vadd.s32 %v4963_v58, %v4961_v36 }
0x2f7b   :  { %vm4965_vm7 = vcmp.eq.s32.totalorder %v9099_v39, %v4964_v50 }
0x2f7c   :  { %v6780_v41 = vsel %vm4965_vm7, 1.0, %v8646_v42 }
0x2f7d   :  { %7785 = vmatmul.mubr.msk.f32.vlgmr.msra.gmra.mrb[64].mxu1 %vm1442_vm10, %v6780_v41 }
0x2f7e   :  { %8439 = vmatpush3.bf16.msra.mxu1 %v9145_v47  ;;  %7804 = vmatprep.mubr.msk.f32.mxu1 %vm8645_vm0, %v8646_v42 }
0x2f7f   :  { %8440 = vmatprep.subr.bf16.mxu1 %v8642_v6 }
0x2f82   :  { %8442 = vmatpush3.bf16.msra.mxu1 %v9152_v21 }
0x2f83   :  { %8449 = vmatprep.subr.bf16.mxu1 %v8642_v6 }
0x2f85   :  { %7805 = vmatmul.mubr.msk.f32.vlgmr.msra.gmra.mrb[66].mxu1 %vm999_vm5, %v4870_v20 }
0x2f86   :  { %8451 = vmatpush3.bf16.msra.mxu1 %v9178_v38  ;;  %7826 = vmatprep.mubr.msk.f32.mxu1 %vm8645_vm0, %v8646_v42 }
0x2f87   :  { %8452 = vmatprep.subr.bf16.mxu1 %v8642_v6 }
0x2f8a   :  { %8454 = vmatpush3.bf16.msra.mxu1 %v9194_v60 }
0x2f8b   :  { %8464 = vmatprep.subr.bf16.mxu1 %v8642_v6 }
0x3050   :  { %v5037_v14 = vpop.f32.mrb[64].mxu1 }
0x3051   :  { %v7786_v53 = vpop.f32.mrb[65].mxu1  ;;  %7794 = vmatmul.mubr.msk.f32.vlgmr.msra.gmra.mrb[44].mxu0 %vm739_vm4, %v5037_v14 }
0x3052   :  { %8445 = vmatpush3.bf16.msra.mxu0 %v9167_v28  ;;  %7815 = vmatprep.mubr.msk.f32.mxu0 %vm8645_vm0, %v8646_v42 }
0x3053   :  { %8446 = vmatprep.subr.bf16.mxu0 %v8642_v6 }
0x3056   :  { %8448 = vmatpush3.bf16.msra.mxu0 %v9171_v35 }
0x3057   :  { %8455 = vmatprep.subr.bf16.mxu0 %v8642_v6 }
0x3058   :  { %v5180_v5 = vpop.f32.mrb[66].mxu1 }
0x3059   :  { %v7806_v26 = vpop.f32.mrb[67].mxu1 }
0x3124   :  { %v5110_v15 = vpop.f32.mrb[44].mxu0 }
0x3125   :  { %v5181_v46 = vadd.f32 %v5180_v5, %v5110_v15  ;;  %v7795_v20 = vpop.f32.mrb[45].mxu0 }
0x3127   :  { %v5184_v43 = vadd.f32 %v9733_v17, %v5181_v46 }
0x3129   :  { %v5185_v16 = vmax.f32 %v5184_v43, 0.0 }
0x312b   :  { %7816 = vmatmul.mubr.msk.f32.vlgmr.msra.gmra.mrb[46].mxu0 %vm999_vm5, %v5185_v16 }
0x312c   :  { %8457 = vmatpush3.bf16.msra.mxu0 %v9206_v4  ;;  %7839 = vmatprep.mubr.msk.f32.mxu0 %vm8645_vm0, %v8646_v42 }
0x312d   :  { %8458 = vmatprep.subr.bf16.mxu0 %v8642_v6 }
0x3130   :  { %8460 = vmatpush3.bf16.msra.mxu0 %v9210_v7 }
0x3131   :  { %7837 = vmatprep.subr.mxu0 %v8646_v42 }
0x3134   :  { %7838 = vmatpush3.msk.msra.mxu0 %vm1837_vm12, %v9744_v33 }
0x3135   :  { %8461 = vmatprep.subr.bf16.mxu0 %v8642_v6 }
0x31fe   :  { %v5255_v34 = vpop.f32.mrb[46].mxu0 }
0x31ff   :  { %v5256_v31 = vadd.f32 %v9750_v44, %v5255_v34  ;;  %v7817_v62 = vpop.f32.mrb[47].mxu0 }
0x3201   :  { %v5259_v11 = vmax.f32 %v5256_v31, 0.0 }
0x3203   :  { %7827 = vmatmul.mubr.msk.f32.vlgmr.msra.gmra.mrb[68].mxu1 %vm999_vm5, %v5259_v11 }
0x3204   :  { %8466 = vmatpush3.bf16.msra.mxu1 %v9289_v25  ;;  %7861 = vmatprep.mubr.msk.f32.mxu1 %vm8645_vm0, %v8646_v42 }
0x3205   :  { %8467 = vmatprep.subr.bf16.mxu1 %v8642_v6 }
0x3208   :  { %8469 = vmatpush3.bf16.msra.mxu1 %v9301_v30  ;;  %v9774_v30 = vld [vmem:[%s9237_s9 + $0x10] sm:$0x3f] }
0x3209   :  { %7859 = vmatprep.subr.mxu1 %v8646_v42 }
0x320c   :  { %7860 = vmatpush3.msk.msra.mxu1 %vm1837_vm12, %v8636_v48 }
0x320d   :  { %7864 = vmatprep.subr.mxu1 %v8646_v42 }
0x32d6   :  { %v5329_v51 = vpop.f32.mrb[68].mxu1 }
0x32d7   :  { %v5330_v25 = vadd.f32 %v9764_v3, %v5329_v51  ;;  %v7828_v32 = vpop.f32.mrb[69].mxu1 }
0x32d9   :  { %7840 = vmatmul.mubr.msk.f32.vlgmr.msra.gmra.mrb[48].mxu0 %vm1833_vm13, %v5330_v25  ;;  %v5481_v55 = vsel %vm1988_vm14, %v5330_v25, -inf }
0x32da   :  { %5482 = vmax.xlane.f32.xlu0 %v5481_v55  ;;  %8463 = vmatpush3.bf16.msra.mxu0 %v9249_v29 }
0x32db   :  { %7846 = vmatprep.subr.mxu0 %v8646_v42  ;;  %7848 = vmatprep.mubr.msk.f32.mxu0 %vm8645_vm0, %v8646_v42 }
0x32de   :  { %7847 = vmatpush3.msk.msra.mxu0 %vm1446_vm9, %v9774_v30 }
0x32df   :  { %8470 = vmatprep.subr.bf16.mxu0 %v8642_v6 }
0x32e1   :  { %7849 = vmatmul.mubr.msk.f32.vlgmr.msra.gmra.mrb[48].mxu0 %vm1442_vm10, %v9699_v0 }
0x32e2   :  { %8472 = vmatpush3.bf16.msra.mxu0 %v8928_v40  ;;  %7875 = vmatprep.mubr.msk.f32.mxu0 %vm8645_vm0, %v8646_v42 }
0x32e3   :  { %7873 = vmatprep.subr.mxu0 %v8646_v42 }
0x32e6   :  { %7874 = vmatpush3.msk.msra.mxu0 %vm752_vm3, %v9448_v54 }
0x32e7   :  { %7876 = vmatmul.mubr.msk.f32.vlgmr.msra.gmra.mrb[50].mxu0 %vm739_vm4, %v5037_v14  ;;  %8479 = vmatprep.subr.bf16.mxu0 %v8642_v6 }
0x32e8   :  { %8481 = vmatpush3.bf16.msra.mxu0 %v8963_v57  ;;  %7897 = vmatprep.mubr.msk.f32.mxu0 %vm8645_vm0, %v8646_v42 }
0x32e9   :  { %8482 = vmatprep.subr.bf16.mxu0 %v8642_v6 }
0x32ec   :  { %8484 = vmatpush3.bf16.msra.mxu0 %v8968_v63 }
0x32ed   :  { %8491 = vmatprep.subr.bf16.mxu0 %v8642_v6 }
0x32ef   :  { %7898 = vmatmul.mubr.msk.f32.vlgmr.msra.gmra.mrb[52].mxu0 %vm999_vm5, %v9659_v10 }
0x32f0   :  { %8493 = vmatpush3.bf16.msra.mxu0 %v9031_v52  ;;  %7919 = vmatprep.mubr.msk.f32.mxu0 %vm8645_vm0, %v8646_v42 }
0x32f1   :  { %8494 = vmatprep.subr.bf16.mxu0 %v8642_v6 }
0x32f4   :  { %8496 = vmatpush3.bf16.msra.mxu0 %v9041_v56 }
0x32f5   :  { %8503 = vmatprep.subr.bf16.mxu0 %v8642_v6 }
0x3367   :  { %v5483_v40 = vpop.xlane.xlu0 %5482 }
0x3368   :  { %vm5484_vm8 = vcmp.eq.f32.partialorder %v5330_v25, %v5483_v40 }
0x3369   :  { %v5485_v57 = vsel %vm5484_vm8, %v9099_v39, 34 }
0x336a   :  { %v5486_v63 = vsel %vm1988_vm14, %v5485_v57, 2147483647 }
0x336b   :  { %v5488_v54 = vshra.s32 %v5486_v63, 16  ;;  %v5487_v53 = vand.u32 65535, %v5486_v63 }
0x336d   :  { %v5490_v0 = vcvt.s32.f32 %v5488_v54  ;;  %v5489_v5 = vcvt.s32.f32 %v5487_v53 }
0x336f   :  { %5491 = vmin.xlane.f32.xlu1 %v5490_v0 }
0x33b4   :  { %v5475_v58 = vpop.f32.mrb[48].mxu0 }
0x33b5   :  { %6792 = vst [vmem:[%s9296_s30 + $0x6] sm:$0x3] %v5475_v58  ;;  %v7850_v52 = vpop.f32.mrb[49].mxu0 }
0x33ba   :  { %v5716_v36 = vpop.f32.mrb[50].mxu0 }
0x33bb   :  { %v7877_v50 = vpop.f32.mrb[51].mxu0 }
0x33c2   :  { %v5858_v41 = vpop.f32.mrb[52].mxu0 }
0x33c3   :  { %v7899_v14 = vpop.f32.mrb[53].mxu0  ;;  %v5859_v57 = vadd.f32 %v9501_v22, %v5858_v41 }
0x33fc   :  { %v5492_v56 = vpop.xlane.xlu1 %5491 }
0x33fd   :  { %vm5493_vm11 = vcmp.eq.f32.partialorder %v5490_v0, %v5492_v56  ;;  %v5498_v15 = vcvt.f32.s32 %v5492_v56 }
0x33fe   :  { %v5494_v26 = vsel %vm5493_vm11, %v5489_v5, inf }
0x33ff   :  { %5495 = vmin.xlane.f32.xlu0 %v5494_v26  ;;  %v5499_v20 = vshll.u32 %v5498_v15, 16 }
0x348c   :  { %v5496_v46 = vpop.xlane.xlu0 %5495 }
0x348d   :  { %v5497_v43 = vcvt.f32.s32 %v5496_v46 }
0x348f   :  { %v5500_v16 = vadd.s32 %v5499_v20, %v5497_v43 }
0x3491   :  { %vm5501_vm14 = vcmp.eq.s32.totalorder %v9099_v39, %v5500_v16 }
0x3492   :  { %v6793_v34 = vsel %vm5501_vm14, 1.0, %v8646_v42 }
0x3493   :  { %7862 = vmatmul.mubr.msk.f32.vlgmr.msra.gmra.mrb[70].mxu1 %vm1833_vm13, %v6793_v34 }
0x3494   :  { %7865 = vmatpush3.msra.mxu1 %v9475_v2  ;;  %7866 = vmatprep.mubr.msk.f32.mxu1 %vm8645_vm0, %v8646_v42 }
0x3495   :  { %8473 = vmatprep.subr.bf16.mxu1 %v8642_v6 }
0x3566   :  { %v5573_v31 = vpop.f32.mrb[70].mxu1 }
0x3567   :  { %v7863_v62 = vpop.f32.mrb[71].mxu1  ;;  %7867 = vmatmul.mubr.msk.f32.vlgmr.msra.gmra.mrb[72].mxu1 %vm849_vm2, %v5573_v31 }
0x3568   :  { %8475 = vmatpush3.bf16.msra.mxu1 %v8941_v45  ;;  %7886 = vmatprep.mubr.msk.f32.mxu1 %vm8645_vm0, %v8646_v42 }
0x3569   :  { %8476 = vmatprep.subr.bf16.mxu1 %v8642_v6 }
0x356c   :  { %8478 = vmatpush3.bf16.msra.mxu1 %v8953_v49 }
0x356d   :  { %8485 = vmatprep.subr.bf16.mxu1 %v8642_v6 }
0x356f   :  { %7887 = vmatmul.mubr.msk.f32.vlgmr.msra.gmra.mrb[74].mxu1 %vm999_vm5, %v9659_v10 }
0x3570   :  { %8487 = vmatpush3.bf16.msra.mxu1 %v9000_v24  ;;  %7908 = vmatprep.mubr.msk.f32.mxu1 %vm8645_vm0, %v8646_v42 }
0x3571   :  { %8488 = vmatprep.subr.bf16.mxu1 %v8642_v6 }
0x3574   :  { %8490 = vmatpush3.bf16.msra.mxu1 %v9004_v27 }
0x3575   :  { %8497 = vmatprep.subr.bf16.mxu1 %v8642_v6 }
0x363a   :  { %v5646_v45 = vpop.f32.mrb[72].mxu1 }
0x363b   :  { %v5717_v2 = vadd.f32 %v5716_v36, %v5646_v45  ;;  %v7868_v11 = vpop.f32.mrb[73].mxu1 }
0x3642   :  { %v5786_v49 = vpop.f32.mrb[74].mxu1 }
0x3643   :  { %v5790_v48 = vadd.f32 %v5786_v49, %v5717_v2  ;;  %v7888_v51 = vpop.f32.mrb[75].mxu1 }
0x3645   :  { %v5791_v25 = vadd.f32 %v9497_v1, %v5790_v48 }
0x3647   :  { %v5862_v10 = vsub.f32 0.0, %v5791_v25 }
0x3649   :  { %v5863_v32 = vmul.f32 1.442695, %v5862_v10 }
0x364b   :  { %8618 = vpow2.f32 %v5863_v32 }
0x3655   :  { %v8619_v24 = vpop.eup %8618 }
0x3656   :  { %v5865_v55 = vadd.f32 1.0, %v8619_v24 }
0x3658   :  { %8620 = vrcp.f32 %v5865_v55 }
0x3662   :  { %v8621_v40 = vpop.eup %8620 }
0x3663   :  { %v6801_v27 = vadd.f32 -1.0, %v8621_v40  ;;  %v5876_v1 = vsub.f32 1.0, %v8621_v40  ;;  %v5882_v36 = vmul.f32 %v8621_v40, %v9655_v18 }
0x3665   :  { %v5869_v63 = vmul.f32 %v6801_v27, %v5859_v57 }
0x3667   :  { %5871 = vrot.lane.b32.xlu1 %v5869_v63, %s8658_s5 }
0x36d9   :  { %v5872_v54 = vpop.permute.xlu1 %5871 }
0x36da   :  { %v5874_v0 = vadd.f32 %v5872_v54, %v5791_v25 }
0x36dc   :  { %8622 = vtanh.f32 %v5874_v0 }
0x36e6   :  { %v8623_v58 = vpop.eup %8622 }
0x36e7   :  { %5878 = vrot.lane.b32.xlu0 %v8623_v58, %s8660_s10 }
0x3759   :  { %v5879_v52 = vpop.permute.xlu0 %5878 }
0x375a   :  { %v5881_v50 = vmul.f32 %v5879_v52, %v5876_v1 }
0x375c   :  { %v5883_v14 = vadd.f32 %v5882_v36, %v5881_v50 }
0x375e   :  { %5885 = vrot.lane.b32.xlu1 %v5883_v14, %s8660_s10 }
0x37d0   :  { %v5886_v53 = vpop.permute.xlu1 %5885 }
0x37d1   :  { %7909 = vmatmul.mubr.msk.f32.vlgmr.msra.gmra.mrb[76].mxu1 %vm999_vm5, %v5886_v53 }
0x37d2   :  { %8499 = vmatpush3.bf16.msra.mxu1 %v9060_v19  ;;  %7930 = vmatprep.mubr.msk.f32.mxu1 %vm8645_vm0, %v8646_v42 }
0x37d3   :  { %8500 = vmatprep.subr.bf16.mxu1 %v8642_v6 }
0x37d6   :  { %8502 = vmatpush3.bf16.msra.mxu1 %v9064_v23 }
0x37d7   :  { %8506 = vmatprep.subr.bf16.mxu1 %v8642_v6 }
0x38a4   :  { %v5955_v22 = vpop.f32.mrb[76].mxu1 }
0x38a5   :  { %v5956_v18 = vadd.f32 %v9670_v59, %v5955_v22  ;;  %v7910_v41 = vpop.f32.mrb[77].mxu1 }
0x38a7   :  { %v5959_v56 = vmax.f32 %v5956_v18, 0.0 }
0x38a9   :  { %7920 = vmatmul.mubr.msk.f32.vlgmr.msra.gmra.mrb[54].mxu0 %vm999_vm5, %v5959_v56 }
0x38aa   :  { %8505 = vmatpush3.bf16.msra.mxu0 %v9110_v61  ;;  %7939 = vmatprep.mubr.msk.f32.mxu0 %vm8645_vm0, %v8646_v42 }
0x38ab   :  { %7937 = vmatprep.subr.mxu0 %v8646_v42 }
0x38ae   :  { %7938 = vmatpush3.msk.msra.mxu0 %vm1446_vm9, %v9679_v12 }
0x38af   :  { %8509 = vmatprep.subr.bf16.mxu0 %v8642_v6 }
0x397c   :  { %v6029_v19 = vpop.f32.mrb[54].mxu0 }
0x397d   :  { %v6030_v23 = vadd.f32 %v9685_v13, %v6029_v19  ;;  %v7921_v59 = vpop.f32.mrb[55].mxu0 }
0x397f   :  { %v6033_v5 = vmax.f32 %v6030_v23, 0.0 }
0x3981   :  { %7931 = vmatmul.mubr.msk.f32.vlgmr.msra.gmra.mrb[78].mxu1 %vm999_vm5, %v6033_v5 }
0x3982   :  { %8508 = vmatpush3.bf16.msra.mxu1 %v9127_v9  ;;  %7948 = vmatprep.mubr.msk.f32.mxu1 %vm8645_vm0, %v8646_v42 }
0x3983   :  { %7946 = vmatprep.subr.mxu1 %v8646_v42 }
0x3986   :  { %7947 = vmatpush3.msk.msra.mxu1 %vm752_vm3, %v9694_v37 }
0x3987   :  { %8515 = vmatprep.subr.bf16.mxu1 %v8642_v6 }
0x3a54   :  { %v9859_v61 = vpop.f32.mrb[78].mxu1 }
0x3a55   :  { %v6107_v12 = vadd.f32 %v9702_v8, %v9859_v61  ;;  %v7932_v13 = vpop.f32.mrb[79].mxu1 }
0x3a57   :  { %v6108_v26 = vsel %vm1418_vm6, %v6107_v12, -inf }
0x3a58   :  { %6109 = vmax.xlane.f32.xlu1 %v6108_v26 }
0x3ae5   :  { %v6110_v9 = vpop.xlane.xlu1 %6109 }
0x3ae6   :  { %vm6111_vm2 = vcmp.eq.f32.partialorder %v6107_v12, %v6110_v9 }
0x3ae7   :  { %v6112_v15 = vsel %vm6111_vm2, %v9099_v39, 22 }
0x3ae8   :  { %v6113_v46 = vsel %vm1418_vm6, %v6112_v15, 2147483647 }
0x3ae9   :  { %v6115_v20 = vshra.s32 %v6113_v46, 16  ;;  %v6114_v37 = vand.u32 65535, %v6113_v46 }
0x3aeb   :  { %v6117_v43 = vcvt.s32.f32 %v6115_v20  ;;  %v6116_v34 = vcvt.s32.f32 %v6114_v37 }
0x3aed   :  { %6118 = vmin.xlane.f32.xlu0 %v6117_v43 }
0x3b7a   :  { %v6119_v16 = vpop.xlane.xlu0 %6118 }
0x3b7b   :  { %vm6120_vm3 = vcmp.eq.f32.partialorder %v6117_v43, %v6119_v16  ;;  %v6125_v8 = vcvt.f32.s32 %v6119_v16 }
0x3b7c   :  { %v6121_v31 = vsel %vm6120_vm3, %v6116_v34, inf }
0x3b7d   :  { %6122 = vmin.xlane.f32.xlu0 %v6121_v31  ;;  %v6126_v45 = vshll.u32 %v6125_v8, 16 }
0x3c0a   :  { %v6123_v62 = vpop.xlane.xlu0 %6122 }
0x3c0b   :  { %v6124_v2 = vcvt.f32.s32 %v6123_v62 }
0x3c0d   :  { %v6127_v11 = vadd.s32 %v6126_v45, %v6124_v2 }
0x3c0f   :  { %vm6128_vm15 = vcmp.eq.s32.totalorder %v9099_v39, %v6127_v11 }
0x3c10   :  { %v6805_v49 = vsel %vm6128_vm15, 1.0, %v8646_v42 }
0x3c11   :  { %7940 = vmatmul.mubr.msk.f32.vlgmr.msra.gmra.mrb[56].mxu0 %vm1442_vm10, %v6805_v49 }
0x3c12   :  { %8511 = vmatpush3.bf16.msra.mxu0 %v9145_v47  ;;  %7959 = vmatprep.mubr.msk.f32.mxu0 %vm8645_vm0, %v8646_v42 }
0x3c13   :  { %8512 = vmatprep.subr.bf16.mxu0 %v8642_v6 }
0x3c16   :  { %8514 = vmatpush3.bf16.msra.mxu0 %v9152_v21 }
0x3c17   :  { %8521 = vmatprep.subr.bf16.mxu0 %v8642_v6 }
0x3c19   :  { %7960 = vmatmul.mubr.msk.f32.vlgmr.msra.gmra.mrb[58].mxu0 %vm999_vm5, %v6033_v5 }
0x3c1a   :  { %8523 = vmatpush3.bf16.msra.mxu0 %v9178_v38  ;;  %7981 = vmatprep.mubr.msk.f32.mxu0 %vm8645_vm0, %v8646_v42 }
0x3c1b   :  { %8524 = vmatprep.subr.bf16.mxu0 %v8642_v6 }
0x3c1e   :  { %8526 = vmatpush3.bf16.msra.mxu0 %v9194_v60 }
0x3ce4   :  { %v6200_v39 = vpop.f32.mrb[56].mxu0 }
0x3ce5   :  { %v7941_v47 = vpop.f32.mrb[57].mxu0  ;;  %7949 = vmatmul.mubr.msk.f32.vlgmr.msra.gmra.mrb[80].mxu1 %vm739_vm4, %v6200_v39 }
0x3ce6   :  { %8517 = vmatpush3.bf16.msra.mxu1 %v9167_v28  ;;  %7970 = vmatprep.mubr.msk.f32.mxu1 %vm8645_vm0, %v8646_v42 }
0x3ce7   :  { %8518 = vmatprep.subr.bf16.mxu1 %v8642_v6 }
0x3cea   :  { %8520 = vmatpush3.bf16.msra.mxu1 %v9171_v35 }
0x3ceb   :  { %8527 = vmatprep.subr.bf16.mxu1 %v8642_v6 }
0x3cec   :  { %v6343_v21 = vpop.f32.mrb[58].mxu0 }
0x3ced   :  { %v7961_v38 = vpop.f32.mrb[59].mxu0 }
0x3db8   :  { %v6273_v48 = vpop.f32.mrb[80].mxu1 }
0x3db9   :  { %v6344_v51 = vadd.f32 %v6343_v21, %v6273_v48  ;;  %v7950_v60 = vpop.f32.mrb[81].mxu1 }
0x3dbb   :  { %v6347_v25 = vadd.f32 %v9733_v17, %v6344_v51 }
0x3dbd   :  { %v6348_v10 = vmax.f32 %v6347_v25, 0.0 }
0x3dbf   :  { %7971 = vmatmul.mubr.msk.f32.vlgmr.msra.gmra.mrb[82].mxu1 %vm999_vm5, %v6348_v10 }
0x3dc0   :  { %8529 = vmatpush3.bf16.msra.mxu1 %v9206_v4  ;;  %7994 = vmatprep.mubr.msk.f32.mxu1 %vm8645_vm0, %v8646_v42 }
0x3dc1   :  { %8530 = vmatprep.subr.bf16.mxu1 %v8642_v6 }
0x3dc4   :  { %8532 = vmatpush3.bf16.msra.mxu1 %v9210_v7 }
0x3dc5   :  { %7992 = vmatprep.subr.mxu1 %v8646_v42 }
0x3dc8   :  { %7993 = vmatpush3.msk.msra.mxu1 %vm1837_vm12, %v9744_v33 }
0x3dc9   :  { %8533 = vmatprep.subr.bf16.mxu1 %v8642_v6 }
0x3e92   :  { %v6418_v28 = vpop.f32.mrb[82].mxu1 }
0x3e93   :  { %v6419_v35 = vadd.f32 %v9750_v44, %v6418_v28  ;;  %v7972_v17 = vpop.f32.mrb[83].mxu1 }
0x3e95   :  { %v6422_v4 = vmax.f32 %v6419_v35, 0.0 }
0x3e97   :  { %7982 = vmatmul.mubr.msk.f32.vlgmr.msra.gmra.mrb[60].mxu0 %vm999_vm5, %v6422_v4 }
0x3f6a   :  { %v6492_v32 = vpop.f32.mrb[60].mxu0 }
0x3f6b   :  { %v6493_v24 = vadd.f32 %v9764_v3, %v6492_v32  ;;  %v7983_v55 = vpop.f32.mrb[61].mxu0 }
0x3f6d   :  { %7995 = vmatmul.mubr.msk.f32.vlgmr.msra.gmra.mrb[84].mxu1 %vm1833_vm13, %v6493_v24 }
0x3f6e   :  { %8535 = vmatpush3.bf16.msra.mxu1 %v9249_v29  ;;  %8003 = vmatprep.mubr.msk.f32.mxu1 %vm8645_vm0, %v8646_v42 }
0x3f6f   :  { %8001 = vmatprep.subr.mxu1 %v8646_v42 }
0x3f72   :  { %8002 = vmatpush3.msk.msra.mxu1 %vm1446_vm9, %v9774_v30 }
0x3f75   :  { %8004 = vmatmul.mubr.msk.f32.vlgmr.msra.gmra.mrb[84].mxu1 %vm1442_vm10, %v9859_v61 }
0x4048   :  { %v6638_v6 = vpop.f32.mrb[84].mxu1 }
0x4049   :  { %6817 = vst [vmem:[%s9296_s30 + $0x8] sm:$0x3] %v6638_v6  ;;  %v8005_v7 = vpop.f32.mrb[85].mxu1 }

</bundles_post_ra>
